<compile_context>
chip_gen: v7x
topology: tpu7x:2x2x1
jax: 0.10.0
libtpu: 0.0.40
codegen_flags: <defaults>
</compile_context>

<pallas_src>
import jax
import jax.numpy as jnp
from jax.experimental import pallas as pl
from jax.experimental.pallas import tpu as pltpu

EPS = 1e-5  # PyTorch BatchNorm2d default


def _conv3x3_bn_relu(src, w2d, scale, shift):
    """3x3 conv as a single im2col matmul (K = 9*C), then folded-BN affine and
    ReLU.  H padding is supplied by the caller via halo rows ("valid" in H);
    W is zero-padded here (conv padding=1 along W).

    src:   (Hs, Ws, C) bf16   (Hs includes one halo row on each side)
    w2d:   (9*C, Cout) bf16   (HWIO weight flattened row-major over (dy, dx, c))
    scale, shift: (1, Cout) f32
    returns (Hs - 2, Ws, Cout) f32
    """
    Hs, Ws, C = src.shape
    Cout = w2d.shape[1]
    Ho = Hs - 2
    padded = jnp.pad(src, ((0, 0), (1, 1), (0, 0)))
    # im2col patch slab; tap order (dy, dx, c) matches w.reshape(9*C, Cout).
    taps = [padded[dy:dy + Ho, dx:dx + Ws, :]
            for dy in range(3) for dx in range(3)]
    patches = jnp.concatenate(taps, axis=-1).reshape(Ho * Ws, 9 * C)
    y = jnp.dot(patches, w2d, preferred_element_type=jnp.float32)
    y = jnp.maximum(y * scale + shift, 0.0)
    return y.reshape(Ho, Ws, Cout)


def _down_kernel(xt_ref, xm_ref, xb_ref, w1_ref, s1_ref, t1_ref,
                 w2_ref, s2_ref, t2_ref, o_ref):
    s = pl.program_id(1)
    T, W2, Cout = o_ref.shape
    Cin = xm_ref.shape[-1]
    H2 = pl.num_programs(1) * T

    # Assemble the halo'd input strip: 4 halo rows | 2*T main rows | 4 halo rows.
    x_strip = jnp.concatenate([xt_ref[...], xm_ref[...], xb_ref[...]], axis=0)

    # MaxPool2d(2): contiguous reshape reduce (no strided sublane reads).
    pooled = jnp.max(x_strip.reshape(T + 4, 2, W2, 2, Cin), axis=(1, 3))

    # Pooled halo rows that fall outside the image are conv1's zero padding.
    # Interior strip seams keep the real neighbour rows.
    p_row = s * T - 2 + jax.lax.broadcasted_iota(jnp.int32, (T + 4, 1, 1), 0)
    pooled = jnp.where((p_row >= 0) & (p_row < H2), pooled,
                       jnp.zeros_like(pooled)).astype(jnp.bfloat16)

    # Conv1 (3x3, pad 1) + folded BN + ReLU -> h1 rows [s*T - 1, s*T + T + 1).
    h1 = _conv3x3_bn_relu(pooled, w1_ref[...], s1_ref[...], t1_ref[...])
    # Rows outside the image are conv2's zero padding; they must be exactly 0
    # (the folded-BN shift would otherwise leak through the border rows).
    h_row = s * T - 1 + jax.lax.broadcasted_iota(jnp.int32, (T + 2, 1, 1), 0)
    h1 = jnp.where((h_row >= 0) & (h_row < H2), h1, jnp.zeros_like(h1))

    # Conv2 (3x3, pad 1) + folded BN + ReLU -> the T output rows of this strip.
    h2 = _conv3x3_bn_relu(h1.astype(jnp.bfloat16), w2_ref[...],
                          s2_ref[...], t2_ref[...])
    o_ref[...] = h2.astype(o_ref.dtype)


def _pick_tile_h(h2, target=32):
    """Largest even divisor of h2 that is <= target (strip height in output rows)."""
    best = 2
    for t in range(2, min(h2, target) + 1, 2):
        if h2 % t == 0:
            best = t
    return best


def down_forward_nhwc(x_nhwc, w1, s1, t1, w2, s2, t2, *, tile_h=None):
    """Core NHWC kernel.  x_nhwc: (N, H, W, Cin); w*: (3,3,C,Cout) HWIO conv
    weights; s*/t*: folded eval-mode BatchNorm scale/shift (Cout,).
    Returns (N, H//2, W//2, Cout) f32."""
    N, H, W, Cin = x_nhwc.shape
    Cout = w1.shape[3]
    assert H % 4 == 0 and W % 2 == 0, "kernel assumes H % 4 == 0 and even W"
    H2, W2 = H // 2, W // 2

    if tile_h is None:
        tile_h = _pick_tile_h(H2)
    assert H2 % tile_h == 0 and tile_h % 2 == 0, (H2, tile_h)
    n_strips = H2 // tile_h
    half_t = tile_h // 2          # halo block-index stride (4 input rows / block)
    max_hblk = H // 4 - 1         # last valid 4-row input block index

    x = x_nhwc.astype(jnp.bfloat16)                      # bf16 input stream
    w1r = w1.astype(jnp.bfloat16).reshape(9 * Cin, Cout)
    w2r = w2.astype(jnp.bfloat16).reshape(9 * Cout, Cout)
    s1r = jnp.asarray(s1, jnp.float32).reshape(1, Cout)
    t1r = jnp.asarray(t1, jnp.float32).reshape(1, Cout)
    s2r = jnp.asarray(s2, jnp.float32).reshape(1, Cout)
    t2r = jnp.asarray(t2, jnp.float32).reshape(1, Cout)

    # Halo index maps: clamped at the image border; the kernel masks the
    # (then meaningless) clamped rows back to zero padding.
    def top_map(b, s):
        return (b, jnp.maximum(s * half_t - 1, 0), 0, 0)

    def mid_map(b, s):
        return (b, s, 0, 0)

    def bot_map(b, s):
        return (b, jnp.minimum((s + 1) * half_t, max_hblk), 0, 0)

    def const_map(b, s):
        return (0, 0)

    out = pl.pallas_call(
        _down_kernel,
        out_shape=jax.ShapeDtypeStruct((N, H2, W2, Cout), jnp.float32),
        grid_spec=pltpu.PrefetchScalarGridSpec(
            num_scalar_prefetch=0,
            grid=(N, n_strips),
            in_specs=[
                pl.BlockSpec((None, 4, W, Cin), top_map),            # top halo
                pl.BlockSpec((None, 2 * tile_h, W, Cin), mid_map),   # main strip
                pl.BlockSpec((None, 4, W, Cin), bot_map),            # bottom halo
                pl.BlockSpec((9 * Cin, Cout), const_map),            # conv1 weight
                pl.BlockSpec((1, Cout), const_map),                  # bn1 scale
                pl.BlockSpec((1, Cout), const_map),                  # bn1 shift
                pl.BlockSpec((9 * Cout, Cout), const_map),           # conv2 weight
                pl.BlockSpec((1, Cout), const_map),                  # bn2 scale
                pl.BlockSpec((1, Cout), const_map),                  # bn2 shift
            ],
            out_specs=pl.BlockSpec((None, tile_h, W2, Cout), mid_map)),
        compiler_params=pltpu.CompilerParams(
            dimension_semantics=("parallel", "parallel"),
            vmem_limit_bytes=32 * 1024 * 1024),
    )(x, x, x, w1r, s1r, t1r, w2r, s2r, t2r)
    return out


def down_forward(x_nchw, w1, s1, t1, w2, s2, t2, *, tile_h=None):
    """PyTorch-layout wrapper: (N, Cin, H, W) in, (N, Cout, H//2, W//2) out.
    The NCHW<->NHWC transposes are boundary glue for parity testing only."""
    x = jnp.transpose(x_nchw, (0, 2, 3, 1))
    out = down_forward_nhwc(x, w1, s1, t1, w2, s2, t2, tile_h=tile_h)
    return jnp.transpose(out, (0, 3, 1, 2))


def _fold_bn(bias, gamma, beta, mean, var):
    # BN(conv_nobias + bias) = scale * conv_nobias + shift  (eval mode)
    scale = gamma / jnp.sqrt(var + EPS)
    shift = scale * (bias - mean) + beta
    return scale, shift


def _reference(x_nchw, raw):
    # Pure-JAX reference mirroring the PyTorch Down forward (BN in eval mode).
    w1, b1, g1, be1, m1, v1, w2, b2, g2, be2, m2, v2 = raw
    xp = jax.lax.reduce_window(x_nchw, -jnp.inf, jax.lax.max,
                               (1, 1, 2, 2), (1, 1, 2, 2), 'VALID')

    def conv_bn_relu(h, w_hwio, b, g, be, m, v):
        y = jax.lax.conv_general_dilated(
            h, w_hwio, (1, 1), 'SAME',
            dimension_numbers=('NCHW', 'HWIO', 'NCHW'))
        y = y + b[None, :, None, None]
        y = (y - m[None, :, None, None]) / jnp.sqrt(v[None, :, None, None] + EPS)
        y = y * g[None, :, None, None] + be[None, :, None, None]
        return jnp.maximum(y, 0.0)

    h = conv_bn_relu(xp, w1, b1, g1, be1, m1, v1)
    return conv_bn_relu(h, w2, b2, g2, be2, m2, v2)


if __name__ == "__main__":
    N, Cin, H, W = 2, 4, 16, 16
    Cout = 8

    key = jax.random.PRNGKey(0)
    keys = jax.random.split(key, 16)

    x = jax.random.normal(keys[0], (N, Cin, H, W), jnp.float32)

    # Deterministic synthetic parameters (HWIO conv weights, eval-mode BN).
    w1 = 0.2 * jax.random.normal(keys[1], (3, 3, Cin, Cout), jnp.float32)
    b1 = 0.1 * jax.random.normal(keys[2], (Cout,), jnp.float32)
    g1 = 1.0 + 0.1 * jax.random.normal(keys[3], (Cout,), jnp.float32)
    be1 = 0.1 * jax.random.normal(keys[4], (Cout,), jnp.float32)
    m1 = 0.1 * jax.random.normal(keys[5], (Cout,), jnp.float32)
    v1 = 1.0 + 0.1 * jax.nn.softplus(jax.random.normal(keys[6], (Cout,), jnp.float32))

    w2 = 0.2 * jax.random.normal(keys[7], (3, 3, Cout, Cout), jnp.float32)
    b2 = 0.1 * jax.random.normal(keys[8], (Cout,), jnp.float32)
    g2 = 1.0 + 0.1 * jax.random.normal(keys[9], (Cout,), jnp.float32)
    be2 = 0.1 * jax.random.normal(keys[10], (Cout,), jnp.float32)
    m2 = 0.1 * jax.random.normal(keys[11], (Cout,), jnp.float32)
    v2 = 1.0 + 0.1 * jax.nn.softplus(jax.random.normal(keys[12], (Cout,), jnp.float32))

    s1, t1 = _fold_bn(b1, g1, be1, m1, v1)
    s2, t2 = _fold_bn(b2, g2, be2, m2, v2)

    ref = _reference(x, (w1, b1, g1, be1, m1, v1, w2, b2, g2, be2, m2, v2))
    ref = jax.block_until_ready(ref)

    run = jax.jit(down_forward, static_argnames=("tile_h",))
    # H2 = 8: exercise single-strip, 2-strip and 4-strip tilings (seam halos).
    for th in (8, 4, 2):
        out = run(x, w1, s1, t1, w2, s2, t2, tile_h=th)
        out = jax.block_until_ready(out)
        assert out.shape == (N, Cout, H // 2, W // 2), out.shape
        # bf16 MXU operands (input, weights, inter-stage activations) with f32
        # accumulation vs an all-f32 reference: tolerance sized for ~2^-8
        # relative operand quantization through two chained 3x3 convs.
        max_err = float(jnp.max(jnp.abs(out - ref)))
        assert bool(jnp.allclose(out, ref, atol=7.5e-2, rtol=5e-2)), (th, max_err)

    print("KERNEL_OK")
</pallas_src>

<mosaic_0001>
module attributes {stable_mosaic.version = 11 : i64} {
  func.func @_down_kernel(%arg0: i32, %arg1: i32, %arg2: memref<1x4x16x4xbf16, #tpu.memory_space<vmem>>, %arg3: memref<1x16x16x4xbf16, #tpu.memory_space<vmem>>, %arg4: memref<1x4x16x4xbf16, #tpu.memory_space<vmem>>, %arg5: memref<36x8xbf16, #tpu.memory_space<vmem>>, %arg6: memref<1x8xf32, #tpu.memory_space<vmem>>, %arg7: memref<1x8xf32, #tpu.memory_space<vmem>>, %arg8: memref<72x8xbf16, #tpu.memory_space<vmem>>, %arg9: memref<1x8xf32, #tpu.memory_space<vmem>>, %arg10: memref<1x8xf32, #tpu.memory_space<vmem>>, %arg11: memref<1x8x8x8xf32, #tpu.memory_space<vmem>>) attributes {dimension_semantics = [#tpu.dimension_semantics<parallel>, #tpu.dimension_semantics<parallel>], iteration_bounds = array<i64: 2, 1>, scalar_prefetch = 0 : i64, scratch_operands = 0 : i64, tpu.core_type = #tpu.core_type<tc>, window_params = [{transform_indices = @transform_0, window_bounds = array<i64: 1, 4, 16, 4>}, {transform_indices = @transform_1, window_bounds = array<i64: 1, 16, 16, 4>}, {transform_indices = @transform_2, window_bounds = array<i64: 1, 4, 16, 4>}, {pipeline_mode = #tpu.pipeline_mode<synchronous>, transform_indices = @transform_3, window_bounds = array<i64: 36, 8>}, {pipeline_mode = #tpu.pipeline_mode<synchronous>, transform_indices = @transform_4, window_bounds = array<i64: 1, 8>}, {pipeline_mode = #tpu.pipeline_mode<synchronous>, transform_indices = @transform_5, window_bounds = array<i64: 1, 8>}, {pipeline_mode = #tpu.pipeline_mode<synchronous>, transform_indices = @transform_6, window_bounds = array<i64: 72, 8>}, {pipeline_mode = #tpu.pipeline_mode<synchronous>, transform_indices = @transform_7, window_bounds = array<i64: 1, 8>}, {pipeline_mode = #tpu.pipeline_mode<synchronous>, transform_indices = @transform_8, window_bounds = array<i64: 1, 8>}, {transform_indices = @transform_9, window_bounds = array<i64: 1, 8, 8, 8>}]} {
    %c0 = arith.constant 0 : index
    %c0_0 = arith.constant 0 : index
    %c0_1 = arith.constant 0 : index
    %c0_2 = arith.constant 0 : index
    %0 = vector.load %arg2[%c0, %c0_0, %c0_1, %c0_2] : memref<1x4x16x4xbf16, #tpu.memory_space<vmem>>, vector<1x4x16x4xbf16>
    %1 = vector.shape_cast %0 : vector<1x4x16x4xbf16> to vector<4x16x4xbf16>
    %c0_3 = arith.constant 0 : index
    %c0_4 = arith.constant 0 : index
    %c0_5 = arith.constant 0 : index
    %c0_6 = arith.constant 0 : index
    %2 = vector.load %arg3[%c0_3, %c0_4, %c0_5, %c0_6] : memref<1x16x16x4xbf16, #tpu.memory_space<vmem>>, vector<1x16x16x4xbf16>
    %3 = vector.shape_cast %2 : vector<1x16x16x4xbf16> to vector<16x16x4xbf16>
    %c0_7 = arith.constant 0 : index
    %c0_8 = arith.constant 0 : index
    %c0_9 = arith.constant 0 : index
    %c0_10 = arith.constant 0 : index
    %4 = vector.load %arg4[%c0_7, %c0_8, %c0_9, %c0_10] : memref<1x4x16x4xbf16, #tpu.memory_space<vmem>>, vector<1x4x16x4xbf16>
    %5 = vector.shape_cast %4 : vector<1x4x16x4xbf16> to vector<4x16x4xbf16>
    %6 = tpu.concatenate %1, %3, %5 in 0 : vector<4x16x4xbf16>, vector<16x16x4xbf16>, vector<4x16x4xbf16> -> vector<24x16x4xbf16>
    %7 = vector.shape_cast %6 : vector<24x16x4xbf16> to vector<12x2x8x2x4xbf16>
    %cst = arith.constant dense<0xFF80> : vector<12x8x4xbf16>
    %8 = vector.multi_reduction <maximumf>, %7, %cst [1, 3] : vector<12x2x8x2x4xbf16> to vector<12x8x4xbf16>
    %c8_i32 = arith.constant 8 : i32
    %9 = arith.muli %arg1, %c8_i32 : i32
    %c2_i32 = arith.constant 2 : i32
    %10 = arith.subi %9, %c2_i32 : i32
    %11 = tpu.iota {dimensions = array<i32: 0>} : vector<12x1x1xi32>
    %12 = vector.broadcast %10 : i32 to vector<12x1x1xi32>
    %13 = arith.addi %12, %11 : vector<12x1x1xi32>
    %c0_i32 = arith.constant 0 : i32
    %14 = vector.broadcast %c0_i32 : i32 to vector<12x1x1xi32>
    %15 = arith.cmpi sge, %13, %14 : vector<12x1x1xi32>
    %c8_i32_11 = arith.constant 8 : i32
    %16 = vector.broadcast %c8_i32_11 : i32 to vector<12x1x1xi32>
    %17 = arith.cmpi slt, %13, %16 : vector<12x1x1xi32>
    %18 = arith.andi %15, %17 : vector<12x1x1xi1>
    %cst_12 = arith.constant 0.000000e+00 : bf16
    %19 = vector.broadcast %cst_12 : bf16 to vector<12x8x4xbf16>
    %20 = vector.shape_cast %18 : vector<12x1x1xi1> to vector<12x1x1xi1>
    %21 = vector.broadcast %20 : vector<12x1x1xi1> to vector<12x8x4xi1>
    %22 = arith.select %21, %8, %19 : vector<12x8x4xi1>, vector<12x8x4xbf16>
    %c0_13 = arith.constant 0 : index
    %c0_14 = arith.constant 0 : index
    %23 = vector.load %arg5[%c0_13, %c0_14] : memref<36x8xbf16, #tpu.memory_space<vmem>>, vector<36x8xbf16>
    %c0_15 = arith.constant 0 : index
    %c0_16 = arith.constant 0 : index
    %24 = vector.load %arg6[%c0_15, %c0_16] : memref<1x8xf32, #tpu.memory_space<vmem>>, vector<1x8xf32>
    %c0_17 = arith.constant 0 : index
    %c0_18 = arith.constant 0 : index
    %25 = vector.load %arg7[%c0_17, %c0_18] : memref<1x8xf32, #tpu.memory_space<vmem>>, vector<1x8xf32>
    %c0_i32_19 = arith.constant 0 : i32
    %26 = arith.sitofp %c0_i32_19 : i32 to bf16
    %27 = vector.broadcast %26 : bf16 to vector<12x1x4xbf16>
    %28 = tpu.concatenate %27, %22 in 1 : vector<12x1x4xbf16>, vector<12x8x4xbf16> -> vector<12x9x4xbf16>
    %29 = vector.broadcast %26 : bf16 to vector<12x1x4xbf16>
    %30 = tpu.concatenate %28, %29 in 1 : vector<12x9x4xbf16>, vector<12x1x4xbf16> -> vector<12x10x4xbf16>
    %31 = vector.extract_strided_slice %30 {offsets = [0, 0, 0], sizes = [10, 8, 4], strides = [1, 1, 1]} : vector<12x10x4xbf16> to vector<10x8x4xbf16>
    %32 = vector.extract_strided_slice %30 {offsets = [0, 1, 0], sizes = [10, 8, 4], strides = [1, 1, 1]} : vector<12x10x4xbf16> to vector<10x8x4xbf16>
    %33 = vector.extract_strided_slice %30 {offsets = [0, 2, 0], sizes = [10, 8, 4], strides = [1, 1, 1]} : vector<12x10x4xbf16> to vector<10x8x4xbf16>
    %34 = vector.extract_strided_slice %30 {offsets = [1, 0, 0], sizes = [10, 8, 4], strides = [1, 1, 1]} : vector<12x10x4xbf16> to vector<10x8x4xbf16>
    %35 = vector.extract_strided_slice %30 {offsets = [1, 1, 0], sizes = [10, 8, 4], strides = [1, 1, 1]} : vector<12x10x4xbf16> to vector<10x8x4xbf16>
    %36 = vector.extract_strided_slice %30 {offsets = [1, 2, 0], sizes = [10, 8, 4], strides = [1, 1, 1]} : vector<12x10x4xbf16> to vector<10x8x4xbf16>
    %37 = vector.extract_strided_slice %30 {offsets = [2, 0, 0], sizes = [10, 8, 4], strides = [1, 1, 1]} : vector<12x10x4xbf16> to vector<10x8x4xbf16>
    %38 = vector.extract_strided_slice %30 {offsets = [2, 1, 0], sizes = [10, 8, 4], strides = [1, 1, 1]} : vector<12x10x4xbf16> to vector<10x8x4xbf16>
    %39 = vector.extract_strided_slice %30 {offsets = [2, 2, 0], sizes = [10, 8, 4], strides = [1, 1, 1]} : vector<12x10x4xbf16> to vector<10x8x4xbf16>
    %40 = tpu.concatenate %31, %32, %33, %34, %35, %36, %37, %38, %39 in 2 : vector<10x8x4xbf16>, vector<10x8x4xbf16>, vector<10x8x4xbf16>, vector<10x8x4xbf16>, vector<10x8x4xbf16>, vector<10x8x4xbf16>, vector<10x8x4xbf16>, vector<10x8x4xbf16>, vector<10x8x4xbf16> -> vector<10x8x36xbf16>
    %41 = vector.shape_cast %40 : vector<10x8x36xbf16> to vector<80x36xbf16>
    %cst_20 = arith.constant dense<0.000000e+00> : vector<80x8xf32>
    %42 = tpu.matmul %41, %23, %cst_20 {dimension_numbers = #tpu.dot_dimension_numbers<[1], [0], [0], [1], [0, 0, 1, 1], [], []>} : vector<80x36xbf16>, vector<36x8xbf16>, vector<80x8xf32> -> vector<80x8xf32>
    %43 = vector.broadcast %24 : vector<1x8xf32> to vector<80x8xf32>
    %44 = arith.mulf %42, %43 : vector<80x8xf32>
    %45 = vector.broadcast %25 : vector<1x8xf32> to vector<80x8xf32>
    %46 = arith.addf %44, %45 : vector<80x8xf32>
    %cst_21 = arith.constant 0.000000e+00 : f32
    %47 = vector.broadcast %cst_21 : f32 to vector<80x8xf32>
    %48 = arith.maximumf %46, %47 : vector<80x8xf32>
    %49 = vector.shape_cast %48 : vector<80x8xf32> to vector<10x8x8xf32>
    %c8_i32_22 = arith.constant 8 : i32
    %50 = arith.muli %arg1, %c8_i32_22 : i32
    %c1_i32 = arith.constant 1 : i32
    %51 = arith.subi %50, %c1_i32 : i32
    %52 = tpu.iota {dimensions = array<i32: 0>} : vector<10x1x1xi32>
    %53 = vector.broadcast %51 : i32 to vector<10x1x1xi32>
    %54 = arith.addi %53, %52 : vector<10x1x1xi32>
    %c0_i32_23 = arith.constant 0 : i32
    %55 = vector.broadcast %c0_i32_23 : i32 to vector<10x1x1xi32>
    %56 = arith.cmpi sge, %54, %55 : vector<10x1x1xi32>
    %c8_i32_24 = arith.constant 8 : i32
    %57 = vector.broadcast %c8_i32_24 : i32 to vector<10x1x1xi32>
    %58 = arith.cmpi slt, %54, %57 : vector<10x1x1xi32>
    %59 = arith.andi %56, %58 : vector<10x1x1xi1>
    %cst_25 = arith.constant 0.000000e+00 : f32
    %60 = vector.broadcast %cst_25 : f32 to vector<10x8x8xf32>
    %61 = vector.shape_cast %59 : vector<10x1x1xi1> to vector<10x1x1xi1>
    %62 = vector.broadcast %61 : vector<10x1x1xi1> to vector<10x8x8xi1>
    %63 = arith.select %62, %49, %60 : vector<10x8x8xi1>, vector<10x8x8xf32>
    %64 = arith.truncf %63 : vector<10x8x8xf32> to vector<10x8x8xbf16>
    %c0_26 = arith.constant 0 : index
    %c0_27 = arith.constant 0 : index
    %65 = vector.load %arg8[%c0_26, %c0_27] : memref<72x8xbf16, #tpu.memory_space<vmem>>, vector<72x8xbf16>
    %c0_28 = arith.constant 0 : index
    %c0_29 = arith.constant 0 : index
    %66 = vector.load %arg9[%c0_28, %c0_29] : memref<1x8xf32, #tpu.memory_space<vmem>>, vector<1x8xf32>
    %c0_30 = arith.constant 0 : index
    %c0_31 = arith.constant 0 : index
    %67 = vector.load %arg10[%c0_30, %c0_31] : memref<1x8xf32, #tpu.memory_space<vmem>>, vector<1x8xf32>
    %c0_i32_32 = arith.constant 0 : i32
    %68 = arith.sitofp %c0_i32_32 : i32 to bf16
    %69 = vector.broadcast %68 : bf16 to vector<10x1x8xbf16>
    %70 = tpu.concatenate %69, %64 in 1 : vector<10x1x8xbf16>, vector<10x8x8xbf16> -> vector<10x9x8xbf16>
    %71 = vector.broadcast %68 : bf16 to vector<10x1x8xbf16>
    %72 = tpu.concatenate %70, %71 in 1 : vector<10x9x8xbf16>, vector<10x1x8xbf16> -> vector<10x10x8xbf16>
    %73 = vector.extract_strided_slice %72 {offsets = [0, 0, 0], sizes = [8, 8, 8], strides = [1, 1, 1]} : vector<10x10x8xbf16> to vector<8x8x8xbf16>
    %74 = vector.extract_strided_slice %72 {offsets = [0, 1, 0], sizes = [8, 8, 8], strides = [1, 1, 1]} : vector<10x10x8xbf16> to vector<8x8x8xbf16>
    %75 = vector.extract_strided_slice %72 {offsets = [0, 2, 0], sizes = [8, 8, 8], strides = [1, 1, 1]} : vector<10x10x8xbf16> to vector<8x8x8xbf16>
    %76 = vector.extract_strided_slice %72 {offsets = [1, 0, 0], sizes = [8, 8, 8], strides = [1, 1, 1]} : vector<10x10x8xbf16> to vector<8x8x8xbf16>
    %77 = vector.extract_strided_slice %72 {offsets = [1, 1, 0], sizes = [8, 8, 8], strides = [1, 1, 1]} : vector<10x10x8xbf16> to vector<8x8x8xbf16>
    %78 = vector.extract_strided_slice %72 {offsets = [1, 2, 0], sizes = [8, 8, 8], strides = [1, 1, 1]} : vector<10x10x8xbf16> to vector<8x8x8xbf16>
    %79 = vector.extract_strided_slice %72 {offsets = [2, 0, 0], sizes = [8, 8, 8], strides = [1, 1, 1]} : vector<10x10x8xbf16> to vector<8x8x8xbf16>
    %80 = vector.extract_strided_slice %72 {offsets = [2, 1, 0], sizes = [8, 8, 8], strides = [1, 1, 1]} : vector<10x10x8xbf16> to vector<8x8x8xbf16>
    %81 = vector.extract_strided_slice %72 {offsets = [2, 2, 0], sizes = [8, 8, 8], strides = [1, 1, 1]} : vector<10x10x8xbf16> to vector<8x8x8xbf16>
    %82 = tpu.concatenate %73, %74, %75, %76, %77, %78, %79, %80, %81 in 2 : vector<8x8x8xbf16>, vector<8x8x8xbf16>, vector<8x8x8xbf16>, vector<8x8x8xbf16>, vector<8x8x8xbf16>, vector<8x8x8xbf16>, vector<8x8x8xbf16>, vector<8x8x8xbf16>, vector<8x8x8xbf16> -> vector<8x8x72xbf16>
    %83 = vector.shape_cast %82 : vector<8x8x72xbf16> to vector<64x72xbf16>
    %cst_33 = arith.constant dense<0.000000e+00> : vector<64x8xf32>
    %84 = tpu.matmul %83, %65, %cst_33 {dimension_numbers = #tpu.dot_dimension_numbers<[1], [0], [0], [1], [0, 0, 1, 1], [], []>} : vector<64x72xbf16>, vector<72x8xbf16>, vector<64x8xf32> -> vector<64x8xf32>
    %85 = vector.broadcast %66 : vector<1x8xf32> to vector<64x8xf32>
    %86 = arith.mulf %84, %85 : vector<64x8xf32>
    %87 = vector.broadcast %67 : vector<1x8xf32> to vector<64x8xf32>
    %88 = arith.addf %86, %87 : vector<64x8xf32>
    %cst_34 = arith.constant 0.000000e+00 : f32
    %89 = vector.broadcast %cst_34 : f32 to vector<64x8xf32>
    %90 = arith.maximumf %88, %89 : vector<64x8xf32>
    %91 = vector.shape_cast %90 : vector<64x8xf32> to vector<8x8x8xf32>
    %c0_35 = arith.constant 0 : index
    %c0_36 = arith.constant 0 : index
    %c0_37 = arith.constant 0 : index
    %c0_38 = arith.constant 0 : index
    %92 = vector.load %arg11[%c0_35, %c0_36, %c0_37, %c0_38] : memref<1x8x8x8xf32, #tpu.memory_space<vmem>>, vector<1x8x8x8xf32>
    %93 = vector.shape_cast %92 : vector<1x8x8x8xf32> to vector<8x8x8xf32>
    %94 = vector.shape_cast %91 : vector<8x8x8xf32> to vector<1x8x8x8xf32>
    tpu.vector_store %arg11[%c0_35, %c0_36, %c0_37, %c0_38], %94 {strides = array<i32>} : memref<1x8x8x8xf32, #tpu.memory_space<vmem>>, vector<1x8x8x8xf32>,
    return
  }
  func.func @transform_0(%arg0: i32, %arg1: i32) -> (i32, i32, i32, i32) {
    %c4_i32 = arith.constant 4 : i32
    %0 = arith.muli %arg1, %c4_i32 : i32
    %c1_i32 = arith.constant 1 : i32
    %1 = arith.subi %0, %c1_i32 : i32
    %c0_i32 = arith.constant 0 : i32
    %2 = arith.maxsi %1, %c0_i32 : i32
    %c0_i32_0 = arith.constant 0 : i32
    %c0_i32_1 = arith.constant 0 : i32
    %c0_i32_2 = arith.constant 0 : i32
    return %arg0, %2, %c0_i32_0, %c0_i32_1 : i32, i32, i32, i32
  }
  func.func @transform_1(%arg0: i32, %arg1: i32) -> (i32, i32, i32, i32) {
    %c0_i32 = arith.constant 0 : i32
    %c0_i32_0 = arith.constant 0 : i32
    %c0_i32_1 = arith.constant 0 : i32
    return %arg0, %arg1, %c0_i32, %c0_i32_0 : i32, i32, i32, i32
  }
  func.func @transform_2(%arg0: i32, %arg1: i32) -> (i32, i32, i32, i32) {
    %c1_i32 = arith.constant 1 : i32
    %0 = arith.addi %arg1, %c1_i32 : i32
    %c4_i32 = arith.constant 4 : i32
    %1 = arith.muli %0, %c4_i32 : i32
    %c3_i32 = arith.constant 3 : i32
    %2 = arith.minsi %1, %c3_i32 : i32
    %c0_i32 = arith.constant 0 : i32
    %c0_i32_0 = arith.constant 0 : i32
    %c0_i32_1 = arith.constant 0 : i32
    return %arg0, %2, %c0_i32, %c0_i32_0 : i32, i32, i32, i32
  }
  func.func @transform_3(%arg0: i32, %arg1: i32) -> (i32, i32) {
    %c0_i32 = arith.constant 0 : i32
    %c0_i32_0 = arith.constant 0 : i32
    %c0_i32_1 = arith.constant 0 : i32
    return %c0_i32, %c0_i32_0 : i32, i32
  }
  func.func @transform_4(%arg0: i32, %arg1: i32) -> (i32, i32) {
    %c0_i32 = arith.constant 0 : i32
    %c0_i32_0 = arith.constant 0 : i32
    %c0_i32_1 = arith.constant 0 : i32
    return %c0_i32, %c0_i32_0 : i32, i32
  }
  func.func @transform_5(%arg0: i32, %arg1: i32) -> (i32, i32) {
    %c0_i32 = arith.constant 0 : i32
    %c0_i32_0 = arith.constant 0 : i32
    %c0_i32_1 = arith.constant 0 : i32
    return %c0_i32, %c0_i32_0 : i32, i32
  }
  func.func @transform_6(%arg0: i32, %arg1: i32) -> (i32, i32) {
    %c0_i32 = arith.constant 0 : i32
    %c0_i32_0 = arith.constant 0 : i32
    %c0_i32_1 = arith.constant 0 : i32
    return %c0_i32, %c0_i32_0 : i32, i32
  }
  func.func @transform_7(%arg0: i32, %arg1: i32) -> (i32, i32) {
    %c0_i32 = arith.constant 0 : i32
    %c0_i32_0 = arith.constant 0 : i32
    %c0_i32_1 = arith.constant 0 : i32
    return %c0_i32, %c0_i32_0 : i32, i32
  }
  func.func @transform_8(%arg0: i32, %arg1: i32) -> (i32, i32) {
    %c0_i32 = arith.constant 0 : i32
    %c0_i32_0 = arith.constant 0 : i32
    %c0_i32_1 = arith.constant 0 : i32
    return %c0_i32, %c0_i32_0 : i32, i32
  }
  func.func @transform_9(%arg0: i32, %arg1: i32) -> (i32, i32, i32, i32) {
    %c0_i32 = arith.constant 0 : i32
    %c0_i32_0 = arith.constant 0 : i32
    %c0_i32_1 = arith.constant 0 : i32
    return %arg0, %arg1, %c0_i32, %c0_i32_0 : i32, i32, i32, i32
  }
}

</mosaic_0001>

<bundles_post_ra>
// kernel: down_forward.1
= control target key start
LH: loop header
LB: loop body
LE: loop exit
PB: predicated region body
PF: predicated region fallthrough
CT: control target
= control target key end

     0   :  { %s5666_s28 = smov 0   ;;  %s5668_s29 = smov 0   ;;  %s7003_s0 = inlined_call_operand.vmem [shape: bf16[2,16,16,4], index: 0, kind: input, shape index: {}, may-alias: {0,1,2}]   ;;  %s7004_s1 = inlined_call_operand.vmem [shape: bf16[2,16,16,4], index: 1, kind: input, shape index: {}, may-alias: {0,1,2}]   ;;  %s7005_s2 = inlined_call_operand.vmem [shape: bf16[2,16,16,4], index: 2, kind: input, shape index: {}, may-alias: {0,1,2}]   ;;  %s7006_s3 = inlined_call_operand.vmem [shape: bf16[36,8], index: 3, kind: input, shape index: {}]   ;;  %s7007_s4 = inlined_call_operand.vmem [shape: f32[1,8], index: 4, kind: input, shape index: {}]   ;;  %s7008_s5 = inlined_call_operand.vmem [shape: f32[1,8], index: 5, kind: input, shape index: {}]   ;;  %s7009_s6 = inlined_call_operand.vmem [shape: bf16[72,8], index: 6, kind: input, shape index: {}]   ;;  %s7010_s7 = inlined_call_operand.vmem [shape: f32[1,8], index: 7, kind: input, shape index: {}]   ;;  %s7011_s8 = inlined_call_operand.vmem [shape: f32[1,8], index: 8, kind: input, shape index: {}]   ;;  %s7012_s9 = inlined_call_operand.vmem [shape: f32[2,8,8,8], index: 9, kind: output, shape index: {}]  }
   0x1   :  { %s5670_s30 = smov 0  }
   0x2 LB: > { %s31_s10 = sadd.s32 1, %s5594_s29  ;;  %p5356_p0 = scmp.ge.s32.totalorder %s5598_s30, 1  ;;  %s5598_s30 = sphi %s5670_s30, %s19_s30   ;;  %s5594_s29 = sphi %s5668_s29, %s7026_s29   ;;  %s5590_s28 = sphi %s5666_s28, %s7025_s28  }
   0x3   : > { %p33_p1 = scmp.ge.s32.totalorder %s31_s10, 2  ;;  %p377_p2 = scmp.lt.s32.totalorder %s5598_s30, 3 }
   0x5   : > { %s7028_s10 = smov (%p33_p1, %s31_s10), 0  ;;  %p378_p3 = pnand %p5356_p0, %p377_p2 }
   0x7   : > { %381 = sbr.rel (%p378_p3) target bundleno = 1072 (0x430), region = 56 }
   0xe   : > { %vm3864_vm0 = vcmask 1040384   ;;  %vm3865_vm1 = vsmask.f32 256  ;;  %vm3879_vm2 = vcmask 1044480   ;;  %v7013_v0 = vmov 0   ;;  %p470_p4 = scmp.lt.s32.totalorder %s5590_s28, 1 }
   0xf   : > { %v5450_v1 = vcombine.low %v7013_v0, %v7013_v0  ;;  %vm5688_vm3 = vmand %vm3864_vm0, %vm3865_vm1  ;;  %vm3880_vm4 = vsmask.f32 4352  ;;  %v810_v3 = vlaneseq  ;;  %v5601_v5 = vmov 1966171168   ;;  %s5602_s11 = smov 12   ;;  %s5603_s16 = smov 8  }
  0x10   : > { %vm5692_vm5 = vmand %vm3879_vm2, %vm3880_vm4  ;;  %v808_v6 = vunpack.c.l.s4 %v5601_v5  ;;  %vm1759_vm6 = vcmask 24576   ;;  %s7030_s28 = smov (!%p470_p4, %s5590_s28), 1  ;;  %s5604_s17 = smov 4   ;;  %vm3762_vm7 = vcmask 1042434   ;;  %vm3764_vm8 = vcmask 1043459  }
  0x11   : > { %v3867_v7 = vsel %vm5688_vm3, 0, %v5450_v1  ;;  %v811_v8 = vshrl.u32 %v810_v3, 7  ;;  %s5446_s12 = sshll.u32 %s7030_s28, 7  ;;  %s5605_s18 = smov 16   ;;  %vm3766_vm9 = vcmask 1044484   ;;  %vm3768_vm10 = vcmask 1045509  }
  0x12   : > { %v5701_v9 = vsel %vm5692_vm5, %v3867_v7, 0  ;;  %v809_v10 = vunpack.c.0.s8 %v808_v6  ;;  %s5723_s15 = scalar_lea.vmem %s7004_s1, %s5446_s12  ;;  %s5606_s19 = smov 20   ;;  %vm3770_vm11 = vcmask 1046534   ;;  %vm3772_vm12 = vcmask 1047559  }
  0x13   : > { %4025 = vrot.lane.b32.xlu1 %v5701_v9, %s5602_s11  ;;  %v5706_v11 = vrot.slane %v5701_v9, 1  ;;  %v3895_v12 = vshrl.u32 %v5701_v9, 16  ;;  %v3897_v13 = vshll.u32 %v5701_v9, 16  ;;  %s5607_s20 = smov 24   ;;  %s5608_s21 = smov 32   ;;  %vm4162_vm13 = vcmask 31744  }
  0x14   : > { %v5713_v14 = vsub.s32 %v809_v10, %v811_v8  ;;  %v5373_v18 = vld.sshfl [vmem:[%s5723_s15] sm:$0x33 pattern:$0x75316420]  ;;  %s5609_s22 = smov 28   ;;  %vm4183_vm14 = vcmask 64512  }
  0x15   : > { %v5717_v15 = vpack.i.bf16 %v5706_v11, %v5706_v11  ;;  %v3899_v16 = vrot.slane %v3897_v13, 1  ;;  %v5374_v19 = vld.sshfl [vmem:[%s5723_s15 + $0x4] sm:$0x33 pattern:$0x75316420]  ;;  %v806_v20 = vcombine.high %v5373_v18, %v5373_v18  ;;  %vm4204_vm15 = vcmask 97280  }
  0x16   : > { %v813_v21 = vrot.slane %v5373_v18, %v5713_v14  ;;  %v5375_v22 = vld.sshfl [vmem:[%s5723_s15 + $0x8] sm:$0x33 pattern:$0x75316420]  ;;  %v830_v23 = vcombine.high %v5374_v19, %v5374_v19  ;;  %v837_v24 = vrot.slane %v5374_v19, %v5713_v14  ;;  %vm4225_vm0 = vcmask 130048   ;;  %s5612_s2 = smov 48  }
  0x17   : > { %5554 = vrot.lane.b32.xlu1 %v5717_v15, %s5603_s16  ;;  %v5727_v17 = vor.u32 %v3899_v16, %v3895_v12  ;;  %v5376_v25 = vld.sshfl [vmem:[%s5723_s15 + $0xc] sm:$0x33 pattern:$0x75316420]  ;;  %v820_v26 = vrot.slane %v806_v20, %v5713_v14  ;;  %v854_v28 = vcombine.high %v5375_v22, %v5375_v22  ;;  %v861_v29 = vrot.slane %v5375_v22, %v5713_v14 }
  0x18   : > { %v821_v27 = vcombine.high %v813_v21, %v813_v21  ;;  %v5742_v30 = vrot.slane %v830_v23, %v5713_v14  ;;  %v845_v31 = vcombine.high %v837_v24, %v837_v24  ;;  %v878_v32 = vcombine.high %v5376_v25, %v5376_v25 }
  0x19   : > { %3964 = vrot.lane.b32.xlu0 %v5727_v17, %s5604_s17  ;;  %v885_v33 = vrot.slane %v5376_v25, %v5713_v14  ;;  %v822_v34 = vcombine.high %v820_v26, %v820_v26  ;;  %v868_v35 = vrot.slane %v854_v28, %v5713_v14  ;;  %v869_v36 = vcombine.high %v861_v29, %v861_v29 }
  0x1a   : > { %v2034_v37 = vsel %vm1759_vm6, %v813_v21, 4286644096  ;;  %v846_v38 = vcombine.high %v5742_v30, %v5742_v30  ;;  %v5752_v39 = vrot.slane %v878_v32, %v5713_v14  ;;  %v2037_v41 = vsel %vm1759_vm6, %v861_v29, 4286644096 }
  0x1b   : > { %4052 = vrot.lane.b32.xlu1 %v5727_v17, %s5605_s18  ;;  %v893_v40 = vcombine.high %v885_v33, %v885_v33  ;;  %v870_v42 = vcombine.high %v868_v35, %v868_v35  ;;  %v2039_v43 = vmax.bf16 %v2037_v41, %v2034_v37  ;;  %v2051_v44 = vsel %vm1759_vm6, %v820_v26, 4286644096 }
  0x1c   : > { %v2054_v45 = vsel %vm1759_vm6, %v868_v35, 4286644096  ;;  %v894_v46 = vcombine.high %v5752_v39, %v5752_v39  ;;  %v2068_v48 = vsel %vm1759_vm6, %v821_v27, 4286644096  ;;  %v2071_v49 = vsel %vm1759_vm6, %v869_v36, 4286644096 }
  0x1d   : > { %3966 = vrot.lane.b32.xlu0 %v5727_v17, %s5604_s17  ;;  %v2056_v47 = vmax.bf16 %v2054_v45, %v2051_v44  ;;  %v2040_v50 = vunpack.i.l.bf16 %v2039_v43  ;;  %v2041_v51 = vunpack.i.h.bf16 %v2039_v43  ;;  %v2073_v52 = vmax.bf16 %v2071_v49, %v2068_v48 }
  0x1e   : > { %v2085_v53 = vsel %vm1759_vm6, %v822_v34, 4286644096  ;;  %v2088_v56 = vsel %vm1759_vm6, %v870_v42, 4286644096  ;;  %v2102_v57 = vsel %vm1759_vm6, %v837_v24, 4286644096 }
  0x1f   : > { %4073 = vrot.lane.b32.xlu1 %v5706_v11, %s5606_s19  ;;  %v2057_v54 = vunpack.i.l.bf16 %v2056_v47  ;;  %v2058_v55 = vunpack.i.h.bf16 %v2056_v47  ;;  %v2042_v58 = vmax.f32 %v2040_v50, %v2041_v51  ;;  %v2074_v59 = vunpack.i.l.bf16 %v2073_v52 }
  0x20   : > { %v2075_v60 = vunpack.i.h.bf16 %v2073_v52  ;;  %v2090_v61 = vmax.bf16 %v2088_v56, %v2085_v53  ;;  %v2105_v63 = vsel %vm1759_vm6, %v885_v33, 4286644096  ;;  %v2119_v1 = vsel %vm1759_vm6, %v5742_v30, 4286644096 }
  0x21   : > { %v2059_v62 = vmax.f32 %v2057_v54, %v2058_v55  ;;  %v2122_v3 = vsel %vm1759_vm6, %v5752_v39, 4286644096  ;;  %v2043_v5 = vrot.slane %v2042_v58, 4  ;;  %v2107_v12 = vmax.bf16 %v2105_v63, %v2102_v57 }
  0x22   : > { %v2076_v6 = vmax.f32 %v2074_v59, %v2075_v60  ;;  %v2091_v7 = vunpack.i.l.bf16 %v2090_v61  ;;  %v2092_v8 = vunpack.i.h.bf16 %v2090_v61  ;;  %v2124_v13 = vmax.bf16 %v2122_v3, %v2119_v1 }
  0x23   : > { %v2060_v10 = vrot.slane %v2059_v62, 4  ;;  %v2136_v16 = vsel %vm1759_vm6, %v845_v31, 4286644096  ;;  %v2044_v18 = vmax.f32 %v2042_v58, %v2043_v5  ;;  %v2139_v21 = vsel %vm1759_vm6, %v893_v40, 4286644096 }
  0x24   : > { %v2077_v19 = vrot.slane %v2076_v6, 4  ;;  %v2093_v20 = vmax.f32 %v2091_v7, %v2092_v8  ;;  %v2108_v23 = vunpack.i.l.bf16 %v2107_v12  ;;  %v2109_v24 = vunpack.i.h.bf16 %v2107_v12 }
  0x25   : > { %v2061_v22 = vmax.f32 %v2059_v62, %v2060_v10  ;;  %v2125_v25 = vunpack.i.l.bf16 %v2124_v13  ;;  %v2045_v26 = vrot.slane %v2044_v18, 2  ;;  %v2126_v29 = vunpack.i.h.bf16 %v2124_v13  ;;  %v5377_v10 = vld.sshfl [vmem:[%s5723_s15 + $0x10] sm:$0x33 pattern:$0x75316420] }
  0x26   : > { %v2078_v27 = vmax.f32 %v2076_v6, %v2077_v19  ;;  %v2094_v28 = vrot.slane %v2093_v20, 4  ;;  %v2110_v32 = vmax.f32 %v2108_v23, %v2109_v24  ;;  %v2141_v33 = vmax.bf16 %v2139_v21, %v2136_v16 }
  0x27   : > { %v2062_v30 = vrot.slane %v2061_v22, 2  ;;  %v2153_v34 = vsel %vm1759_vm6, %v846_v38, 4286644096  ;;  %v2046_v35 = vmax.f32 %v2044_v18, %v2045_v26  ;;  %v2127_v37 = vmax.f32 %v2125_v25, %v2126_v29 }
  0x28   : > { %v2079_v31 = vrot.slane %v2078_v27, 2  ;;  %v2095_v36 = vmax.f32 %v2093_v20, %v2094_v28  ;;  %v2111_v40 = vrot.slane %v2110_v32, 4  ;;  %v2142_v41 = vunpack.i.l.bf16 %v2141_v33  ;;  %v5378_v26 = vld.sshfl [vmem:[%s5723_s15 + $0x14] sm:$0x33 pattern:$0x75316420] }
  0x29   : > { %v2063_v39 = vmax.f32 %v2061_v22, %v2062_v30  ;;  %v2143_v42 = vunpack.i.h.bf16 %v2141_v33  ;;  %v2047_v43 = vrot.slane %v2046_v35, 1  ;;  %v2128_v47 = vrot.slane %v2127_v37, 4 }
  0x2a   : > { %v2080_v44 = vmax.f32 %v2078_v27, %v2079_v31  ;;  %v2096_v45 = vrot.slane %v2095_v36, 2  ;;  %v2112_v49 = vmax.f32 %v2110_v32, %v2111_v40  ;;  %v2156_v51 = vsel %vm1759_vm6, %v894_v46, 4286644096 }
  0x2b   : > { %v2064_v48 = vrot.slane %v2063_v39, 1  ;;  %v2144_v50 = vmax.f32 %v2142_v41, %v2143_v42  ;;  %v2048_v38 = vmax.f32 %v2046_v35, %v2047_v43  ;;  %v2129_v54 = vmax.f32 %v2127_v37, %v2128_v47  ;;  %v5379_v40 = vld.sshfl [vmem:[%s5723_s15 + $0x18] sm:$0x33 pattern:$0x75316420] }
  0x2c   : > { %v2081_v52 = vrot.slane %v2080_v44, 1  ;;  %v2097_v53 = vmax.f32 %v2095_v36, %v2096_v45  ;;  %v2113_v56 = vrot.slane %v2112_v49, 2  ;;  %v2158_v58 = vmax.bf16 %v2156_v51, %v2153_v34 }
  0x2d   : > { %v2065_v55 = vmax.f32 %v2063_v39, %v2064_v48  ;;  %v2145_v57 = vrot.slane %v2144_v50, 4  ;;  %v2049_v59 = vpack.i.bf16 %v2048_v38, %v2048_v38  ;;  %v2130_v62 = vrot.slane %v2129_v54, 2 }
  0x2e   : > { %v2082_v60 = vmax.f32 %v2080_v44, %v2081_v52  ;;  %v2098_v61 = vrot.slane %v2097_v53, 1  ;;  %v2114_v1 = vmax.f32 %v2112_v49, %v2113_v56  ;;  %v2159_v5 = vunpack.i.l.bf16 %v2158_v58  ;;  %v5380_v49 = vld.sshfl [vmem:[%s5723_s15 + $0x1c] sm:$0x33 pattern:$0x75316420] }
  0x2f   : > { %v2066_v63 = vpack.i.bf16 %v2065_v55, %v2065_v55  ;;  %v2146_v3 = vmax.f32 %v2144_v50, %v2145_v57  ;;  %v2131_v7 = vmax.f32 %v2129_v54, %v2130_v62  ;;  %v2160_v8 = vunpack.i.h.bf16 %v2158_v58 }
  0x30   : > { %v2083_v46 = vpack.i.bf16 %v2082_v60, %v2082_v60  ;;  %v2099_v6 = vmax.f32 %v2097_v53, %v2098_v61  ;;  %v2115_v12 = vrot.slane %v2114_v1, 1  ;;  %v3682_v16 = vunpack.c.l.b16 %v2049_v59 }
  0x31   : > { %v2147_v13 = vrot.slane %v2146_v3, 2  ;;  %v3683_v18 = vunpack.c.l.b16 %v2066_v63  ;;  %v2132_v20 = vrot.slane %v2131_v7, 1  ;;  %v2161_v21 = vmax.f32 %v2159_v5, %v2160_v8 }
  0x32   : > { %v2100_v19 = vpack.i.bf16 %v2099_v6, %v2099_v6  ;;  %v3684_v22 = vunpack.c.l.b16 %v2083_v46  ;;  %v2116_v23 = vmax.f32 %v2114_v1, %v2115_v12  ;;  %v902_v27 = vcombine.high %v5377_v10, %v5377_v10 }
  0x33   : > { %v2148_v24 = vmax.f32 %v2146_v3, %v2147_v13  ;;  %v3780_v25 = vsel %vm3762_vm7, %v3683_v18, %v3682_v16  ;;  %v2133_v28 = vmax.f32 %v2131_v7, %v2132_v20  ;;  %v2162_v29 = vrot.slane %v2161_v21, 4 }
  0x34   : > { %v3685_v30 = vunpack.c.l.b16 %v2100_v19  ;;  %v3781_v32 = vsel %vm3764_vm8, %v3684_v22, %v3780_v25  ;;  %v2117_v33 = vpack.i.bf16 %v2116_v23, %v2116_v23  ;;  %v909_v35 = vrot.slane %v5377_v10, %v5713_v14 }
  0x35   : > { %v2149_v34 = vrot.slane %v2148_v24, 1  ;;  %v916_v31 = vrot.slane %v902_v27, %v5713_v14  ;;  %v2134_v36 = vpack.i.bf16 %v2133_v28, %v2133_v28  ;;  %v2163_v37 = vmax.f32 %v2161_v21, %v2162_v29 }
  0x36   : > { %v3782_v39 = vsel %vm3766_vm9, %v3685_v30, %v3781_v32  ;;  %v926_v41 = vcombine.high %v5378_v26, %v5378_v26  ;;  %v3686_v43 = vunpack.c.l.b16 %v2117_v33  ;;  %v917_v44 = vcombine.high %v909_v35, %v909_v35 }
  0x37   : > { %v2150_v42 = vmax.f32 %v2148_v24, %v2149_v34  ;;  %v918_v45 = vcombine.high %v916_v31, %v916_v31  ;;  %v2164_v47 = vrot.slane %v2163_v37, 2  ;;  %v3687_v48 = vunpack.c.l.b16 %v2134_v36 }
  0x38   : > { %v5785_v50 = vrot.slane %v5378_v26, %v5713_v14  ;;  %v5788_v51 = vrot.slane %v926_v41, %v5713_v14  ;;  %v3783_v52 = vsel %vm3768_vm10, %v3686_v43, %v3782_v39  ;;  %v950_v53 = vcombine.high %v5379_v40, %v5379_v40 }
  0x39   : > { %v2151_v38 = vpack.i.bf16 %v2150_v42, %v2150_v42  ;;  %v957_v54 = vrot.slane %v5379_v40, %v5713_v14  ;;  %v2165_v55 = vmax.f32 %v2163_v37, %v2164_v47  ;;  %v3784_v56 = vsel %vm3770_vm11, %v3687_v48, %v3783_v52 }
  0x3a   : > { %v941_v57 = vcombine.high %v5785_v50, %v5785_v50  ;;  %v942_v58 = vcombine.high %v5788_v51, %v5788_v51  ;;  %v964_v60 = vrot.slane %v950_v53, %v5713_v14  ;;  %v974_v62 = vcombine.high %v5380_v49, %v5380_v49 }
  0x3b   : > { %v3688_v59 = vunpack.c.l.b16 %v2151_v38  ;;  %v965_v61 = vcombine.high %v957_v54, %v957_v54  ;;  %v2166_v63 = vrot.slane %v2165_v55, 1  ;;  %v981_v1 = vrot.slane %v5380_v49, %v5713_v14 }
  0x3c   : > { %v2170_v3 = vsel %vm1759_vm6, %v909_v35, 4286644096  ;;  %v2173_v5 = vsel %vm1759_vm6, %v957_v54, 4286644096  ;;  %v966_v6 = vcombine.high %v964_v60, %v964_v60  ;;  %v5803_v7 = vrot.slane %v974_v62, %v5713_v14 }
  0x3d   : > { %v3785_v46 = vsel %vm3772_vm12, %v3688_v59, %v3784_v56  ;;  %v2175_v8 = vmax.bf16 %v2173_v5, %v2170_v3  ;;  %v2167_v10 = vmax.f32 %v2165_v55, %v2166_v63  ;;  %v989_v12 = vcombine.high %v981_v1, %v981_v1 }
  0x3e   : > { %v2187_v13 = vsel %vm1759_vm6, %v916_v31, 4286644096  ;;  %v2190_v16 = vsel %vm1759_vm6, %v964_v60, 4286644096  ;;  %v990_v18 = vcombine.high %v5803_v7, %v5803_v7  ;;  %v2204_v23 = vsel %vm1759_vm6, %v917_v44, 4286644096 }
  0x3f   : > { %v2176_v19 = vunpack.i.l.bf16 %v2175_v8  ;;  %v2177_v20 = vunpack.i.h.bf16 %v2175_v8  ;;  %v2192_v21 = vmax.bf16 %v2190_v16, %v2187_v13  ;;  %v2168_v22 = vpack.i.bf16 %v2167_v10, %v2167_v10 }
  0x40   : > { %v2207_v24 = vsel %vm1759_vm6, %v965_v61, 4286644096  ;;  %v2221_v25 = vsel %vm1759_vm6, %v918_v45, 4286644096  ;;  %v2224_v32 = vsel %vm1759_vm6, %v966_v6, 4286644096 }
  0x41   : > { %v2178_v26 = vmax.f32 %v2176_v19, %v2177_v20  ;;  %v2193_v27 = vunpack.i.l.bf16 %v2192_v21  ;;  %v2194_v28 = vunpack.i.h.bf16 %v2192_v21  ;;  %v2209_v29 = vmax.bf16 %v2207_v24, %v2204_v23 }
  0x42   : > { %v3689_v30 = vunpack.c.l.b16 %v2168_v22  ;;  %v2238_v33 = vsel %vm1759_vm6, %v5785_v50, 4286644096  ;;  %v2241_v34 = vsel %vm1759_vm6, %v981_v1, 4286644096  ;;  %v2226_v40 = vmax.bf16 %v2224_v32, %v2221_v25 }
  0x43   : > { %v2179_v35 = vrot.slane %v2178_v26, 4  ;;  %v2195_v31 = vmax.f32 %v2193_v27, %v2194_v28  ;;  %v2210_v36 = vunpack.i.l.bf16 %v2209_v29  ;;  %v2211_v37 = vunpack.i.h.bf16 %v2209_v29 }
  0x44   : > { %v3842_v39 = vpack.c.b16 %v3689_v30, %v3785_v46  ;;  %v2243_v41 = vmax.bf16 %v2241_v34, %v2238_v33  ;;  %v2255_v42 = vsel %vm1759_vm6, %v5788_v51, 4286644096  ;;  %v2258_v47 = vsel %vm1759_vm6, %v5803_v7, 4286644096 }
  0x45   : > { %v2180_v43 = vmax.f32 %v2178_v26, %v2179_v35  ;;  %v2196_v44 = vrot.slane %v2195_v31, 4  ;;  %v2212_v45 = vmax.f32 %v2210_v36, %v2211_v37  ;;  %v2227_v49 = vunpack.i.l.bf16 %v2226_v40 }
  0x46   : > { %v3869_v48 = vsel %vm5688_vm3, 0, %v3842_v39  ;;  %v2228_v50 = vunpack.i.h.bf16 %v2226_v40  ;;  %v2244_v38 = vunpack.i.l.bf16 %v2243_v41  ;;  %v2245_v59 = vunpack.i.h.bf16 %v2243_v41  ;;  %v5381_v41 = vld.sshfl [vmem:[%s5723_s15 + $0x20] sm:$0x33 pattern:$0x75316420] }
  0x47   : > { %v5824_v52 = vsel %vm5692_vm5, %v3869_v48, 0  ;;  %v2181_v53 = vrot.slane %v2180_v43, 2  ;;  %v2197_v54 = vmax.f32 %v2195_v31, %v2196_v44  ;;  %v2213_v55 = vrot.slane %v2212_v45, 4 }
  0x48   : > { %4094 = vrot.lane.b32.xlu1 %v5824_v52, %s5607_s20  ;;  %4027 = vrot.lane.b32.xlu0 %v5824_v52, %s5602_s11  ;;  %v2229_v56 = vmax.f32 %v2227_v49, %v2228_v50  ;;  %v2260_v60 = vmax.bf16 %v2258_v47, %v2255_v42  ;;  %v2272_v61 = vsel %vm1759_vm6, %v941_v57, 4286644096  ;;  %v2275_v3 = vsel %vm1759_vm6, %v989_v12, 4286644096 }
  0x49   : > { %v2182_v62 = vmax.f32 %v2180_v43, %v2181_v53  ;;  %v2198_v63 = vrot.slane %v2197_v54, 2  ;;  %v2214_v1 = vmax.f32 %v2212_v45, %v2213_v55  ;;  %v2246_v46 = vmax.f32 %v2244_v38, %v2245_v59 }
  0x4a   : > { %v2230_v5 = vrot.slane %v2229_v56, 4  ;;  %v2261_v6 = vunpack.i.l.bf16 %v2260_v60  ;;  %v2262_v8 = vunpack.i.h.bf16 %v2260_v60  ;;  %v2277_v19 = vmax.bf16 %v2275_v3, %v2272_v61 }
  0x4b   : > { %v2183_v10 = vrot.slane %v2182_v62, 1  ;;  %v2199_v13 = vmax.f32 %v2197_v54, %v2198_v63  ;;  %v2215_v16 = vrot.slane %v2214_v1, 2  ;;  %v2247_v21 = vrot.slane %v2246_v46, 4 }
  0x4c   : > { %v2231_v20 = vmax.f32 %v2229_v56, %v2230_v5  ;;  %v2263_v22 = vmax.f32 %v2261_v6, %v2262_v8  ;;  %v2289_v57 = vsel %vm1759_vm6, %v942_v58, 4286644096  ;;  %v2278_v12 = vunpack.i.l.bf16 %v2277_v19 }
  0x4d   : > { %v2184_v23 = vmax.f32 %v2182_v62, %v2183_v10  ;;  %v2200_v24 = vrot.slane %v2199_v13, 1  ;;  %v2216_v25 = vmax.f32 %v2214_v1, %v2215_v16  ;;  %v2248_v27 = vmax.f32 %v2246_v46, %v2247_v21  ;;  %v5382_v1 = vld.sshfl [vmem:[%s5723_s15 + $0x24] sm:$0x33 pattern:$0x75316420] }
  0x4e   : > { %v2232_v26 = vrot.slane %v2231_v20, 2  ;;  %v2264_v28 = vrot.slane %v2263_v22, 4  ;;  %v2279_v29 = vunpack.i.h.bf16 %v2277_v19  ;;  %v2292_v34 = vsel %vm1759_vm6, %v990_v18, 4286644096 }
  0x4f   : > { %v2185_v30 = vpack.i.bf16 %v2184_v23, %v2184_v23  ;;  %v2201_v32 = vmax.f32 %v2199_v13, %v2200_v24  ;;  %v2217_v33 = vrot.slane %v2216_v25, 1  ;;  %v2249_v35 = vrot.slane %v2248_v27, 2  ;;  %v5383_v19 = vld.sshfl [vmem:[%s5723_s15 + $0x28] sm:$0x33 pattern:$0x75316420] }
  0x50   : > { %v2233_v51 = vmax.f32 %v2231_v20, %v2232_v26  ;;  %v2265_v58 = vmax.f32 %v2263_v22, %v2264_v28  ;;  %v2280_v31 = vmax.f32 %v2278_v12, %v2279_v29  ;;  %v2294_v39 = vmax.bf16 %v2292_v34, %v2289_v57 }
  0x51   : > { %v2202_v36 = vpack.i.bf16 %v2201_v32, %v2201_v32  ;;  %v2218_v37 = vmax.f32 %v2216_v25, %v2217_v33  ;;  %v3690_v40 = vunpack.c.l.b16 %v2185_v30  ;;  %v2250_v43 = vmax.f32 %v2248_v27, %v2249_v35  ;;  %v5384_v27 = vld.sshfl [vmem:[%s5723_s15 + $0x2c] sm:$0x33 pattern:$0x75316420] }
  0x52   : > { %v2234_v42 = vrot.slane %v2233_v51, 1  ;;  %v2266_v44 = vrot.slane %v2265_v58, 2  ;;  %v2281_v45 = vrot.slane %v2280_v31, 4  ;;  %v2295_v48 = vunpack.i.l.bf16 %v2294_v39 }
  0x53   : > { %v2219_v47 = vpack.i.bf16 %v2218_v37, %v2218_v37  ;;  %v2296_v49 = vunpack.i.h.bf16 %v2294_v39  ;;  %v3691_v7 = vunpack.c.l.b16 %v2202_v36  ;;  %v2251_v18 = vrot.slane %v2250_v43, 1 }
  0x54   : > { %v2235_v50 = vmax.f32 %v2233_v51, %v2234_v42  ;;  %v2267_v38 = vmax.f32 %v2265_v58, %v2266_v44  ;;  %v2282_v53 = vmax.f32 %v2280_v31, %v2281_v45  ;;  %v998_v59 = vcombine.high %v5381_v41, %v5381_v41 }
  0x55   : > { %v2297_v54 = vmax.f32 %v2295_v48, %v2296_v49  ;;  %v3692_v55 = vunpack.c.l.b16 %v2219_v47  ;;  %v3786_v56 = vsel %vm3762_vm7, %v3691_v7, %v3690_v40  ;;  %v2252_v61 = vmax.f32 %v2250_v43, %v2251_v18 }
  0x56   : > { %v2236_v60 = vpack.i.bf16 %v2235_v50, %v2235_v50  ;;  %v2268_v62 = vrot.slane %v2267_v38, 1  ;;  %v2283_v63 = vrot.slane %v2282_v53, 2  ;;  %v1005_v46 = vrot.slane %v5381_v41, %v5713_v14 }
  0x57   : > { %v2298_v3 = vrot.slane %v2297_v54, 4  ;;  %v3787_v5 = vsel %vm3764_vm8, %v3692_v55, %v3786_v56  ;;  %v1012_v6 = vrot.slane %v998_v59, %v5713_v14  ;;  %v2253_v8 = vpack.i.bf16 %v2252_v61, %v2252_v61 }
  0x58   : > { %v2269_v10 = vmax.f32 %v2267_v38, %v2268_v62  ;;  %v2284_v13 = vmax.f32 %v2282_v53, %v2283_v63  ;;  %v3693_v16 = vunpack.c.l.b16 %v2236_v60  ;;  %v1013_v21 = vcombine.high %v1005_v46, %v1005_v46 }
  0x59   : > { %v2299_v20 = vmax.f32 %v2297_v54, %v2298_v3  ;;  %v1014_v22 = vcombine.high %v1012_v6, %v1012_v6  ;;  %v1022_v57 = vcombine.high %v5382_v1, %v5382_v1  ;;  %v3694_v25 = vunpack.c.l.b16 %v2253_v8 }
  0x5a   : > { %v2270_v23 = vpack.i.bf16 %v2269_v10, %v2269_v10  ;;  %v2285_v24 = vrot.slane %v2284_v13, 1  ;;  %v3788_v12 = vsel %vm3766_vm9, %v3693_v16, %v3787_v5  ;;  %v5850_v28 = vrot.slane %v5382_v1, %v5713_v14 }
  0x5b   : > { %v2300_v26 = vrot.slane %v2299_v20, 2  ;;  %v5853_v29 = vrot.slane %v1022_v57, %v5713_v14  ;;  %v1046_v30 = vcombine.high %v5383_v19, %v5383_v19  ;;  %v3789_v34 = vsel %vm3768_vm10, %v3694_v25, %v3788_v12 }
  0x5c   : > { %v2286_v32 = vmax.f32 %v2284_v13, %v2285_v24  ;;  %v3695_v33 = vunpack.c.l.b16 %v2270_v23  ;;  %v1053_v51 = vrot.slane %v5383_v19, %v5713_v14  ;;  %v1037_v58 = vcombine.high %v5850_v28, %v5850_v28 }
  0x5d   : > { %v2301_v35 = vmax.f32 %v2299_v20, %v2300_v26  ;;  %v1038_v31 = vcombine.high %v5853_v29, %v5853_v29  ;;  %v1060_v36 = vrot.slane %v1046_v30, %v5713_v14  ;;  %v1070_v41 = vcombine.high %v5384_v27, %v5384_v27 }
  0x5e   : > { %v2287_v37 = vpack.i.bf16 %v2286_v32, %v2286_v32  ;;  %v3790_v39 = vsel %vm3770_vm11, %v3695_v33, %v3789_v34  ;;  %v1061_v40 = vcombine.high %v1053_v51, %v1053_v51  ;;  %v5864_v44 = vrot.slane %v5384_v27, %v5713_v14 }
  0x5f   : > { %v2302_v42 = vrot.slane %v2301_v35, 1  ;;  %v1062_v43 = vcombine.high %v1060_v36, %v1060_v36  ;;  %v2306_v45 = vsel %vm1759_vm6, %v1005_v46, 4286644096  ;;  %v5868_v48 = vrot.slane %v1070_v41, %v5713_v14 }
  0x60   : > { %v3696_v47 = vunpack.c.l.b16 %v2287_v37  ;;  %v2309_v49 = vsel %vm1759_vm6, %v1053_v51, 4286644096  ;;  %v2323_v7 = vsel %vm1759_vm6, %v1012_v6, 4286644096  ;;  %v1085_v18 = vcombine.high %v5864_v44, %v5864_v44 }
  0x61   : > { %v2303_v50 = vmax.f32 %v2301_v35, %v2302_v42  ;;  %v2311_v38 = vmax.bf16 %v2309_v49, %v2306_v45  ;;  %v2326_v53 = vsel %vm1759_vm6, %v1060_v36, 4286644096  ;;  %v1086_v55 = vcombine.high %v5868_v48, %v5868_v48 }
  0x62   : > { %v3791_v54 = vsel %vm3772_vm12, %v3696_v47, %v3790_v39  ;;  %v2328_v56 = vmax.bf16 %v2326_v53, %v2323_v7  ;;  %v2340_v59 = vsel %vm1759_vm6, %v1013_v21, 4286644096  ;;  %v2343_v63 = vsel %vm1759_vm6, %v1061_v40, 4286644096 }
  0x63   : > { %v2304_v60 = vpack.i.bf16 %v2303_v50, %v2303_v50  ;;  %v2312_v61 = vunpack.i.l.bf16 %v2311_v38  ;;  %v2313_v62 = vunpack.i.h.bf16 %v2311_v38  ;;  %v2345_v5 = vmax.bf16 %v2343_v63, %v2340_v59 }
  0x64   : > { %v2329_v1 = vunpack.i.l.bf16 %v2328_v56  ;;  %v2330_v3 = vunpack.i.h.bf16 %v2328_v56  ;;  %v2357_v46 = vsel %vm1759_vm6, %v1014_v22, 4286644096  ;;  %v2360_v10 = vsel %vm1759_vm6, %v1062_v43, 4286644096 }
  0x65   : > { %v3697_v6 = vunpack.c.l.b16 %v2304_v60  ;;  %v2314_v8 = vmax.f32 %v2312_v61, %v2313_v62  ;;  %v2374_v13 = vsel %vm1759_vm6, %v5850_v28, 4286644096  ;;  %v2346_v19 = vunpack.i.l.bf16 %v2345_v5 }
  0x66   : > { %v2331_v16 = vmax.f32 %v2329_v1, %v2330_v3  ;;  %v2347_v20 = vunpack.i.h.bf16 %v2345_v5  ;;  %v2362_v21 = vmax.bf16 %v2360_v10, %v2357_v46  ;;  %v2377_v24 = vsel %vm1759_vm6, %v5864_v44, 4286644096 }
  0x67   : > { %v3843_v57 = vpack.c.b16 %v3697_v6, %v3791_v54  ;;  %v2315_v23 = vrot.slane %v2314_v8, 4  ;;  %v2391_v25 = vsel %vm1759_vm6, %v5853_v29, 4286644096  ;;  %v2379_v33 = vmax.bf16 %v2377_v24, %v2374_v13 }
  0x68   : > { %v2332_v22 = vrot.slane %v2331_v16, 4  ;;  %v2348_v12 = vmax.f32 %v2346_v19, %v2347_v20  ;;  %v2363_v26 = vunpack.i.l.bf16 %v2362_v21  ;;  %v2364_v27 = vunpack.i.h.bf16 %v2362_v21 }
  0x69   : > { %v3870_v30 = vsel %vm5688_vm3, 0, %v3843_v57  ;;  %v2316_v32 = vmax.f32 %v2314_v8, %v2315_v23  ;;  %v2394_v34 = vsel %vm1759_vm6, %v5868_v48, 4286644096  ;;  %v2380_v40 = vunpack.i.l.bf16 %v2379_v33 }
  0x6a   : > { %v5894_v51 = vsel %vm5692_vm5, %v3870_v30, 0  ;;  %v2333_v35 = vmax.f32 %v2331_v16, %v2332_v22  ;;  %v2349_v36 = vrot.slane %v2348_v12, 4  ;;  %v2365_v37 = vmax.f32 %v2363_v26, %v2364_v27 }
  0x6b   : > { %4029 = vrot.lane.b32.xlu1 %v5894_v51, %s5602_s11  ;;  %4096 = vrot.lane.b32.xlu0 %v5894_v51, %s5607_s20  ;;  %v2317_v39 = vrot.slane %v2316_v32, 2  ;;  %v2381_v41 = vunpack.i.h.bf16 %v2379_v33  ;;  %v2396_v42 = vmax.bf16 %v2394_v34, %v2391_v25  ;;  %v2408_v47 = vsel %vm1759_vm6, %v1037_v58, 4286644096 }
  0x6c   : > { %v2334_v43 = vrot.slane %v2333_v35, 2  ;;  %v2350_v44 = vmax.f32 %v2348_v12, %v2349_v36  ;;  %v2366_v45 = vrot.slane %v2365_v37, 4  ;;  %v2411_v59 = vsel %vm1759_vm6, %v1085_v18, 4286644096 }
  0x6d   : > { %v2318_v49 = vmax.f32 %v2316_v32, %v2317_v39  ;;  %v2382_v7 = vmax.f32 %v2380_v40, %v2381_v41  ;;  %v2397_v50 = vunpack.i.l.bf16 %v2396_v42  ;;  %v2398_v38 = vunpack.i.h.bf16 %v2396_v42 }
  0x6e   : > { %v2335_v53 = vmax.f32 %v2333_v35, %v2334_v43  ;;  %v2351_v54 = vrot.slane %v2350_v44, 2  ;;  %v2367_v56 = vmax.f32 %v2365_v37, %v2366_v45  ;;  %v2413_v63 = vmax.bf16 %v2411_v59, %v2408_v47 }
  0x6f   : > { %v2319_v60 = vrot.slane %v2318_v49, 1  ;;  %v2383_v61 = vrot.slane %v2382_v7, 4  ;;  %v2399_v62 = vmax.f32 %v2397_v50, %v2398_v38  ;;  %v2425_v28 = vsel %vm1759_vm6, %v1038_v31, 4286644096 }
  0x70   : > { %v2336_v1 = vrot.slane %v2335_v53, 1  ;;  %v2352_v3 = vmax.f32 %v2350_v44, %v2351_v54  ;;  %v2368_v5 = vrot.slane %v2367_v56, 2  ;;  %v2414_v8 = vunpack.i.l.bf16 %v2413_v63  ;;  %v5385_v54 = vld.sshfl [vmem:[%s5723_s15 + $0x30] sm:$0x33 pattern:$0x75316420] }
  0x71   : > { %v2320_v58 = vmax.f32 %v2318_v49, %v2319_v60  ;;  %v2384_v46 = vmax.f32 %v2382_v7, %v2383_v61  ;;  %v2400_v6 = vrot.slane %v2399_v62, 4  ;;  %v2415_v18 = vunpack.i.h.bf16 %v2413_v63 }
  0x72   : > { %v2337_v10 = vmax.f32 %v2335_v53, %v2336_v1  ;;  %v2353_v13 = vrot.slane %v2352_v3, 1  ;;  %v2369_v16 = vmax.f32 %v2367_v56, %v2368_v5  ;;  %v2428_v57 = vsel %vm1759_vm6, %v1086_v55, 4286644096 }
  0x73   : > { %v2321_v19 = vpack.i.bf16 %v2320_v58, %v2320_v58  ;;  %v2385_v20 = vrot.slane %v2384_v46, 2  ;;  %v2401_v21 = vmax.f32 %v2399_v62, %v2400_v6  ;;  %v2416_v31 = vmax.f32 %v2414_v8, %v2415_v18  ;;  %v5386_v58 = vld.sshfl [vmem:[%s5723_s15 + $0x34] sm:$0x33 pattern:$0x75316420] }
  0x74   : > { %v2338_v23 = vpack.i.bf16 %v2337_v10, %v2337_v10  ;;  %v2354_v29 = vmax.f32 %v2352_v3, %v2353_v13  ;;  %v2370_v24 = vrot.slane %v2369_v16, 1  ;;  %v2430_v12 = vmax.bf16 %v2428_v57, %v2425_v28  ;;  %v5387_v18 = vld.sshfl [vmem:[%s5723_s15 + $0x38] sm:$0x33 pattern:$0x75316420] }
  0x75   : > { %v2386_v25 = vmax.f32 %v2384_v46, %v2385_v20  ;;  %v2402_v22 = vrot.slane %v2401_v21, 2  ;;  %v3698_v26 = vunpack.c.l.b16 %v2321_v19  ;;  %v2417_v32 = vrot.slane %v2416_v31, 4  ;;  %v5388_v57 = vld.sshfl [vmem:[%s5723_s15 + $0x3c] sm:$0x33 pattern:$0x75316420] }
  0x76   : > { %v2355_v27 = vpack.i.bf16 %v2354_v29, %v2354_v29  ;;  %v2371_v30 = vmax.f32 %v2369_v16, %v2370_v24  ;;  %v3699_v33 = vunpack.c.l.b16 %v2338_v23  ;;  %v2431_v36 = vunpack.i.l.bf16 %v2430_v12 }
  0x77   : > { %v2387_v34 = vrot.slane %v2386_v25, 1  ;;  %v2403_v35 = vmax.f32 %v2401_v21, %v2402_v22  ;;  %v2432_v37 = vunpack.i.h.bf16 %v2430_v12  ;;  %v2418_v39 = vmax.f32 %v2416_v31, %v2417_v32 }
  0x78   : > { %v2372_v48 = vpack.i.bf16 %v2371_v30, %v2371_v30  ;;  %v3700_v55 = vunpack.c.l.b16 %v2355_v27  ;;  %v3792_v40 = vsel %vm3762_vm7, %v3699_v33, %v3698_v26  ;;  %v5916_v49 = vrot.slane %v5824_v52, 1 }
  0x79   : > { %v2388_v41 = vmax.f32 %v2386_v25, %v2387_v34  ;;  %v2404_v42 = vrot.slane %v2403_v35, 1  ;;  %v2433_v43 = vmax.f32 %v2431_v36, %v2432_v37  ;;  %v2419_v44 = vrot.slane %v2418_v39, 2 }
  0x7a   : > { %v3701_v45 = vunpack.c.l.b16 %v2372_v48  ;;  %v3793_v47 = vsel %vm3764_vm8, %v3700_v55, %v3792_v40  ;;  %v3909_v53 = vshrl.u32 %v5824_v52, 16  ;;  %v3911_v60 = vshll.u32 %v5824_v52, 16 }
  0x7b   : > { %v2389_v7 = vpack.i.bf16 %v2388_v41, %v2388_v41  ;;  %v2405_v50 = vmax.f32 %v2403_v35, %v2404_v42  ;;  %v2434_v38 = vrot.slane %v2433_v43, 4  ;;  %v2420_v56 = vmax.f32 %v2418_v39, %v2419_v44 }
  0x7c   : > { %v3794_v59 = vsel %vm3766_vm9, %v3701_v45, %v3793_v47  ;;  %v3916_v61 = vshrl.u32 %v5894_v51, 16  ;;  %v3918_v3 = vshll.u32 %v5894_v51, 16  ;;  %v3913_v28 = vrot.slane %v3911_v60, 1 }
  0x7d   : > { %v2406_v62 = vpack.i.bf16 %v2405_v50, %v2405_v50  ;;  %v2435_v63 = vmax.f32 %v2433_v43, %v2434_v38  ;;  %v3702_v1 = vunpack.c.l.b16 %v2389_v7  ;;  %v2421_v5 = vrot.slane %v2420_v56, 1 }
  0x7e   : > { %v1094_v46 = vcombine.high %v5385_v54, %v5385_v54  ;;  %v1101_v6 = vrot.slane %v5385_v54, %v5713_v14  ;;  %v3920_v16 = vrot.slane %v3918_v3, 1  ;;  %v5929_v20 = vrot.slane %v5894_v51, 1 }
  0x7f   : > { %v2436_v8 = vrot.slane %v2435_v63, 2  ;;  %v3703_v10 = vunpack.c.l.b16 %v2406_v62  ;;  %v3795_v13 = vsel %vm3768_vm10, %v3702_v1, %v3794_v59  ;;  %v2422_v19 = vmax.f32 %v2420_v56, %v2421_v5 }
  0x80   : > { %v5931_v21 = vor.u32 %v3913_v28, %v3909_v53  ;;  %v1108_v23 = vrot.slane %v1094_v46, %v5713_v14  ;;  %v1109_v31 = vcombine.high %v1101_v6, %v1101_v6  ;;  %v1118_v25 = vcombine.high %v5386_v58, %v5386_v58 }
  0x81   : > { %v2437_v29 = vmax.f32 %v2435_v63, %v2436_v8  ;;  %v3796_v24 = vsel %vm3770_vm11, %v3703_v10, %v3795_v13  ;;  %v2423_v22 = vpack.i.bf16 %v2422_v19, %v2422_v19  ;;  %v5936_v12 = vor.u32 %v3920_v16, %v3916_v61 }
  0x82   : > { %v5939_v26 = vrot.slane %v5386_v58, %v5713_v14  ;;  %v1142_v27 = vcombine.high %v5387_v18, %v5387_v18  ;;  %v5942_v32 = vrot.slane %v1118_v25, %v5713_v14  ;;  %v1149_v33 = vrot.slane %v5387_v18, %v5713_v14 }
  0x83   : > { %v2438_v30 = vrot.slane %v2437_v29, 1  ;;  %v1166_v34 = vcombine.high %v5388_v57, %v5388_v57  ;;  %v3704_v35 = vunpack.c.l.b16 %v2423_v22  ;;  %v1110_v36 = vcombine.high %v1108_v23, %v1108_v23 }
  0x84   : > { %v1156_v37 = vrot.slane %v1142_v27, %v5713_v14  ;;  %v5947_v48 = vrot.slane %v5388_v57, %v5713_v14  ;;  %v1133_v55 = vcombine.high %v5939_v26, %v5939_v26  ;;  %v1134_v40 = vcombine.high %v5942_v32, %v5942_v32 }
  0x85   : > { %v2439_v39 = vmax.f32 %v2437_v29, %v2438_v30  ;;  %v1157_v41 = vcombine.high %v1149_v33, %v1149_v33  ;;  %v3797_v42 = vsel %vm3772_vm12, %v3704_v35, %v3796_v24  ;;  %v5955_v44 = vrot.slane %v1166_v34, %v5713_v14 }
  0x86   : > { %v1158_v43 = vcombine.high %v1156_v37, %v1156_v37  ;;  %v2442_v45 = vsel %vm1759_vm6, %v1101_v6, 4286644096  ;;  %v1181_v7 = vcombine.high %v5947_v48, %v5947_v48  ;;  %v2445_v50 = vsel %vm1759_vm6, %v1149_v33, 4286644096 }
  0x87   : > { %v2440_v47 = vpack.i.bf16 %v2439_v39, %v2439_v39  ;;  %v2459_v38 = vsel %vm1759_vm6, %v1108_v23, 4286644096  ;;  %v2447_v53 = vmax.bf16 %v2445_v50, %v2442_v45  ;;  %v2462_v54 = vsel %vm1759_vm6, %v1156_v37, 4286644096 }
  0x88   : > { %v2476_v56 = vsel %vm1759_vm6, %v1109_v31, 4286644096  ;;  %v2479_v59 = vsel %vm1759_vm6, %v1157_v41, 4286644096  ;;  %v2464_v61 = vmax.bf16 %v2462_v54, %v2459_v38  ;;  %v2493_v63 = vsel %vm1759_vm6, %v1110_v36, 4286644096 }
  0x89   : > { %v3705_v60 = vunpack.c.l.b16 %v2440_v47  ;;  %v2481_v62 = vmax.bf16 %v2479_v59, %v2476_v56  ;;  %v2448_v1 = vunpack.i.l.bf16 %v2447_v53  ;;  %v2449_v3 = vunpack.i.h.bf16 %v2447_v53 }
  0x8a   : > { %v2496_v5 = vsel %vm1759_vm6, %v1158_v43, 4286644096  ;;  %v2510_v28 = vsel %vm1759_vm6, %v5939_v26, 4286644096  ;;  %v2465_v46 = vunpack.i.l.bf16 %v2464_v61  ;;  %v2466_v6 = vunpack.i.h.bf16 %v2464_v61 }
  0x8b   : > { %v3844_v58 = vpack.c.b16 %v3705_v60, %v3797_v42  ;;  %v2482_v8 = vunpack.i.l.bf16 %v2481_v62  ;;  %v2450_v10 = vmax.f32 %v2448_v1, %v2449_v3  ;;  %v2483_v13 = vunpack.i.h.bf16 %v2481_v62 }
  0x8c   : > { %v2498_v16 = vmax.bf16 %v2496_v5, %v2493_v63  ;;  %v2513_v18 = vsel %vm1759_vm6, %v5947_v48, 4286644096  ;;  %v1182_v57 = vcombine.high %v5955_v44, %v5955_v44  ;;  %v2467_v23 = vmax.f32 %v2465_v46, %v2466_v6 }
  0x8d   : > { %v3871_v19 = vsel %vm5688_vm3, 0, %v3844_v58  ;;  %v2515_v29 = vmax.bf16 %v2513_v18, %v2510_v28  ;;  %v2451_v31 = vrot.slane %v2450_v10, 4  ;;  %v2484_v25 = vmax.f32 %v2482_v8, %v2483_v13 }
  0x8e   : > { %v5977_v24 = vsel %vm5692_vm5, %v3871_v19, 0  ;;  %v2499_v22 = vunpack.i.l.bf16 %v2498_v16  ;;  %v2468_v33 = vrot.slane %v2467_v23, 4  ;;  %v2527_v34 = vsel %vm1759_vm6, %v5942_v32, 4286644096 }
  0x8f   : > { %4098 = vrot.lane.b32.xlu1 %v5977_v24, %s5607_s20  ;;  %4031 = vrot.lane.b32.xlu0 %v5977_v24, %s5602_s11  ;;  %v3923_v27 = vshrl.u32 %v5977_v24, 16  ;;  %v3925_v30 = vshll.u32 %v5977_v24, 16  ;;  %v2452_v35 = vmax.f32 %v2450_v10, %v2451_v31  ;;  %v2485_v36 = vrot.slane %v2484_v25, 4 }
  0x90   : > { %v2500_v37 = vunpack.i.h.bf16 %v2498_v16  ;;  %v2516_v39 = vunpack.i.l.bf16 %v2515_v29  ;;  %v2469_v42 = vmax.f32 %v2467_v23, %v2468_v33  ;;  %v2517_v43 = vunpack.i.h.bf16 %v2515_v29 }
  0x91   : > { %v3927_v41 = vrot.slane %v3925_v30, 1  ;;  %v2530_v45 = vsel %vm1759_vm6, %v5955_v44, 4286644096  ;;  %v2453_v47 = vrot.slane %v2452_v35, 2  ;;  %v2486_v50 = vmax.f32 %v2484_v25, %v2485_v36 }
  0x92   : > { %v2501_v38 = vmax.f32 %v2499_v22, %v2500_v37  ;;  %v2532_v53 = vmax.bf16 %v2530_v45, %v2527_v34  ;;  %v2470_v56 = vrot.slane %v2469_v42, 2  ;;  %v2518_v59 = vmax.f32 %v2516_v39, %v2517_v43  ;;  %v5389_v43 = vld.sshfl [vmem:[%s5723_s15 + $0x40] sm:$0x33 pattern:$0x75316420] }
  0x93   : > { %4142 = vrot.lane.b32.xlu1 %v5916_v49, %s5608_s21  ;;  %4075 = vrot.lane.b32.xlu0 %v5916_v49, %s5606_s19  ;;  %v5993_v54 = vor.u32 %v3927_v41, %v3923_v27  ;;  %v2544_v44 = vsel %vm1759_vm6, %v1133_v55, 4286644096  ;;  %v2454_v60 = vmax.f32 %v2452_v35, %v2453_v47  ;;  %v2487_v61 = vrot.slane %v2486_v50, 2 }
  0x94   : > { %v2502_v62 = vrot.slane %v2501_v38, 4  ;;  %v2533_v63 = vunpack.i.l.bf16 %v2532_v53  ;;  %v2471_v1 = vmax.f32 %v2469_v42, %v2470_v56  ;;  %v2519_v3 = vrot.slane %v2518_v59, 4 }
  0x95   : > { %v2534_v5 = vunpack.i.h.bf16 %v2532_v53  ;;  %v2547_v28 = vsel %vm1759_vm6, %v1181_v7, 4286644096  ;;  %v2455_v58 = vrot.slane %v2454_v60, 1  ;;  %v2488_v46 = vmax.f32 %v2486_v50, %v2487_v61 }
  0x96   : > { %v2503_v6 = vmax.f32 %v2501_v38, %v2502_v62  ;;  %v2549_v8 = vmax.bf16 %v2547_v28, %v2544_v44  ;;  %v2472_v26 = vrot.slane %v2471_v1, 1  ;;  %v2520_v55 = vmax.f32 %v2518_v59, %v2519_v3  ;;  %v5390_v62 = vld.sshfl [vmem:[%s5723_s15 + $0x44] sm:$0x33 pattern:$0x75316420] }
  0x97   : > { %4008 = vrot.lane.b32.xlu1 %v5916_v49, %s5603_s16  ;;  %4144 = vrot.lane.b32.xlu0 %v5929_v20, %s5608_s21  ;;  %v2535_v10 = vmax.f32 %v2533_v63, %v2534_v5  ;;  %v2561_v48 = vsel %vm1759_vm6, %v1134_v40, 4286644096  ;;  %v2456_v13 = vmax.f32 %v2454_v60, %v2455_v58  ;;  %v2489_v7 = vrot.slane %v2488_v46, 1 }
  0x98   : > { %v2504_v16 = vrot.slane %v2503_v6, 2  ;;  %v2550_v18 = vunpack.i.l.bf16 %v2549_v8  ;;  %v2473_v19 = vmax.f32 %v2471_v1, %v2472_v26  ;;  %v2521_v23 = vrot.slane %v2520_v55, 2 }
  0x99   : > { %v2536_v29 = vrot.slane %v2535_v10, 4  ;;  %v2551_v31 = vunpack.i.h.bf16 %v2549_v8  ;;  %v2457_v49 = vpack.i.bf16 %v2456_v13, %v2456_v13  ;;  %v2490_v25 = vmax.f32 %v2488_v46, %v2489_v7 }
  0x9a   : > { %v2505_v22 = vmax.f32 %v2503_v6, %v2504_v16  ;;  %v2564_v27 = vsel %vm1759_vm6, %v1182_v57, 4286644096  ;;  %v6017_v32 = vrot.slane %v5977_v24, 1  ;;  %v2474_v40 = vpack.i.bf16 %v2473_v19, %v2473_v19 }
  0x9b   : > { %4077 = vrot.lane.b32.xlu1 %v5929_v20, %s5606_s19  ;;  %4010 = vrot.lane.b32.xlu0 %v5929_v20, %s5603_s16  ;;  %v2522_v30 = vmax.f32 %v2520_v55, %v2521_v23  ;;  %v2537_v33 = vmax.f32 %v2535_v10, %v2536_v29  ;;  %v2491_v34 = vpack.i.bf16 %v2490_v25, %v2490_v25  ;;  %v3706_v42 = vunpack.c.l.b16 %v2457_v49  ;;  %v5391_v10 = vld.sshfl [vmem:[%s5723_s15 + $0x48] sm:$0x33 pattern:$0x75316420] }
  0x9c   : > { %v2506_v35 = vrot.slane %v2505_v22, 1  ;;  %v2552_v36 = vmax.f32 %v2550_v18, %v2551_v31  ;;  %v2566_v37 = vmax.bf16 %v2564_v27, %v2561_v48  ;;  %v3707_v57 = vunpack.c.l.b16 %v2474_v40  ;;  %v5392_v19 = vld.sshfl [vmem:[%s5723_s15 + $0x4c] sm:$0x33 pattern:$0x75316420] }
  0x9d   : > { %v2523_v39 = vrot.slane %v2522_v30, 1  ;;  %v2538_v41 = vrot.slane %v2537_v33, 2  ;;  %v3708_v56 = vunpack.c.l.b16 %v2491_v34  ;;  %v1190_v63 = vcombine.high %v5389_v43, %v5389_v43 }
  0x9e   : > { %v2507_v45 = vmax.f32 %v2505_v22, %v2506_v35  ;;  %v2553_v47 = vrot.slane %v2552_v36, 4  ;;  %v2567_v50 = vunpack.i.l.bf16 %v2566_v37  ;;  %v2568_v20 = vunpack.i.h.bf16 %v2566_v37 }
  0x9f   : > { %4079 = vrot.lane.b32.xlu0 %v6017_v32, %s5606_s19  ;;  %4121 = vrot.lane.b32.xlu1 %v5931_v21, %s5609_s22  ;;  %v2524_v38 = vmax.f32 %v2522_v30, %v2523_v39  ;;  %v2539_v53 = vmax.f32 %v2537_v33, %v2538_v41  ;;  %v3798_v59 = vsel %vm3762_vm7, %v3707_v57, %v3706_v42  ;;  %vm4246_vm1 = vcmask 162816  }
  0xa0   : > { %v2508_v44 = vpack.i.bf16 %v2507_v45, %v2507_v45  ;;  %v2554_v60 = vmax.f32 %v2552_v36, %v2553_v47  ;;  %v2569_v61 = vmax.f32 %v2567_v50, %v2568_v20  ;;  %v3799_v5 = vsel %vm3764_vm8, %v3708_v56, %v3798_v59 }
  0xa1   : > { %v2525_v1 = vpack.i.bf16 %v2524_v38, %v2524_v38  ;;  %v2540_v3 = vrot.slane %v2539_v53, 1  ;;  %v1197_v28 = vrot.slane %v5389_v43, %v5713_v14  ;;  %v1204_v8 = vrot.slane %v1190_v63, %v5713_v14 }
  0xa2   : > { %v2555_v58 = vrot.slane %v2554_v60, 2  ;;  %v2570_v46 = vrot.slane %v2569_v61, 4  ;;  %v3709_v6 = vunpack.c.l.b16 %v2508_v44  ;;  %v1214_v13 = vcombine.high %v5390_v62, %v5390_v62 }
  0xa3   : > { %3968 = vrot.lane.b32.xlu1 %v5931_v21, %s5604_s17  ;;  %4054 = vrot.lane.b32.xlu0 %v5931_v21, %s5605_s18  ;;  %v2541_v26 = vmax.f32 %v2539_v53, %v2540_v3  ;;  %v3710_v55 = vunpack.c.l.b16 %v2525_v1  ;;  %v1205_v48 = vcombine.high %v1197_v28, %v1197_v28  ;;  %v1206_v23 = vcombine.high %v1204_v8, %v1204_v8 }
  0xa4   : > { %v2556_v7 = vmax.f32 %v2554_v60, %v2555_v58  ;;  %v2571_v16 = vmax.f32 %v2569_v61, %v2570_v46  ;;  %v3800_v18 = vsel %vm3766_vm9, %v3709_v6, %v3799_v5  ;;  %v6038_v49 = vrot.slane %v5390_v62, %v5713_v14 }
  0xa5   : > { %v2542_v29 = vpack.i.bf16 %v2541_v26, %v2541_v26  ;;  %v3801_v31 = vsel %vm3768_vm10, %v3710_v55, %v3800_v18  ;;  %v6041_v25 = vrot.slane %v1214_v13, %v5713_v14  ;;  %v1238_v27 = vcombine.high %v5391_v10, %v5391_v10 }
  0xa6   : > { %v2557_v21 = vrot.slane %v2556_v7, 1  ;;  %v2572_v22 = vrot.slane %v2571_v16, 2  ;;  %v1245_v40 = vrot.slane %v5391_v10, %v5713_v14  ;;  %v1229_v33 = vcombine.high %v6038_v49, %v6038_v49 }
  0xa7   : > { %4056 = vrot.lane.b32.xlu1 %v5936_v12, %s5605_s18  ;;  %4123 = vrot.lane.b32.xlu0 %v5936_v12, %s5609_s22  ;;  %v3711_v30 = vunpack.c.l.b16 %v2542_v29  ;;  %v1230_v34 = vcombine.high %v6041_v25, %v6041_v25  ;;  %v1262_v35 = vcombine.high %v5392_v19, %v5392_v19  ;;  %v1252_v39 = vrot.slane %v1238_v27, %v5713_v14 }
  0xa8   : > { %v2558_v36 = vmax.f32 %v2556_v7, %v2557_v21  ;;  %v2573_v37 = vmax.f32 %v2571_v16, %v2572_v22  ;;  %v1253_v41 = vcombine.high %v1245_v40, %v1245_v40  ;;  %v6055_v57 = vrot.slane %v5392_v19, %v5713_v14 }
  0xa9   : > { %v3802_v42 = vsel %vm3770_vm11, %v3711_v30, %v3801_v31  ;;  %v6058_v43 = vrot.slane %v1262_v35, %v5713_v14  ;;  %v2578_v45 = vsel %vm1759_vm6, %v1197_v28, 4286644096  ;;  %v1254_v20 = vcombine.high %v1252_v39, %v1252_v39 }
  0xaa   : > { %v2559_v47 = vpack.i.bf16 %v2558_v36, %v2558_v36  ;;  %v2574_v50 = vrot.slane %v2573_v37, 1  ;;  %v2581_v38 = vsel %vm1759_vm6, %v1245_v40, 4286644096  ;;  %v1277_v53 = vcombine.high %v6055_v57, %v6055_v57 }
  0xab   : > { %4125 = vrot.lane.b32.xlu1 %v5993_v54, %s5609_s22  ;;  %3970 = vrot.lane.b32.xlu0 %v5936_v12, %s5604_s17  ;;  %v1278_v56 = vcombine.high %v6058_v43, %v6058_v43  ;;  %v2583_v59 = vmax.bf16 %v2581_v38, %v2578_v45  ;;  %v2595_v44 = vsel %vm1759_vm6, %v1204_v8, 4286644096  ;;  %v2598_v62 = vsel %vm1759_vm6, %v1252_v39, 4286644096 }
  0xac   : > { %v2575_v60 = vmax.f32 %v2573_v37, %v2574_v50  ;;  %v3712_v61 = vunpack.c.l.b16 %v2559_v47  ;;  %v2612_v63 = vsel %vm1759_vm6, %v1205_v48, 4286644096  ;;  %v2600_v5 = vmax.bf16 %v2598_v62, %v2595_v44 }
  0xad   : > { %v2584_v1 = vunpack.i.l.bf16 %v2583_v59  ;;  %v2585_v3 = vunpack.i.h.bf16 %v2583_v59  ;;  %v2615_v12 = vsel %vm1759_vm6, %v1253_v41, 4286644096  ;;  %v2629_v6 = vsel %vm1759_vm6, %v1206_v23, 4286644096 }
  0xae   : > { %v2576_v28 = vpack.i.bf16 %v2575_v60, %v2575_v60  ;;  %v3803_v58 = vsel %vm3772_vm12, %v3712_v61, %v3802_v42  ;;  %v2617_v46 = vmax.bf16 %v2615_v12, %v2612_v63  ;;  %v2601_v26 = vunpack.i.l.bf16 %v2600_v5 }
  0xaf   : > { %4146 = vrot.lane.b32.xlu1 %v6017_v32, %s5608_s21  ;;  %4058 = vrot.lane.b32.xlu0 %v5993_v54, %s5605_s18  ;;  %v2586_v8 = vmax.f32 %v2584_v1, %v2585_v3  ;;  %v2602_v55 = vunpack.i.h.bf16 %v2600_v5  ;;  %v2632_v10 = vsel %vm1759_vm6, %v1254_v20, 4286644096  ;;  %v2646_v23 = vsel %vm1759_vm6, %v6038_v49, 4286644096 }
  0xb0   : > { %v3713_v48 = vunpack.c.l.b16 %v2576_v28  ;;  %v2618_v13 = vunpack.i.l.bf16 %v2617_v46  ;;  %v2619_v7 = vunpack.i.h.bf16 %v2617_v46  ;;  %v2634_v16 = vmax.bf16 %v2632_v10, %v2629_v6 }
  0xb1   : > { %v2587_v18 = vrot.slane %v2586_v8, 4  ;;  %v2603_v19 = vmax.f32 %v2601_v26, %v2602_v55  ;;  %v2649_v29 = vsel %vm1759_vm6, %v6055_v57, 4286644096  ;;  %v2663_v36 = vsel %vm1759_vm6, %v6041_v25, 4286644096 }
  0xb2   : > { %v3845_v31 = vpack.c.b16 %v3713_v48, %v3803_v58  ;;  %v2620_v21 = vmax.f32 %v2618_v13, %v2619_v7  ;;  %v2635_v22 = vunpack.i.l.bf16 %v2634_v16  ;;  %v2636_v27 = vunpack.i.h.bf16 %v2634_v16 }
  0xb3   : > { %3972 = vrot.lane.b32.xlu1 %v5993_v54, %s5604_s17  ;;  %v2588_v40 = vmax.f32 %v2586_v8, %v2587_v18  ;;  %v2604_v30 = vrot.slane %v2603_v19, 4  ;;  %v2651_v35 = vmax.bf16 %v2649_v29, %v2646_v23  ;;  %v2666_v42 = vsel %vm1759_vm6, %v6058_v43, 4286644096 }
  0xb4   : > { %v3872_v37 = vsel %vm5688_vm3, 0, %v3845_v31  ;;  %v2621_v39 = vrot.slane %v2620_v21, 4  ;;  %v2637_v41 = vmax.f32 %v2635_v22, %v2636_v27  ;;  %v2668_v5 = vmax.bf16 %v2666_v42, %v2663_v36 }
  0xb5   : > { %v6095_v45 = vsel %vm5692_vm5, %v3872_v37, 0  ;;  %v2589_v47 = vrot.slane %v2588_v40, 2  ;;  %v2605_v54 = vmax.f32 %v2603_v19, %v2604_v30  ;;  %v2652_v50 = vunpack.i.l.bf16 %v2651_v35 }
  0xb6   : > { %4100 = vrot.lane.b32.xlu0 %v6095_v45, %s5607_s20  ;;  %v3930_v20 = vshrl.u32 %v6095_v45, 16  ;;  %v3932_v38 = vshll.u32 %v6095_v45, 16  ;;  %v6102_v59 = vrot.slane %v6095_v45, 1  ;;  %v2622_v44 = vmax.f32 %v2620_v21, %v2621_v39 }
  0xb7   : > { %4012 = vrot.lane.b32.xlu1 %v6017_v32, %s5603_s16  ;;  %v2590_v60 = vmax.f32 %v2588_v40, %v2589_v47  ;;  %v2606_v61 = vrot.slane %v2605_v54, 2  ;;  %v2638_v62 = vrot.slane %v2637_v41, 4  ;;  %v2653_v63 = vunpack.i.h.bf16 %v2651_v35  ;;  %v5393_v47 = vld.sshfl [vmem:[%s5723_s15 + $0x50] sm:$0x33 pattern:$0x75316420] }
  0xb8   : > { %v3934_v1 = vrot.slane %v3932_v38, 1  ;;  %v2623_v3 = vrot.slane %v2622_v44, 2  ;;  %v2680_v12 = vsel %vm1759_vm6, %v1229_v33, 4286644096  ;;  %v2669_v55 = vunpack.i.l.bf16 %v2668_v5 }
  0xb9   : > { %v2591_v28 = vrot.slane %v2590_v60, 1  ;;  %v2607_v58 = vmax.f32 %v2605_v54, %v2606_v61  ;;  %v2639_v46 = vmax.f32 %v2637_v41, %v2638_v62  ;;  %v2654_v6 = vmax.f32 %v2652_v50, %v2653_v63 }
  0xba   : > { %v3935_v8 = vor.u32 %v3934_v1, %v3930_v20  ;;  %v2624_v26 = vmax.f32 %v2622_v44, %v2623_v3  ;;  %v2670_v32 = vunpack.i.h.bf16 %v2668_v5  ;;  %v2683_v33 = vsel %vm1759_vm6, %v1277_v53, 4286644096  ;;  %v5394_v3 = vld.sshfl [vmem:[%s5723_s15 + $0x54] sm:$0x33 pattern:$0x75316420] }
  0xbb   : > { %4033 = vrot.lane.b32.xlu1 %v6095_v45, %s5602_s11  ;;  %v2592_v10 = vmax.f32 %v2590_v60, %v2591_v28  ;;  %v2608_v48 = vrot.slane %v2607_v58, 1  ;;  %v2640_v13 = vrot.slane %v2639_v46, 2  ;;  %v2655_v7 = vrot.slane %v2654_v6, 4 }
  0xbc   : > { %4127 = vrot.lane.b32.xlu0 %v3935_v8, %s5609_s22  ;;  %v2625_v49 = vrot.slane %v2624_v26, 1  ;;  %v2671_v16 = vmax.f32 %v2669_v55, %v2670_v32  ;;  %v2697_v18 = vsel %vm1759_vm6, %v1230_v34, 4286644096  ;;  %v2685_v27 = vmax.bf16 %v2683_v33, %v2680_v12 }
  0xbd   : > { %v2593_v19 = vpack.i.bf16 %v2592_v10, %v2592_v10  ;;  %v2609_v23 = vmax.f32 %v2607_v58, %v2608_v48  ;;  %v2641_v29 = vmax.f32 %v2639_v46, %v2640_v13  ;;  %v2656_v31 = vmax.f32 %v2654_v6, %v2655_v7  ;;  %v5395_v13 = vld.sshfl [vmem:[%s5723_s15 + $0x58] sm:$0x33 pattern:$0x75316420] }
  0xbe   : > { %v2626_v21 = vmax.f32 %v2624_v26, %v2625_v49  ;;  %v2672_v22 = vrot.slane %v2671_v16, 4  ;;  %v2700_v57 = vsel %vm1759_vm6, %v1278_v56, 4286644096  ;;  %v2686_v36 = vunpack.i.l.bf16 %v2685_v27 }
  0xbf   : > { %4060 = vrot.lane.b32.xlu1 %v3935_v8, %s5605_s18  ;;  %v2610_v53 = vpack.i.bf16 %v2609_v23, %v2609_v23  ;;  %v2642_v40 = vrot.slane %v2641_v29, 1  ;;  %v2657_v25 = vrot.slane %v2656_v31, 2  ;;  %v2702_v30 = vmax.bf16 %v2700_v57, %v2697_v18 }
  0xc0   : > { %4148 = vrot.lane.b32.xlu0 %v6102_v59, %s5608_s21  ;;  %v2627_v34 = vpack.i.bf16 %v2626_v21, %v2626_v21  ;;  %v2673_v35 = vmax.f32 %v2671_v16, %v2672_v22  ;;  %v2687_v37 = vunpack.i.h.bf16 %v2685_v27  ;;  %v3714_v50 = vunpack.c.l.b16 %v2593_v19  ;;  %v5396_v27 = vld.sshfl [vmem:[%s5723_s15 + $0x5c] sm:$0x33 pattern:$0x75316420] }
  0xc1   : > { %v2643_v39 = vmax.f32 %v2641_v29, %v2642_v40  ;;  %v2658_v41 = vmax.f32 %v2656_v31, %v2657_v25  ;;  %v2703_v42 = vunpack.i.l.bf16 %v2702_v30  ;;  %v2704_v43 = vunpack.i.h.bf16 %v2702_v30 }
  0xc2   : > { %v2674_v56 = vrot.slane %v2673_v35, 2  ;;  %v2688_v54 = vmax.f32 %v2686_v36, %v2687_v37  ;;  %v3715_v20 = vunpack.c.l.b16 %v2610_v53  ;;  %v3716_v61 = vunpack.c.l.b16 %v2627_v34 }
  0xc3   : > { %4081 = vrot.lane.b32.xlu1 %v6102_v59, %s5606_s19  ;;  %v2644_v38 = vpack.i.bf16 %v2643_v39, %v2643_v39  ;;  %v2659_v44 = vrot.slane %v2658_v41, 1  ;;  %v2705_v60 = vmax.f32 %v2703_v42, %v2704_v43  ;;  %v1286_v5 = vcombine.high %v5393_v47, %v5393_v47 }
  0xc4   : > { %3974 = vrot.lane.b32.xlu0 %v3935_v8, %s5604_s17  ;;  %v2675_v62 = vmax.f32 %v2673_v35, %v2674_v56  ;;  %v2689_v63 = vrot.slane %v2688_v54, 4  ;;  %v3804_v1 = vsel %vm3762_vm7, %v3715_v20, %v3714_v50  ;;  %v1293_v55 = vrot.slane %v5393_v47, %v5713_v14 }
  0xc5   : > { %v2660_v12 = vmax.f32 %v2658_v41, %v2659_v44  ;;  %v2706_v28 = vrot.slane %v2705_v60, 4  ;;  %v3717_v58 = vunpack.c.l.b16 %v2644_v38  ;;  %v3805_v46 = vsel %vm3764_vm8, %v3716_v61, %v3804_v1 }
  0xc6   : > { %v2676_v6 = vrot.slane %v2675_v62, 1  ;;  %v2690_v26 = vmax.f32 %v2688_v54, %v2689_v63  ;;  %v1300_v32 = vrot.slane %v1286_v5, %v5713_v14  ;;  %v1310_v7 = vcombine.high %v5394_v3, %v5394_v3 }
  0xc7   : > { %v2661_v10 = vpack.i.bf16 %v2660_v12, %v2660_v12  ;;  %v2707_v8 = vmax.f32 %v2705_v60, %v2706_v28  ;;  %v3806_v48 = vsel %vm3766_vm9, %v3717_v58, %v3805_v46  ;;  %v1301_v33 = vcombine.high %v1293_v55, %v1293_v55 }
  0xc8   : > { %4014 = vrot.lane.b32.xlu0 %v6102_v59, %s5603_s16  ;;  %v2677_v49 = vmax.f32 %v2675_v62, %v2676_v6  ;;  %v2691_v16 = vrot.slane %v2690_v26, 2  ;;  %v1302_v18 = vcombine.high %v1300_v32, %v1300_v32  ;;  %v6142_v29 = vrot.slane %v5394_v3, %v5713_v14 }
  0xc9   : > { %v2708_v19 = vrot.slane %v2707_v8, 2  ;;  %v3718_v23 = vunpack.c.l.b16 %v2661_v10  ;;  %v6145_v31 = vrot.slane %v1310_v7, %v5713_v14  ;;  %v1334_v57 = vcombine.high %v5395_v13, %v5395_v13 }
  0xca   : > { %v2678_v21 = vpack.i.bf16 %v2677_v49, %v2677_v49  ;;  %v2692_v22 = vmax.f32 %v2690_v26, %v2691_v16  ;;  %v1341_v53 = vrot.slane %v5395_v13, %v5713_v14  ;;  %v1325_v25 = vcombine.high %v6142_v29, %v6142_v29 }
  0xcb   : > { %v2709_v40 = vmax.f32 %v2707_v8, %v2708_v19  ;;  %v3807_v59 = vsel %vm3768_vm10, %v3718_v23, %v3806_v48  ;;  %v1326_v30 = vcombine.high %v6145_v31, %v6145_v31  ;;  %v1348_v36 = vrot.slane %v1334_v57, %v5713_v14 }
  0xcc   : > { %v2693_v34 = vrot.slane %v2692_v22, 1  ;;  %v3719_v35 = vunpack.c.l.b16 %v2678_v21  ;;  %v1349_v37 = vcombine.high %v1341_v53, %v1341_v53  ;;  %v1358_v41 = vcombine.high %v5396_v27, %v5396_v27 }
  0xcd   : > { %v2710_v39 = vrot.slane %v2709_v40, 1  ;;  %v6156_v42 = vrot.slane %v5396_v27, %v5713_v14  ;;  %v2714_v43 = vsel %vm1759_vm6, %v1293_v55, 4286644096  ;;  %v1350_v54 = vcombine.high %v1348_v36, %v1348_v36 }
  0xce   : > { %v2694_v47 = vmax.f32 %v2692_v22, %v2693_v34  ;;  %v3808_v56 = vsel %vm3770_vm11, %v3719_v35, %v3807_v59  ;;  %v2717_v50 = vsel %vm1759_vm6, %v1341_v53, 4286644096  ;;  %v6162_v38 = vrot.slane %v1358_v41, %v5713_v14 }
  0xcf   : > { %v2711_v20 = vmax.f32 %v2709_v40, %v2710_v39  ;;  %v1373_v44 = vcombine.high %v6156_v42, %v6156_v42  ;;  %v2719_v60 = vmax.bf16 %v2717_v50, %v2714_v43  ;;  %v2731_v62 = vsel %vm1759_vm6, %v1300_v32, 4286644096 }
  0xd0   : > { %v2695_v61 = vpack.i.bf16 %v2694_v47, %v2694_v47  ;;  %v2734_v63 = vsel %vm1759_vm6, %v1348_v36, 4286644096  ;;  %v2748_v1 = vsel %vm1759_vm6, %v1301_v33, 4286644096  ;;  %v1374_v5 = vcombine.high %v6162_v38, %v6162_v38 }
  0xd1   : > { %v2712_v3 = vpack.i.bf16 %v2711_v20, %v2711_v20  ;;  %v2720_v12 = vunpack.i.l.bf16 %v2719_v60  ;;  %v2721_v28 = vunpack.i.h.bf16 %v2719_v60  ;;  %v2736_v46 = vmax.bf16 %v2734_v63, %v2731_v62 }
  0xd2   : > { %v3720_v58 = vunpack.c.l.b16 %v2695_v61  ;;  %v2751_v6 = vsel %vm1759_vm6, %v1349_v37, 4286644096  ;;  %v2765_v26 = vsel %vm1759_vm6, %v1302_v18, 4286644096  ;;  %v2768_v32 = vsel %vm1759_vm6, %v1350_v54, 4286644096 }
  0xd3   : > { %v3721_v55 = vunpack.c.l.b16 %v2712_v3  ;;  %v2722_v10 = vmax.f32 %v2720_v12, %v2721_v28  ;;  %v2753_v8 = vmax.bf16 %v2751_v6, %v2748_v1  ;;  %v2737_v13 = vunpack.i.l.bf16 %v2736_v46 }
  0xd4   : > { %v3809_v48 = vsel %vm3772_vm12, %v3720_v58, %v3808_v56  ;;  %v2738_v7 = vunpack.i.h.bf16 %v2736_v46  ;;  %v2770_v49 = vmax.bf16 %v2768_v32, %v2765_v26  ;;  %v2782_v18 = vsel %vm1759_vm6, %v6142_v29, 4286644096 }
  0xd5   : > { %v3846_v16 = vpack.c.b16 %v3721_v55, %v3809_v48  ;;  %v2723_v33 = vrot.slane %v2722_v10, 4  ;;  %v2754_v19 = vunpack.i.l.bf16 %v2753_v8  ;;  %v2755_v23 = vunpack.i.h.bf16 %v2753_v8 }
  0xd6   : > { %v2739_v21 = vmax.f32 %v2737_v13, %v2738_v7  ;;  %v2771_v22 = vunpack.i.l.bf16 %v2770_v49  ;;  %v2772_v27 = vunpack.i.h.bf16 %v2770_v49  ;;  %v2785_v59 = vsel %vm1759_vm6, %v6156_v42, 4286644096 }
  0xd7   : > { %v3873_v57 = vsel %vm5688_vm3, 0, %v3846_v16  ;;  %v2724_v53 = vmax.f32 %v2722_v10, %v2723_v33  ;;  %v2756_v40 = vmax.f32 %v2754_v19, %v2755_v23  ;;  %v2787_v37 = vmax.bf16 %v2785_v59, %v2782_v18 }
  0xd8   : > { %v6183_v34 = vsel %vm5692_vm5, %v3873_v57, 0  ;;  %v2740_v35 = vrot.slane %v2739_v21, 4  ;;  %v2773_v36 = vmax.f32 %v2771_v22, %v2772_v27  ;;  %v2799_v63 = vsel %vm1759_vm6, %v6145_v31, 4286644096 }
  0xd9   : > { %4102 = vrot.lane.b32.xlu1 %v6183_v34, %s5607_s20  ;;  %4035 = vrot.lane.b32.xlu0 %v6183_v34, %s5602_s11  ;;  %v3937_v39 = vshrl.u32 %v6183_v34, 16  ;;  %v3939_v41 = vshll.u32 %v6183_v34, 16  ;;  %v6192_v43 = vrot.slane %v6183_v34, 1  ;;  %v2725_v47 = vrot.slane %v2724_v53, 2 }
  0xda   : > { %v2741_v56 = vmax.f32 %v2739_v21, %v2740_v35  ;;  %v2757_v54 = vrot.slane %v2756_v40, 4  ;;  %v2774_v50 = vrot.slane %v2773_v36, 4  ;;  %v2788_v20 = vunpack.i.l.bf16 %v2787_v37 }
  0xdb   : > { %v3941_v60 = vrot.slane %v3939_v41, 1  ;;  %v2726_v61 = vmax.f32 %v2724_v53, %v2725_v47  ;;  %v2789_v62 = vunpack.i.h.bf16 %v2787_v37  ;;  %v2802_v28 = vsel %vm1759_vm6, %v6162_v38, 4286644096 }
  0xdc   : > { %v2742_v1 = vrot.slane %v2741_v56, 2  ;;  %v2758_v3 = vmax.f32 %v2756_v40, %v2757_v54  ;;  %v2775_v12 = vmax.f32 %v2773_v36, %v2774_v50  ;;  %v2804_v26 = vmax.bf16 %v2802_v28, %v2799_v63 }
  0xdd   : > { %v3942_v58 = vor.u32 %v3941_v60, %v3937_v39  ;;  %v2727_v46 = vrot.slane %v2726_v61, 1  ;;  %v2790_v6 = vmax.f32 %v2788_v20, %v2789_v62  ;;  %v2816_v32 = vsel %vm1759_vm6, %v1325_v25, 4286644096 }
  0xde   : > { %v2743_v55 = vmax.f32 %v2741_v56, %v2742_v1  ;;  %v2759_v10 = vrot.slane %v2758_v3, 2  ;;  %v2776_v8 = vrot.slane %v2775_v12, 2  ;;  %v2805_v7 = vunpack.i.l.bf16 %v2804_v26  ;;  %v5397_v56 = vld.sshfl [vmem:[%s5723_s15 + $0x60] sm:$0x33 pattern:$0x75316420] }
  0xdf   : > { %4129 = vrot.lane.b32.xlu1 %v3942_v58, %s5609_s22  ;;  %4062 = vrot.lane.b32.xlu0 %v3942_v58, %s5605_s18  ;;  %v2728_v48 = vmax.f32 %v2726_v61, %v2727_v46  ;;  %v2791_v13 = vrot.slane %v2790_v6, 4  ;;  %v2806_v49 = vunpack.i.h.bf16 %v2804_v26  ;;  %v2819_v23 = vsel %vm1759_vm6, %v1373_v44, 4286644096 }
  0xe0   : > { %v2744_v16 = vrot.slane %v2743_v55, 1  ;;  %v2760_v33 = vmax.f32 %v2758_v3, %v2759_v10  ;;  %v2777_v19 = vmax.f32 %v2775_v12, %v2776_v8  ;;  %v2821_v25 = vmax.bf16 %v2819_v23, %v2816_v32  ;;  %v5398_v61 = vld.sshfl [vmem:[%s5723_s15 + $0x64] sm:$0x33 pattern:$0x75316420] }
  0xe1   : > { %v2729_v21 = vpack.i.bf16 %v2728_v48, %v2728_v48  ;;  %v2792_v29 = vmax.f32 %v2790_v6, %v2791_v13  ;;  %v2807_v22 = vmax.f32 %v2805_v7, %v2806_v49  ;;  %v2833_v53 = vsel %vm1759_vm6, %v1326_v30, 4286644096 }
  0xe2   : > { %v2745_v27 = vmax.f32 %v2743_v55, %v2744_v16  ;;  %v2761_v18 = vrot.slane %v2760_v33, 1  ;;  %v2778_v57 = vrot.slane %v2777_v19, 1  ;;  %v2822_v40 = vunpack.i.l.bf16 %v2821_v25  ;;  %v5399_v16 = vld.sshfl [vmem:[%s5723_s15 + $0x68] sm:$0x33 pattern:$0x75316420] }
  0xe3   : > { %4150 = vrot.lane.b32.xlu1 %v6192_v43, %s5608_s21  ;;  %4083 = vrot.lane.b32.xlu0 %v6192_v43, %s5606_s19  ;;  %v2793_v42 = vrot.slane %v2792_v29, 2  ;;  %v2808_v44 = vrot.slane %v2807_v22, 4  ;;  %v2823_v59 = vunpack.i.h.bf16 %v2821_v25  ;;  %v2836_v31 = vsel %vm1759_vm6, %v1374_v5, 4286644096 }
  0xe4   : > { %v2746_v35 = vpack.i.bf16 %v2745_v27, %v2745_v27  ;;  %v2762_v36 = vmax.f32 %v2760_v33, %v2761_v18  ;;  %v2779_v37 = vmax.f32 %v2777_v19, %v2778_v57  ;;  %v2838_v47 = vmax.bf16 %v2836_v31, %v2833_v53  ;;  %v5400_v27 = vld.sshfl [vmem:[%s5723_s15 + $0x6c] sm:$0x33 pattern:$0x75316420]  ;;  %v6238_v57 = vpop.permute.xlu0 %3964 }
  0xe5   : > { %v2794_v30 = vmax.f32 %v2792_v29, %v2793_v42  ;;  %v2809_v39 = vmax.f32 %v2807_v22, %v2808_v44  ;;  %v2824_v41 = vmax.f32 %v2822_v40, %v2823_v59  ;;  %v3722_v20 = vunpack.c.l.b16 %v2729_v21 }
  0xe6   : > { %v2763_v54 = vpack.i.bf16 %v2762_v36, %v2762_v36  ;;  %v2780_v50 = vpack.i.bf16 %v2779_v37, %v2779_v37  ;;  %v3723_v60 = vunpack.c.l.b16 %v2746_v35  ;;  %v2839_v3 = vunpack.i.l.bf16 %v2838_v47 }
  0xe7   : > { %3976 = vrot.lane.b32.xlu1 %v3942_v58, %s5604_s17  ;;  %v2795_v62 = vrot.slane %v2794_v30, 1  ;;  %v2810_v63 = vrot.slane %v2809_v39, 2  ;;  %v2825_v1 = vrot.slane %v2824_v41, 4  ;;  %v2840_v12 = vunpack.i.h.bf16 %v2838_v47 }
  0xe8   : > { %v3724_v38 = vunpack.c.l.b16 %v2763_v54  ;;  %v3725_v5 = vunpack.c.l.b16 %v2780_v50  ;;  %v3810_v28 = vsel %vm3762_vm7, %v3723_v60, %v3722_v20  ;;  %v1382_v55 = vcombine.high %v5397_v56, %v5397_v56 }
  0xe9   : > { %v2796_v46 = vmax.f32 %v2794_v30, %v2795_v62  ;;  %v2811_v6 = vmax.f32 %v2809_v39, %v2810_v63  ;;  %v2826_v26 = vmax.f32 %v2824_v41, %v2825_v1  ;;  %v2841_v10 = vmax.f32 %v2839_v3, %v2840_v12  ;;  %v6258_v12 = vpop.permute.xlu0 %3966 }
  0xea   : > { %v3811_v8 = vsel %vm3764_vm8, %v3724_v38, %v3810_v28  ;;  %v1389_v58 = vrot.slane %v5397_v56, %v5713_v14  ;;  %v1406_v32 = vcombine.high %v5398_v61, %v5398_v61  ;;  %v1396_v19 = vrot.slane %v1382_v55, %v5713_v14 }
  0xeb   : > { %v2797_v48 = vpack.i.bf16 %v2796_v46, %v2796_v46  ;;  %v2812_v13 = vrot.slane %v2811_v6, 1  ;;  %v2827_v7 = vrot.slane %v2826_v26, 2  ;;  %v3812_v49 = vsel %vm3766_vm9, %v3725_v5, %v3811_v8  ;;  %4016 = vrot.lane.b32.xlu1 %v6192_v43, %s5603_s16 }
  0xec   : > { %v2842_v33 = vrot.slane %v2841_v10, 4  ;;  %v1397_v23 = vcombine.high %v1389_v58, %v1389_v58  ;;  %v6232_v21 = vrot.slane %v5398_v61, %v5713_v14  ;;  %v6236_v18 = vrot.slane %v1406_v32, %v5713_v14 }
  0xed   : > { %v2813_v29 = vmax.f32 %v2811_v6, %v2812_v13  ;;  %v2828_v22 = vmax.f32 %v2826_v26, %v2827_v7  ;;  %v3726_v25 = vunpack.c.l.b16 %v2797_v48  ;;  %v1398_v42 = vcombine.high %v1396_v19, %v1396_v19  ;;  %v6263_v6 = vpop.permute.xlu1 %4025 }
  0xee   : > { %v2843_v53 = vmax.f32 %v2841_v10, %v2842_v33  ;;  %v1421_v43 = vcombine.high %v6232_v21, %v6232_v21  ;;  %v1430_v44 = vcombine.high %v5399_v16, %v5399_v16  ;;  %v1422_v36 = vcombine.high %v6236_v18, %v6236_v18 }
  0xef   : > { %v2814_v40 = vpack.i.bf16 %v2813_v29, %v2813_v29  ;;  %v2829_v59 = vrot.slane %v2828_v22, 1  ;;  %v3813_v35 = vsel %vm3768_vm10, %v3726_v25, %v3812_v49  ;;  %v1437_v31 = vrot.slane %v5399_v16, %v5713_v14 }
  0xf0   : > { %v2844_v37 = vrot.slane %v2843_v53, 2  ;;  %v1444_v30 = vrot.slane %v1430_v44, %v5713_v14  ;;  %v1454_v39 = vcombine.high %v5400_v27, %v5400_v27  ;;  %v6248_v56 = vrot.slane %v5400_v27, %v5713_v14 }
  0xf1   : > { %v2830_v41 = vmax.f32 %v2828_v22, %v2829_v59  ;;  %v3727_v47 = vunpack.c.l.b16 %v2814_v40  ;;  %v2850_v54 = vsel %vm1759_vm6, %v1389_v58, 4286644096  ;;  %v1445_v20 = vcombine.high %v1437_v31, %v1437_v31  ;;  %v6273_v40 = vpop.permute.xlu0 %4027 }
  0xf2   : > { %v2845_v50 = vmax.f32 %v2843_v53, %v2844_v37  ;;  %v1446_v60 = vcombine.high %v1444_v30, %v1444_v30  ;;  %v6252_v61 = vrot.slane %v1454_v39, %v5713_v14  ;;  %v1469_v1 = vcombine.high %v6248_v56, %v6248_v56 }
  0xf3   : > { %v2831_v62 = vpack.i.bf16 %v2830_v41, %v2830_v41  ;;  %v3814_v63 = vsel %vm3770_vm11, %v3727_v47, %v3813_v35  ;;  %v2853_v3 = vsel %vm1759_vm6, %v1437_v31, 4286644096  ;;  %v2867_v46 = vsel %vm1759_vm6, %v1396_v19, 4286644096  ;;  %v6277_v31 = vpop.permute.xlu1 %5554 }
  0xf4   : > { %v2846_v38 = vrot.slane %v2845_v50, 1  ;;  %v1470_v5 = vcombine.high %v6252_v61, %v6252_v61  ;;  %v2855_v28 = vmax.bf16 %v2853_v3, %v2850_v54  ;;  %v2870_v55 = vsel %vm1759_vm6, %v1444_v30, 4286644096 }
  0xf5   : > { %v3728_v26 = vunpack.c.l.b16 %v2831_v62  ;;  %v2884_v10 = vsel %vm1759_vm6, %v1397_v23, 4286644096  ;;  %v2887_v8 = vsel %vm1759_vm6, %v1445_v20, 4286644096  ;;  %v2872_v13 = vmax.bf16 %v2870_v55, %v2867_v46 }
  0xf6   : > { %v2847_v58 = vmax.f32 %v2845_v50, %v2846_v38  ;;  %v2856_v32 = vunpack.i.l.bf16 %v2855_v28  ;;  %v2857_v48 = vunpack.i.h.bf16 %v2855_v28  ;;  %v2889_v49 = vmax.bf16 %v2887_v8, %v2884_v10 }
  0xf7   : > { %v3815_v7 = vsel %vm3772_vm12, %v3728_v26, %v3814_v63  ;;  %v2901_v16 = vsel %vm1759_vm6, %v1398_v42, 4286644096  ;;  %v2904_v33 = vsel %vm1759_vm6, %v1446_v60, 4286644096  ;;  %v2873_v22 = vunpack.i.l.bf16 %v2872_v13 }
  0xf8   : > { %v2848_v19 = vpack.i.bf16 %v2847_v58, %v2847_v58  ;;  %v2858_v29 = vmax.f32 %v2856_v32, %v2857_v48  ;;  %v2874_v25 = vunpack.i.h.bf16 %v2872_v13  ;;  %v2890_v27 = vunpack.i.l.bf16 %v2889_v49  ;;  %v6289_v48 = vpop.permute.xlu0 %4096 }
  0xf9   : > { %v2891_v53 = vunpack.i.h.bf16 %v2889_v49  ;;  %v2906_v23 = vmax.bf16 %v2904_v33, %v2901_v16  ;;  %v2918_v44 = vsel %vm1759_vm6, %v6232_v21, 4286644096  ;;  %v2921_v42 = vsel %vm1759_vm6, %v6248_v56, 4286644096  ;;  %v6300_v33 = vpop.permute.xlu1 %4052 }
  0xfa   : > { %v3729_v59 = vunpack.c.l.b16 %v2848_v19  ;;  %v2859_v35 = vrot.slane %v2858_v29, 4  ;;  %v2875_v37 = vmax.f32 %v2873_v22, %v2874_v25  ;;  %v2923_v47 = vmax.bf16 %v2921_v42, %v2918_v44 }
  0xfb   : > { %v2892_v30 = vmax.f32 %v2890_v27, %v2891_v53  ;;  %v2907_v39 = vunpack.i.l.bf16 %v2906_v23  ;;  %v2908_v41 = vunpack.i.h.bf16 %v2906_v23  ;;  %v2935_v60 = vsel %vm1759_vm6, %v6236_v18, 4286644096 }
  0xfc   : > { %v3847_v54 = vpack.c.b16 %v3729_v59, %v3815_v7  ;;  %v2860_v50 = vmax.f32 %v2858_v29, %v2859_v35  ;;  %v2876_v20 = vrot.slane %v2875_v37, 4  ;;  %v2924_v3 = vunpack.i.l.bf16 %v2923_v47 }
  0xfd   : > { %v2893_v62 = vrot.slane %v2892_v30, 4  ;;  %v2909_v63 = vmax.f32 %v2907_v39, %v2908_v41  ;;  %v2925_v38 = vunpack.i.h.bf16 %v2923_v47  ;;  %v2938_v55 = vsel %vm1759_vm6, %v6252_v61, 4286644096 }
  0xfe   : > { %v3874_v28 = vsel %vm5688_vm3, 0, %v3847_v54  ;;  %v2861_v46 = vrot.slane %v2860_v50, 2  ;;  %v2877_v26 = vmax.f32 %v2875_v37, %v2876_v20  ;;  %v2940_v23 = vmax.bf16 %v2938_v55, %v2935_v60 }
  0xff   : > { %v6287_v10 = vsel %vm5692_vm5, %v3874_v28, 0  ;;  %v2894_v8 = vmax.f32 %v2892_v30, %v2893_v62  ;;  %v2910_v58 = vrot.slane %v2909_v63, 4  ;;  %v2926_v32 = vmax.f32 %v2924_v3, %v2925_v38  ;;  %v6318_v38 = vpop.permute.xlu1 %4073 }
 0x100   : > { %4104 = vrot.lane.b32.xlu0 %v6287_v10, %s5607_s20  ;;  %v3944_v13 = vshrl.u32 %v6287_v10, 16  ;;  %v3946_v7 = vshll.u32 %v6287_v10, 16  ;;  %4037 = vrot.lane.b32.xlu1 %v6287_v10, %s5602_s11  ;;  %v6298_v49 = vrot.slane %v6287_v10, 1  ;;  %v2862_v16 = vmax.f32 %v2860_v50, %v2861_v46 }
 0x101   : > { %v2878_v19 = vrot.slane %v2877_v26, 2  ;;  %v2895_v29 = vrot.slane %v2894_v8, 2  ;;  %v2911_v22 = vmax.f32 %v2909_v63, %v2910_v58  ;;  %v2927_v25 = vrot.slane %v2926_v32, 4  ;;  %v6306_v63 = vpop.permute.xlu0 %4031 }
 0x102   : > { %v3948_v27 = vrot.slane %v3946_v7, 1  ;;  %v2863_v53 = vrot.slane %v2862_v16, 1  ;;  %v2952_v44 = vsel %vm1759_vm6, %v1421_v43, 4286644096  ;;  %v2941_v41 = vunpack.i.l.bf16 %v2940_v23 }
 0x103   : > { %v2879_v59 = vmax.f32 %v2877_v26, %v2878_v19  ;;  %v2896_v35 = vmax.f32 %v2894_v8, %v2895_v29  ;;  %v2912_v37 = vrot.slane %v2911_v22, 2  ;;  %v2928_v42 = vmax.f32 %v2926_v32, %v2927_v25 }
 0x104   : > { %v3949_v30 = vor.u32 %v3948_v27, %v3944_v13  ;;  %v2864_v39 = vmax.f32 %v2862_v16, %v2863_v53  ;;  %v2942_v47 = vunpack.i.h.bf16 %v2940_v23  ;;  %v2955_v60 = vsel %vm1759_vm6, %v1469_v1, 4286644096 }
 0x105   : > { %v2880_v54 = vrot.slane %v2879_v59, 1  ;;  %v2897_v50 = vrot.slane %v2896_v35, 1  ;;  %v2913_v20 = vmax.f32 %v2911_v22, %v2912_v37  ;;  %v2929_v62 = vrot.slane %v2928_v42, 2  ;;  %v6328_v27 = vpop.permute.xlu0 %4075 }
 0x106   : > { %4131 = vrot.lane.b32.xlu0 %v3949_v30, %s5609_s22  ;;  %4064 = vrot.lane.b32.xlu1 %v3949_v30, %s5605_s18  ;;  %v2865_v21 = vpack.i.bf16 %v2864_v39, %v2864_v39  ;;  %v2943_v43 = vmax.f32 %v2941_v41, %v2942_v47  ;;  %v2969_v3 = vsel %vm1759_vm6, %v1422_v36, 4286644096  ;;  %v2957_v58 = vmax.bf16 %v2955_v60, %v2952_v44  ;;  %v5402_v60 = vld.sshfl [vmem:[%s5723_s15 + $0x74] sm:$0x33 pattern:$0x75316420] }
 0x107   : > { %v2881_v28 = vmax.f32 %v2879_v59, %v2880_v54  ;;  %v2898_v46 = vmax.f32 %v2896_v35, %v2897_v50  ;;  %v2914_v26 = vrot.slane %v2913_v20, 1  ;;  %v2930_v55 = vmax.f32 %v2928_v42, %v2929_v62  ;;  %v6330_v35 = vpop.permute.xlu1 %4094 }
 0x108   : > { %v2944_v8 = vrot.slane %v2943_v43, 4  ;;  %v2972_v56 = vsel %vm1759_vm6, %v1470_v5, 4286644096  ;;  %v3730_v32 = vunpack.c.l.b16 %v2865_v21  ;;  %v2958_v16 = vunpack.i.l.bf16 %v2957_v58 }
 0x109   : > { %v2882_v1 = vpack.i.bf16 %v2881_v28, %v2881_v28  ;;  %v2899_v13 = vpack.i.bf16 %v2898_v46, %v2898_v46  ;;  %v2915_v7 = vmax.f32 %v2913_v20, %v2914_v26  ;;  %v2931_v18 = vrot.slane %v2930_v55, 1  ;;  %v5401_v20 = vld.sshfl [vmem:[%s5723_s15 + $0x70] sm:$0x33 pattern:$0x75316420] }
 0x10a   : > { %4152 = vrot.lane.b32.xlu0 %v6298_v49, %s5608_s21  ;;  %4085 = vrot.lane.b32.xlu1 %v6298_v49, %s5606_s19  ;;  %v2945_v36 = vmax.f32 %v2943_v43, %v2944_v8  ;;  %v2959_v19 = vunpack.i.h.bf16 %v2957_v58  ;;  %v2974_v29 = vmax.bf16 %v2972_v56, %v2969_v3  ;;  %v5556_v43 = vunpack.i.l.bf16 %v6277_v31  ;;  %v6345_v56 = vpop.permute.xlu0 %4144 }
 0x10b   : > { %v2916_v22 = vpack.i.bf16 %v2915_v7, %v2915_v7  ;;  %v2932_v25 = vmax.f32 %v2930_v55, %v2931_v18  ;;  %v3731_v61 = vunpack.c.l.b16 %v2882_v1  ;;  %v3732_v5 = vunpack.c.l.b16 %v2899_v13  ;;  %v5403_v55 = vld.sshfl [vmem:[%s5723_s15 + $0x78] sm:$0x33 pattern:$0x75316420]  ;;  %v6352_v18 = vpop.permute.xlu1 %4029 }
 0x10c   : > { %v2946_v53 = vrot.slane %v2945_v36, 2  ;;  %v2960_v23 = vmax.f32 %v2958_v16, %v2959_v19  ;;  %v2975_v44 = vunpack.i.l.bf16 %v2974_v29  ;;  %v2976_v59 = vunpack.i.h.bf16 %v2974_v29 }
 0x10d   : > { %v2933_v37 = vpack.i.bf16 %v2932_v25, %v2932_v25  ;;  %v3733_v42 = vunpack.c.l.b16 %v2916_v22  ;;  %v3816_v39 = vsel %vm3762_vm7, %v3731_v61, %v3730_v32  ;;  %v4164_v26 = vsel %vm4162_vm13, %v5701_v9, %v6238_v57  ;;  %v5404_v61 = vld.sshfl [vmem:[%s5723_s15 + $0x7c] sm:$0x33 pattern:$0x75316420] }
 0x10e   : > { %3978 = vrot.lane.b32.xlu0 %v3949_v30, %s5604_s17  ;;  %v2947_v41 = vmax.f32 %v2945_v36, %v2946_v53  ;;  %v2961_v47 = vrot.slane %v2960_v23, 4  ;;  %v2977_v54 = vmax.f32 %v2975_v44, %v2976_v59  ;;  %v3817_v50 = vsel %vm3764_vm8, %v3732_v5, %v3816_v39 }
 0x10f   : > { %v3734_v62 = vunpack.c.l.b16 %v2933_v37  ;;  %v3818_v21 = vsel %vm3766_vm9, %v3733_v42, %v3817_v50  ;;  %v1478_v8 = vcombine.high %v5401_v20, %v5401_v20  ;;  %v1485_v58 = vrot.slane %v5401_v20, %v5713_v14  ;;  %v6371_v20 = vpop.permute.xlu0 %4010 }
 0x110   : > { %v2948_v3 = vrot.slane %v2947_v41, 1  ;;  %v2962_v28 = vmax.f32 %v2960_v23, %v2961_v47  ;;  %v2978_v46 = vrot.slane %v2977_v54, 4  ;;  %v6350_v7 = vsel %vm4183_vm14, %v4164_v26, %v5556_v43 }
 0x111   : > { %v3819_v30 = vsel %vm3768_vm10, %v3734_v62, %v3818_v21  ;;  %v1492_v57 = vrot.slane %v1478_v8, %v5713_v14  ;;  %v1493_v36 = vcombine.high %v1485_v58, %v1485_v58  ;;  %v1502_v16 = vcombine.high %v5402_v60, %v5402_v60 }
 0x112   : > { %4018 = vrot.lane.b32.xlu0 %v6298_v49, %s5603_s16  ;;  %v2949_v32 = vmax.f32 %v2947_v41, %v2948_v3  ;;  %v2963_v1 = vrot.slane %v2962_v28, 2  ;;  %v2979_v13 = vmax.f32 %v2977_v54, %v2978_v46  ;;  %v6356_v19 = vrot.slane %v5402_v60, %v5713_v14  ;;  %v6374_v3 = vpop.permute.xlu1 %4098 }
 0x113   : > { %v1526_v49 = vcombine.high %v5403_v55, %v5403_v55  ;;  %v1494_v5 = vcombine.high %v1492_v57, %v1492_v57  ;;  %v6360_v53 = vrot.slane %v1502_v16, %v5713_v14  ;;  %v1533_v44 = vrot.slane %v5403_v55, %v5713_v14 }
 0x114   : > { %v2950_v29 = vpack.i.bf16 %v2949_v32, %v2949_v32  ;;  %v2964_v22 = vmax.f32 %v2962_v28, %v2963_v1  ;;  %v2980_v25 = vrot.slane %v2979_v13, 2  ;;  %v1517_v23 = vcombine.high %v6356_v19, %v6356_v19 }
 0x115   : > { %v1540_v39 = vrot.slane %v1526_v49, %v5713_v14  ;;  %v1541_v47 = vcombine.high %v1533_v44, %v1533_v44  ;;  %v1550_v54 = vcombine.high %v5404_v61, %v5404_v61  ;;  %v6369_v50 = vrot.slane %v5404_v61, %v5713_v14 }
 0x116   : > { %v2965_v59 = vrot.slane %v2964_v22, 1  ;;  %v2981_v37 = vmax.f32 %v2979_v13, %v2980_v25  ;;  %v3735_v42 = vunpack.c.l.b16 %v2950_v29  ;;  %v2986_v26 = vsel %vm1759_vm6, %v1485_v58, 4286644096 }
 0x117   : > { %v1542_v60 = vcombine.high %v1540_v39, %v1540_v39  ;;  %v6377_v28 = vrot.slane %v1550_v54, %v5713_v14  ;;  %v2989_v55 = vsel %vm1759_vm6, %v1533_v44, 4286644096  ;;  %v3003_v13 = vsel %vm1759_vm6, %v1492_v57, 4286644096  ;;  %v6391_v57 = vpop.permute.xlu0 %4079 }
 0x118   : > { %v2966_v62 = vmax.f32 %v2964_v22, %v2965_v59  ;;  %v2982_v21 = vrot.slane %v2981_v37, 1  ;;  %v3820_v43 = vsel %vm3770_vm11, %v3735_v42, %v3819_v30  ;;  %v2991_v1 = vmax.bf16 %v2989_v55, %v2986_v26 }
 0x119   : > { %v3006_v16 = vsel %vm1759_vm6, %v1540_v39, 4286644096  ;;  %v3020_v14 = vsel %vm1759_vm6, %v1493_v36, 4286644096  ;;  %v3023_v29 = vsel %vm1759_vm6, %v1541_v47, 4286644096  ;;  %v6394_v36 = vpop.permute.xlu1 %4142 }
 0x11a   : > { %v2967_v8 = vpack.i.bf16 %v2966_v62, %v2966_v62  ;;  %v2983_v32 = vmax.f32 %v2981_v37, %v2982_v21  ;;  %v2992_v61 = vunpack.i.l.bf16 %v2991_v1  ;;  %v2993_v58 = vunpack.i.h.bf16 %v2991_v1 }
 0x11b   : > { %v3008_v49 = vmax.bf16 %v3006_v16, %v3003_v13  ;;  %v3025_v44 = vmax.bf16 %v3023_v29, %v3020_v14  ;;  %v3037_v59 = vsel %vm1759_vm6, %v1494_v5, 4286644096  ;;  %v3040_v37 = vsel %vm1759_vm6, %v1542_v60, 4286644096 }
 0x11c   : > { %v2984_v22 = vpack.i.bf16 %v2983_v32, %v2983_v32  ;;  %v3736_v25 = vunpack.c.l.b16 %v2967_v8  ;;  %v2994_v39 = vmax.f32 %v2992_v61, %v2993_v58  ;;  %v3042_v62 = vmax.bf16 %v3040_v37, %v3037_v59  ;;  %v6408_v59 = vpop.permute.xlu0 %4054 }
 0x11d   : > { %v3009_v47 = vunpack.i.l.bf16 %v3008_v49  ;;  %v3010_v21 = vunpack.i.h.bf16 %v3008_v49  ;;  %v3026_v26 = vunpack.i.l.bf16 %v3025_v44  ;;  %v3027_v55 = vunpack.i.h.bf16 %v3025_v44 }
 0x11e   : > { %v3737_v42 = vunpack.c.l.b16 %v2984_v22  ;;  %v3821_v54 = vsel %vm3772_vm12, %v3736_v25, %v3820_v43  ;;  %v2995_v32 = vrot.slane %v2994_v39, 4  ;;  %v3043_v1 = vunpack.i.l.bf16 %v3042_v62 }
 0x11f   : > { %v3044_v13 = vunpack.i.h.bf16 %v3042_v62  ;;  %v3011_v5 = vmax.f32 %v3009_v47, %v3010_v21  ;;  %v3028_v16 = vmax.f32 %v3026_v26, %v3027_v55  ;;  %v3054_v60 = vsel %vm1759_vm6, %v6356_v19, 4286644096  ;;  %v6419_v62 = vpop.permute.xlu1 %4008 }
 0x120   : > { %v3848_v8 = vpack.c.b16 %v3737_v42, %v3821_v54  ;;  %v3057_v43 = vsel %vm1759_vm6, %v6369_v50, 4286644096  ;;  %v2996_v29 = vmax.f32 %v2994_v39, %v2995_v32  ;;  %v3071_v44 = vsel %vm1759_vm6, %v6360_v53, 4286644096 }
 0x121   : > { %v3045_v22 = vmax.f32 %v3043_v1, %v3044_v13  ;;  %v3059_v25 = vmax.bf16 %v3057_v43, %v3054_v60  ;;  %v3012_v58 = vrot.slane %v3011_v5, 4  ;;  %v3029_v49 = vrot.slane %v3028_v16, 4 }
 0x122   : > { %v3875_v14 = vsel %vm5688_vm3, 0, %v3848_v8  ;;  %v2997_v39 = vrot.slane %v2996_v29, 2  ;;  %v3074_v13 = vsel %vm1759_vm6, %v6377_v28, 4286644096  ;;  %vm4267_vm2 = vcmask 195584  }
 0x123   : > { %v6404_v61 = vsel %vm5692_vm5, %v3875_v14, 0  ;;  %v3013_v47 = vmax.f32 %v3011_v5, %v3012_v58  ;;  %v3030_v21 = vmax.f32 %v3028_v16, %v3029_v49  ;;  %v3046_v26 = vrot.slane %v3045_v22, 4 }
 0x124   : > { %7019 = vst [vmem:[#allocation2_spill] sm:$0xff] %v6404_v61  ;;  %4106 = vrot.lane.b32.xlu1 %v6404_v61, %s5607_s20  ;;  %4039 = vrot.lane.b32.xlu0 %v6404_v61, %s5602_s11  ;;  %v3951_v37 = vshrl.u32 %v6404_v61, 16  ;;  %v3953_v42 = vshll.u32 %v6404_v61, 16  ;;  %v6417_v54 = vrot.slane %v6404_v61, 1  ;;  %v3060_v55 = vunpack.i.l.bf16 %v3059_v25 }
 0x125   : > { %v2998_v32 = vmax.f32 %v2996_v29, %v2997_v39  ;;  %v3061_v1 = vunpack.i.h.bf16 %v3059_v25  ;;  %v3014_v60 = vrot.slane %v3013_v47, 2  ;;  %v3031_v43 = vrot.slane %v3030_v21, 2  ;;  %v6427_v25 = vpop.permute.xlu0 %4123  ;;  %v6435_v39 = vpop.permute.xlu1 %4077 }
 0x126   : > { %v3955_v8 = vrot.slane %v3953_v42, 1  ;;  %v3047_v14 = vmax.f32 %v3045_v22, %v3046_v26  ;;  %v3076_v0 = vmax.bf16 %v3074_v13, %v3071_v44  ;;  %v3088_v5 = vsel %vm1759_vm6, %v1517_v23, 4286644096 }
 0x127   : > { %v2999_v41 = vrot.slane %v2998_v32, 1  ;;  %v3062_v46 = vmax.f32 %v3060_v55, %v3061_v1  ;;  %v3015_v16 = vmax.f32 %v3013_v47, %v3014_v60  ;;  %v3032_v58 = vmax.f32 %v3030_v21, %v3031_v43 }
 0x128   : > { %v3956_v30 = vor.u32 %v3955_v8, %v3951_v37  ;;  %v3048_v49 = vrot.slane %v3047_v14, 2  ;;  %v3077_v29 = vunpack.i.l.bf16 %v3076_v0  ;;  %v3078_v37 = vunpack.i.h.bf16 %v3076_v0 }
 0x129   : > { %v3000_v22 = vmax.f32 %v2998_v32, %v2999_v41  ;;  %v3063_v44 = vrot.slane %v3062_v46, 4  ;;  %v7020_v42 = vcombine.high %v6369_v50, %v6369_v50  ;;  %v3016_v23 = vrot.slane %v3015_v16, 1 }
 0x12a   : > { %4133 = vrot.lane.b32.xlu1 %v3956_v30, %s5609_s22  ;;  %4066 = vrot.lane.b32.xlu0 %v3956_v30, %s5605_s18  ;;  %v3033_v47 = vrot.slane %v3032_v58, 1  ;;  %v3049_v21 = vmax.f32 %v3047_v14, %v3048_v49  ;;  %v3079_v1 = vmax.f32 %v3077_v29, %v3078_v37  ;;  %v7021_v13 = vcombine.high %v6360_v53, %v6360_v53 }
 0x12b   : > { %v3091_v19 = vsel %vm1759_vm6, %v7020_v42, 4286644096  ;;  %v3001_v55 = vpack.i.bf16 %v3000_v22, %v3000_v22  ;;  %v3064_v8 = vmax.f32 %v3062_v46, %v3063_v44  ;;  %v3017_v0 = vmax.f32 %v3015_v16, %v3016_v23  ;;  %v6449_v22 = vpop.permute.xlu0 %3970  ;;  %v6451_v23 = vpop.permute.xlu1 %4121 }
 0x12c   : > { %v3093_v26 = vmax.bf16 %v3091_v19, %v3088_v5  ;;  %v3105_v41 = vsel %vm1759_vm6, %v7021_v13, 4286644096  ;;  %v3034_v32 = vmax.f32 %v3032_v58, %v3033_v47  ;;  %v3050_v60 = vrot.slane %v3049_v21, 1 }
 0x12d   : > { %v3065_v43 = vrot.slane %v3064_v8, 2  ;;  %v3080_v14 = vrot.slane %v3079_v1, 4  ;;  %v7022_v46 = vcombine.high %v6377_v28, %v6377_v28  ;;  %v3018_v49 = vpack.i.bf16 %v3017_v0, %v3017_v0 }
 0x12e   : > { %v3094_v50 = vunpack.i.l.bf16 %v3093_v26  ;;  %4154 = vrot.lane.b32.xlu1 %v6417_v54, %s5608_s21  ;;  %4087 = vrot.lane.b32.xlu0 %v6417_v54, %s5606_s19  ;;  %v3095_v5 = vunpack.i.h.bf16 %v3093_v26  ;;  %v3035_v29 = vpack.i.bf16 %v3034_v32, %v3034_v32  ;;  %v3051_v16 = vmax.f32 %v3049_v21, %v3050_v60 }
 0x12f   : > { %v3108_v53 = vsel %vm1759_vm6, %v7022_v46, 4286644096  ;;  %v3066_v44 = vmax.f32 %v3064_v8, %v3065_v43  ;;  %v3081_v37 = vmax.f32 %v3079_v1, %v3080_v14  ;;  %v3738_v19 = vunpack.c.l.b16 %v3001_v55 }
 0x130   : > { %v3110_v58 = vmax.bf16 %v3108_v53, %v3105_v41  ;;  %v3096_v42 = vmax.f32 %v3094_v50, %v3095_v5  ;;  %v3052_v47 = vpack.i.bf16 %v3051_v16, %v3051_v16  ;;  %v3739_v61 = vunpack.c.l.b16 %v3018_v49  ;;  %v6457_v5 = vpop.permute.xlu0 %4058 }
 0x131   : > { %v3067_v28 = vrot.slane %v3066_v44, 1  ;;  %v3082_v46 = vrot.slane %v3081_v37, 2  ;;  %v3740_v32 = vunpack.c.l.b16 %v3035_v29  ;;  %v5557_v43 = vunpack.i.h.bf16 %v6277_v31 }
 0x132   : > { %v3111_v13 = vunpack.i.l.bf16 %v3110_v58  ;;  %v3112_v26 = vunpack.i.h.bf16 %v3110_v58  ;;  %3980 = vrot.lane.b32.xlu1 %v3956_v30, %s5604_s17  ;;  %v3097_v0 = vrot.slane %v3096_v42, 4  ;;  %v3741_v41 = vunpack.c.l.b16 %v3052_v47 }
 0x133   : > { %v3822_v60 = vsel %vm3762_vm7, %v3739_v61, %v3738_v19  ;;  %v3068_v8 = vmax.f32 %v3066_v44, %v3067_v28  ;;  %v3083_v1 = vmax.f32 %v3081_v37, %v3082_v46  ;;  %v4206_v29 = vsel %vm4204_vm15, %v6350_v7, %v6263_v6  ;;  %v3969_v61 = vpop.permute.xlu1 %3968  ;;  %v5568_v6 = vld [vmem:[%s7006_s3] sm:$0xff]  }
 0x134   : > { %v3113_v21 = vmax.f32 %v3111_v13, %v3112_v26  ;;  %v3098_v55 = vmax.f32 %v3096_v42, %v3097_v0  ;;  %v3823_v50 = vsel %vm3764_vm8, %v3740_v32, %v3822_v60  ;;  %v4227_v31 = vsel %vm4225_vm0, %v4206_v29, %v6300_v33  ;;  %v4101_v46 = vpop.permute.xlu0 %4100 }
 0x135   : > { %v3069_v30 = vpack.i.bf16 %v3068_v8, %v3068_v8  ;;  %v3084_v53 = vrot.slane %v3083_v1, 1  ;;  %v3824_v58 = vsel %vm3766_vm9, %v3741_v41, %v3823_v50  ;;  %v4166_v19 = vsel %vm4162_vm13, %v5701_v9, %v6258_v12 }
 0x136   : > { %v3114_v14 = vrot.slane %v3113_v21, 4  ;;  %v3099_v49 = vrot.slane %v3098_v55, 2  ;;  %4020 = vrot.lane.b32.xlu1 %v6417_v54, %s5603_s16  ;;  %v4248_v13 = vsel %vm4246_vm1, %v4227_v31, %v6318_v38  ;;  %v4187_v28 = vsel %vm4183_vm14, %v4166_v19, %v5557_v43 }
 0x137   : > { %v3085_v44 = vmax.f32 %v3083_v1, %v3084_v53  ;;  %v3742_v42 = vunpack.c.l.b16 %v3069_v30  ;;  %v4208_v12 = vsel %vm4204_vm15, %v4187_v28, %v6273_v40  ;;  %v4168_v41 = vsel %vm4162_vm13, %v5824_v52, %v3969_v61  ;;  %v4057_v60 = vpop.permute.xlu1 %4056  ;;  %v5569_v40 = vld [vmem:[%s7006_s3 + $0x8] sm:$0xff]  }
 0x138   : > { %v3115_v16 = vmax.f32 %v3113_v21, %v3114_v14  ;;  %v3100_v37 = vmax.f32 %v3098_v55, %v3099_v49  ;;  %v5610_v21 = vmov 0.0   ;;  %vm4288_vm4 = vcmask 228352  }
 0x139   : > { %v3086_v7 = vpack.i.bf16 %v3085_v44, %v3085_v44  ;;  %v3825_v33 = vsel %vm3768_vm10, %v3742_v42, %v3824_v58  ;;  %5468 = vmatprep.subr.bf16.mxu0 %v5610_v21  ;;  %v4189_v8 = vsel %vm4183_vm14, %v4168_v41, %v6419_v62  ;;  %v4229_v1 = vsel %vm4225_vm0, %v4208_v12, %v6408_v59  ;;  %v5570_v62 = vld [vmem:[%s7006_s3 + $0x10] ss:$0 sps:$4 sm:$0x33]  }
 0x13a   : > { %v3116_v47 = vrot.slane %v3115_v16, 2  ;;  %v3101_v54 = vrot.slane %v3100_v37, 1  ;;  %5469 = vmatpush3.bf16.msra.mxu0 %v5568_v6  ;;  %v4269_v52 = vsel %vm4267_vm2, %v4248_v13, %v6330_v35  ;;  %v4250_v43 = vsel %vm4246_vm1, %v4229_v1, %v6328_v27 }
 0x13b   : > { %v3743_v32 = vunpack.c.l.b16 %v3086_v7  ;;  %5470 = vmatprep.subr.bf16.mxu0 %v5610_v21  ;;  %v4210_v14 = vsel %vm4204_vm15, %v4189_v8, %v6352_v18  ;;  %v4271_v30 = vsel %vm4267_vm2, %v4250_v43, %v6289_v48  ;;  %vm4386_vm6 = vcmask 1041408   ;;  %v4128_v18 = vpop.permute.xlu0 %4127 }
 0x13c   : > { %v3117_v26 = vmax.f32 %v3115_v16, %v3116_v47  ;;  %v3102_v0 = vmax.f32 %v3100_v37, %v3101_v54  ;;  %vm4309_vm7 = vcmask 261120   ;;  %v4290_v35 = vsel %vm4288_vm4, %v4269_v52, %v6451_v23  ;;  %v4126_v23 = vpop.permute.xlu1 %4125 }
 0x13d   : > { %v3826_v50 = vsel %vm3770_vm11, %v3743_v32, %v3825_v33  ;;  %v4292_v27 = vsel %vm4288_vm4, %v4271_v30, %v6427_v25  ;;  %v4231_v29 = vsel %vm4225_vm0, %v4210_v14, %v4057_v60  ;;  %v4388_v48 = vsel %vm4386_vm6, %v5570_v62, 0 }
 0x13e   : > { %v3118_v38 = vrot.slane %v3117_v26, 1  ;;  %v3103_v55 = vpack.i.bf16 %v3102_v0, %v3102_v0  ;;  %5471 = vmatpush3.bf16.msra.mxu0 %v5569_v40  ;;  %v4313_v61 = vsel %vm4309_vm7, %v4292_v27, %v6345_v56  ;;  %vm5611_vm8 = vmmov 0  }
 0x13f   : > { %5472 = vmatprep.subr.bf16.mxu0 %v5610_v21  ;;  %5474 = vmatprep.mubr.msk.bf16.mxu0 %vm5611_vm8, %v5610_v21  ;;  %v4311_v25 = vsel %vm4309_vm7, %v4290_v35, %v6394_v36  ;;  %v4170_v31 = vsel %vm4162_vm13, %v5894_v51, %v6449_v22  ;;  %v4252_v56 = vsel %vm4246_vm1, %v4231_v29, %v6435_v39  ;;  %vm4370_vm9 = vcmask 293888   ;;  %v4149_v22 = vpop.permute.xlu0 %4148 }
 0x140   : > { %v3119_v59 = vmax.f32 %v3117_v26, %v3118_v38  ;;  %v3744_v53 = vunpack.c.l.b16 %v3103_v55  ;;  %v5413_v44 = vcombine.low %v4311_v25, %v4313_v61  ;;  %v4191_v37 = vsel %vm4183_vm14, %v4170_v31, %v6371_v20 }
 0x141   : > { %v4212_v19 = vsel %vm4204_vm15, %v4191_v37, %v6306_v63  ;;  %v4273_v51 = vsel %vm4267_vm2, %v4252_v56, %v6374_v3  ;;  %v4147_v63 = vpop.permute.xlu1 %4146  ;;  %v5558_v32 = vpack.i.bf16 %v5701_v9, %v5701_v9  ;;  %vm5107_vm10 = vcmask 1043456  }
 0x142   : > { %v3120_v49 = vpack.i.bf16 %v3119_v59, %v3119_v59  ;;  %v3827_v16 = vsel %vm3772_vm12, %v3744_v53, %v3826_v50  ;;  %5473 = vmatpush3.bf16.msra.mxu0 %v4388_v48  ;;  %v4233_v36 = vsel %vm4225_vm0, %v4212_v19, %v6457_v5  ;;  %v4294_v7 = vsel %vm4288_vm4, %v4273_v51, %v4126_v23 }
 0x143   : > { %v4254_v39 = vsel %vm4246_vm1, %v4233_v36, %v6391_v57  ;;  %v4315_v26 = vsel %vm4309_vm7, %v4294_v7, %v4147_v63  ;;  %v3975_v12 = vpop.permute.xlu0 %3974  ;;  %vm5013_vm11 = vcmask 457728   ;;  %vm5030_vm12 = vcmask 523264  }
 0x144   : > { %v3745_v58 = vunpack.c.l.b16 %v3120_v49  ;;  %v4275_v6 = vsel %vm4267_vm2, %v4254_v39, %v4101_v46 }
 0x145   : > { %5475 = vmatmul.mubr.msk.bf16.vlgmr.msra.gmra.mrb[0].mxu0 %vm4370_vm9, %v5413_v44  ;;  %v4296_v57 = vsel %vm4288_vm4, %v4275_v6, %v4128_v18  ;;  %v3973_v0 = vpop.permute.xlu1 %3972 }
 0x146   : > { %v3849_v42 = vpack.c.b16 %v3745_v58, %v3827_v16  ;;  %v4317_v54 = vsel %vm4309_vm7, %v4296_v57, %v4149_v22  ;;  %5478 = vmatprep.mubr.msk.bf16.mxu0 %vm5611_vm8, %v5610_v21  ;;  %v4172_v52 = vsel %vm4162_vm13, %v5977_v24, %v3973_v0 }
 0x147   : > { %v5414_v33 = vcombine.low %v4315_v26, %v4317_v54  ;;  %v4015_v60 = vpop.permute.xlu0 %4014 }
 0x148   : > { %v3876_v47 = vsel %vm5688_vm3, 0, %v3849_v42 }
 0x149   : > { %v6534_v20 = vsel %vm5692_vm5, %v3876_v47, 0  ;;  %v4013_v41 = vpop.permute.xlu1 %4012  ;;  %v7023_v47 = vmov 0  }
 0x14a   : > { %4108 = vrot.lane.b32.xlu0 %v6534_v20, %s5607_s20  ;;  %v3958_v5 = vshrl.u32 %v6534_v20, 16  ;;  %v3960_v3 = vshll.u32 %v6534_v20, 16  ;;  %4041 = vrot.lane.b32.xlu1 %v6534_v20, %s5602_s11  ;;  %v4003_v46 = vrot.slane %v6534_v20, 1  ;;  %v4600_v51 = vrot.slane %v7023_v47, 7 }
 0x14b   : > { %v4036_v8 = vpop.permute.xlu0 %4035 }
 0x14c   : > { %v3962_v13 = vrot.slane %v3960_v3, 1  ;;  %v4677_v22 = vsel %vm5688_vm3, 0, %v4600_v51 }
 0x14d   : > { %5479 = vmatmul.mubr.msk.bf16.gmra.mrb[4].mxu0 %vm4370_vm9, %v5414_v33  ;;  %v4034_v38 = vpop.permute.xlu1 %4033  ;;  %v6601_v63 = vsel %vm5692_vm5, %v4677_v22, 0 }
 0x14e   : > { %v3963_v28 = vor.u32 %v3962_v13, %v3958_v5  ;;  %5482 = vmatprep.mubr.msk.bf16.mxu0 %vm5611_vm8, %v5610_v21  ;;  %v4698_v6 = vshrl.u32 %v6601_v63, 16  ;;  %v4700_v5 = vshll.u32 %v6601_v63, 16  ;;  %v4777_v13 = vrot.slane %v6601_v63, 1 }
 0x150   : > { %4135 = vrot.lane.b32.xlu0 %v3963_v28, %s5609_s22  ;;  %4068 = vrot.lane.b32.xlu1 %v3963_v28, %s5605_s18  ;;  %v4702_v57 = vrot.slane %v4700_v5, 1 }
 0x151   : > { %v4061_v1 = vpop.permute.xlu1 %4060  ;;  %v4063_v40 = vpop.permute.xlu0 %4062 }
 0x152   : > { %v4703_v54 = vor.u32 %v4702_v57, %v4698_v6 }
 0x154   : > { %4156 = vrot.lane.b32.xlu0 %v4003_v46, %s5608_s21  ;;  %4089 = vrot.lane.b32.xlu1 %v4003_v46, %s5606_s19 }
 0x155   : > { %v4082_v55 = vpop.permute.xlu1 %4081  ;;  %v4084_v50 = vpop.permute.xlu0 %4083 }
 0x158   : > { %3982 = vrot.lane.b32.xlu0 %v3963_v28, %s5604_s17  ;;  %5559 = vrot.lane.b32.xlu1 %v5558_v32, %s5607_s20  ;;  %s5614_s17 = smov 40  }
 0x159   : > { %v4103_v43 = vpop.permute.xlu1 %4102 }
 0x15c   : > { %4022 = vrot.lane.b32.xlu0 %v4003_v46, %s5603_s16  ;;  %4139 = vrot.lane.b32.xlu1 %v5727_v17, %s5609_s22 }
 0x15d   : > { %v4130_v14 = vpop.permute.xlu1 %4129 }
 0x160   : > { %4043 = vrot.lane.b32.xlu0 %v5701_v9, %s5602_s11  ;;  %v4193_v9 = vsel %vm4183_vm14, %v4172_v52, %v4013_v41  ;;  %4753 = vrot.lane.b32.xlu1 %v4703_v54, %s5603_s16  ;;  %s5613_s11 = smov 56  }
 0x161   : > { %v4214_v59 = vsel %vm4204_vm15, %v4193_v9, %v4034_v38  ;;  %v4151_v27 = vpop.permute.xlu1 %4150 }
 0x162   : > { %v4235_v30 = vsel %vm4225_vm0, %v4214_v59, %v4061_v1 }
 0x164   : > { %4070 = vrot.lane.b32.xlu0 %v5727_v17, %s5605_s18  ;;  %4785 = vrot.lane.b32.xlu1 %v4777_v13, %s5605_s18 }
 0x165   : > { %v3977_v25 = vpop.permute.xlu1 %3976 }
 0x166   : > { %v4176_v26 = vsel %vm4162_vm13, %v6183_v34, %v3977_v25 }
 0x168   : > { %4091 = vrot.lane.b32.xlu0 %v5706_v11, %s5606_s19  ;;  %v4174_v11 = vsel %vm4162_vm13, %v6095_v45, %v3975_v12  ;;  %s5615_s19 = smov 64  }
 0x169   : > { %v4017_v31 = vpop.permute.xlu1 %4016 }
 0x16a   : > { %v4197_v46 = vsel %vm4183_vm14, %v4176_v26, %v4017_v31 }
 0x16c   : > { %4137 = vrot.lane.b32.xlu0 %v5727_v17, %s5609_s22  ;;  %v4195_v17 = vsel %vm4183_vm14, %v4174_v11, %v4015_v60 }
 0x16d   : > { %v4216_v53 = vsel %vm4204_vm15, %v4195_v17, %v4036_v8 }
 0x16e   : > { %v4237_v35 = vsel %vm4225_vm0, %v4216_v53, %v4063_v40 }
 0x16f   : > { %v4258_v49 = vsel %vm4246_vm1, %v4237_v35, %v4084_v50 }
 0x170   : > { %5564 = vrot.lane.b32.xlu0 %v5717_v15, %s5608_s21  ;;  %v4256_v15 = vsel %vm4246_vm1, %v4235_v30, %v4082_v55 }
 0x171   : > { %v4277_v29 = vsel %vm4267_vm2, %v4256_v15, %v4103_v43  ;;  %v7024_v15 = vld [vmem:[#allocation2_spill] sm:$0xff] }
 0x172   : > { %v4105_v62 = vpop.permute.xlu0 %4104  ;;  %v4298_v45 = vsel %vm4288_vm4, %v4277_v29, %v4130_v14  ;;  %v4038_v56 = vpop.permute.xlu1 %4037 }
 0x173   : > { %v4279_v61 = vsel %vm4267_vm2, %v4258_v49, %v4105_v62  ;;  %v4319_v48 = vsel %vm4309_vm7, %v4298_v45, %v4151_v27  ;;  %v4218_v0 = vsel %vm4204_vm15, %v4197_v46, %v4038_v56 }
 0x174   : > { %4873 = vrot.lane.b32.xlu0 %v6601_v63, %s5612_s2 }
 0x178   : > { %v4132_v24 = vpop.permute.xlu0 %4131  ;;  %v4065_v37 = vpop.permute.xlu1 %4064  ;;  %4896 = vrot.lane.b32.xlu0 %v4703_v54, %s5613_s11  ;;  %v6656_v54 = vld [vmem:[%s7007_s4] ss:$0 sm:$0xff] }
 0x179   : > { %v4300_v18 = vsel %vm4288_vm4, %v4279_v61, %v4132_v24  ;;  %v4239_v60 = vsel %vm4225_vm0, %v4218_v0, %v4065_v37 }
 0x17c   : > { %v4153_v16 = vpop.permute.xlu0 %4152  ;;  %v4086_v19 = vpop.permute.xlu1 %4085 }
 0x17d   : > { %v4321_v23 = vsel %vm4309_vm7, %v4300_v18, %v4153_v16  ;;  %v4260_v34 = vsel %vm4246_vm1, %v4239_v60, %v4086_v19 }
 0x17e   : > { %v5415_v58 = vcombine.low %v4319_v48, %v4321_v23 }
 0x180   : > { %5483 = vmatmul.mubr.msk.bf16.gmra.mrb[8].mxu0 %vm4370_vm9, %v5415_v58  ;;  %v3979_v44 = vpop.permute.xlu0 %3978 }
 0x181   : > { %5486 = vmatprep.mubr.msk.bf16.mxu0 %vm5611_vm8, %v5610_v21  ;;  %v4178_v12 = vsel %vm4162_vm13, %v6287_v10, %v3979_v44 }
 0x184   : > { %v4019_v42 = vpop.permute.xlu0 %4018 }
 0x185   : > { %v4199_v38 = vsel %vm4183_vm14, %v4178_v12, %v4019_v42 }
 0x196   : > { %v4040_v36 = vpop.permute.xlu0 %4039  ;;  %v4107_v39 = vpop.permute.xlu1 %4106 }
 0x197   : > { %v4220_v8 = vsel %vm4204_vm15, %v4199_v38, %v4040_v36  ;;  %v4281_v52 = vsel %vm4267_vm2, %v4260_v34, %v4107_v39 }
 0x19c   : > { %v4067_v3 = vpop.permute.xlu0 %4066  ;;  %v4134_v7 = vpop.permute.xlu1 %4133 }
 0x19d   : > { %v4241_v40 = vsel %vm4225_vm0, %v4220_v8, %v4067_v3  ;;  %v4302_v10 = vsel %vm4288_vm4, %v4281_v52, %v4134_v7 }
 0x1a0   : > { %v4088_v33 = vpop.permute.xlu0 %4087  ;;  %v4155_v28 = vpop.permute.xlu1 %4154 }
 0x1a1   : > { %v4262_v55 = vsel %vm4246_vm1, %v4241_v40, %v4088_v33  ;;  %v4323_v59 = vsel %vm4309_vm7, %v4302_v10, %v4155_v28  ;;  %v6661_v33 = vld [vmem:[%s7008_s5] ss:$0 sm:$0xff] }
 0x1a4   : > { %v3981_v41 = vpop.permute.xlu1 %3980 }
 0x1a5   : > { %v4180_v27 = vsel %vm4162_vm13, %v7024_v15, %v3981_v41 }
 0x1a8   : > { %v4021_v50 = vpop.permute.xlu1 %4020 }
 0x1a9   : > { %v4201_v45 = vsel %vm4183_vm14, %v4180_v27, %v4021_v50 }
 0x1bc   : > { %v4109_v32 = vpop.permute.xlu0 %4108  ;;  %v4042_v30 = vpop.permute.xlu1 %4041 }
 0x1bd   : > { %v4283_v43 = vsel %vm4267_vm2, %v4262_v55, %v4109_v32  ;;  %v4222_v48 = vsel %vm4204_vm15, %v4201_v45, %v4042_v30 }
 0x1c2   : > { %v4136_v1 = vpop.permute.xlu0 %4135  ;;  %v4069_v24 = vpop.permute.xlu1 %4068 }
 0x1c3   : > { %v4304_v9 = vsel %vm4288_vm4, %v4283_v43, %v4136_v1  ;;  %v4243_v44 = vsel %vm4225_vm0, %v4222_v48, %v4069_v24 }
 0x1c6   : > { %v4157_v62 = vpop.permute.xlu0 %4156  ;;  %v4090_v49 = vpop.permute.xlu1 %4089 }
 0x1c7   : > { %v4325_v14 = vsel %vm4309_vm7, %v4304_v9, %v4157_v62  ;;  %v4264_v19 = vsel %vm4246_vm1, %v4243_v44, %v4090_v49 }
 0x1c8   : > { %v5416_v11 = vcombine.low %v4323_v59, %v4325_v14 }
 0x1ca   : > { %5487 = vmatmul.mubr.msk.bf16.gmra.mrb[12].mxu0 %vm4370_vm9, %v5416_v11  ;;  %v3983_v17 = vpop.permute.xlu0 %3982  ;;  %v5560_v23 = vpop.permute.xlu1 %5559 }
 0x1cb   : > { %5490 = vmatprep.mubr.msk.bf16.mxu0 %vm5611_vm8, %v5610_v21  ;;  %v4182_v61 = vsel %vm4162_vm13, %v6534_v20, %v3983_v17  ;;  %v5562_v58 = vunpack.i.h.bf16 %v5560_v23  ;;  %v5561_v37 = vunpack.i.l.bf16 %v5560_v23  ;;  %vm5094_vm13 = vcmask 588800  }
 0x1cd   : > { %v4285_v47 = vsel %vm4267_vm2, %v4264_v19, %v5561_v37 }
 0x1ce   : > { %v4023_v53 = vpop.permute.xlu0 %4022  ;;  %v4140_v20 = vpop.permute.xlu1 %4139 }
 0x1cf   : > { %v4203_v16 = vsel %vm4183_vm14, %v4182_v61, %v4023_v53 }
 0x1d2   : > { %v4044_v35 = vpop.permute.xlu0 %4043 }
 0x1d3   : > { %v4224_v21 = vsel %vm4204_vm15, %v4203_v16, %v4044_v35 }
 0x1d6   : > { %v4071_v29 = vpop.permute.xlu0 %4070 }
 0x1d7   : > { %v4245_v25 = vsel %vm4225_vm0, %v4224_v21, %v4071_v29 }
 0x1da   : > { %v4092_v18 = vpop.permute.xlu0 %4091 }
 0x1db   : > { %v4266_v31 = vsel %vm4246_vm1, %v4245_v25, %v4092_v18 }
 0x1dc   : > { %v4287_v42 = vsel %vm4267_vm2, %v4266_v31, %v5562_v58 }
 0x1dd   : > { %v4308_v22 = vsel %vm4288_vm4, %v4287_v42, %v4140_v20 }
 0x1de   : > { %v4138_v56 = vpop.permute.xlu0 %4137 }
 0x1df   : > { %v4306_v6 = vsel %vm4288_vm4, %v4285_v47, %v4138_v56 }
 0x1e2   : > { %v5565_v36 = vpop.permute.xlu0 %5564 }
 0x1e3   : > { %v5567_v51 = vunpack.i.h.bf16 %v5565_v36  ;;  %v5566_v39 = vunpack.i.l.bf16 %v5565_v36 }
 0x1e5   : > { %v4329_v5 = vsel %vm4309_vm7, %v4308_v22, %v5567_v51  ;;  %v4327_v3 = vsel %vm4309_vm7, %v4306_v6, %v5566_v39 }
 0x1e6   : > { %v5417_v57 = vcombine.low %v4327_v3, %v4329_v5 }
 0x1e8   : > { %5491 = vmatmul.mubr.msk.bf16.gmra.mrb[16].mxu0 %vm4370_vm9, %v5417_v57 }
 0x218   : > { %v4424_v7 = vpop.f32.mrb[0].mxu0 }
 0x219   : > { %v5476_v26 = vpop.f32.mrb[1].mxu0 }
 0x21a   : > { %v4427_v28 = vpop.f32.mrb[2].mxu0 }
 0x21b   : > { %v4470_v46 = vmul.f32 %v6656_v54, %v4427_v28  ;;  %v5477_v0 = vpop.f32.mrb[3].mxu0 }
 0x21d   : > { %v4486_v32 = vadd.f32 %v6661_v33, %v4470_v46 }
 0x21f   : > { %v4496_v12 = vmax.f32 %v4486_v32, 0.0 }
 0x220   : > { %v4432_v41 = vpop.f32.mrb[4].mxu0 }
 0x221   : > { %v4577_v60 = vpack.c.bf16 %v4496_v12, %v4496_v12  ;;  %v4471_v38 = vmul.f32 %v6656_v54, %v4432_v41  ;;  %v5480_v34 = vpop.f32.mrb[5].mxu0 }
 0x222   : > { %v4435_v8 = vpop.f32.mrb[6].mxu0 }
 0x223   : > { %v4605_v1 = vshrl.u32 %v4577_v60, 16  ;;  %v4487_v40 = vadd.f32 %v6661_v33, %v4471_v38  ;;  %v4472_v55 = vmul.f32 %v6656_v54, %v4435_v8  ;;  %v5481_v50 = vpop.f32.mrb[7].mxu0  ;;  %v4608_v43 = vshll.u32 %v4577_v60, 16 }
 0x225   : > { %v4607_v52 = vrot.slane %v4605_v1, 7  ;;  %v4497_v10 = vmax.f32 %v4487_v40, 0.0  ;;  %v4488_v9 = vadd.f32 %v6661_v33, %v4472_v55  ;;  %v5571_v40 = vld [vmem:[%s7009_s6] sm:$0xff]  }
 0x226   : > { %5494 = vmatprep.subr.bf16.mxu1 %v5571_v40 }
 0x227   : > { %v4610_v62 = vor.u32 %v4608_v43, %v4607_v52  ;;  %v4578_v59 = vpack.c.bf16 %v4497_v10, %v4497_v10  ;;  %v4498_v14 = vmax.f32 %v4488_v9, 0.0  ;;  %5495 = vmatpush3.bf16.msra.mxu1 %v5571_v40  ;;  %v5572_v10 = vld [vmem:[%s7009_s6 + $0x8] sm:$0xff]  }
 0x228   : > { %5496 = vmatprep.subr.bf16.mxu1 %v5572_v10 }
 0x229   : > { %v4678_v11 = vsel %vm5688_vm3, 0, %v4610_v62  ;;  %v4612_v30 = vshrl.u32 %v4578_v59, 16  ;;  %v4579_v53 = vpack.c.bf16 %v4498_v14, %v4498_v14  ;;  %v4615_v35 = vshll.u32 %v4578_v59, 16  ;;  %v5573_v59 = vld [vmem:[%s7009_s6 + $0x10] sm:$0xff]  }
 0x22a   : > { %v6673_v17 = vsel %vm5692_vm5, %v4678_v11, 0 }
 0x22b   : > { %4802 = vrot.lane.b32.xlu1 %v6673_v17, %s5607_s20  ;;  %v4614_v24 = vrot.slane %v4612_v30, 7  ;;  %v4778_v15 = vrot.slane %v6673_v17, 1  ;;  %v4707_v27 = vshll.u32 %v6673_v17, 16  ;;  %v4619_v29 = vshrl.u32 %v4579_v53, 16  ;;  %5497 = vmatpush3.bf16.msra.mxu1 %v5572_v10  ;;  %v5574_v30 = vld [vmem:[%s7009_s6 + $0x18] sm:$0xff]  }
 0x22c   : > { %v4705_v61 = vshrl.u32 %v6673_v17, 16  ;;  %v4622_v21 = vshll.u32 %v4579_v53, 16  ;;  %5498 = vmatprep.subr.bf16.mxu1 %v5573_v59 }
 0x22d   : > { %v4617_v49 = vor.u32 %v4615_v35, %v4614_v24  ;;  %4787 = vrot.lane.b32.xlu0 %v4778_v15, %s5605_s18  ;;  %v4709_v45 = vrot.slane %v4707_v27, 1  ;;  %v4621_v48 = vrot.slane %v4619_v29, 7 }
 0x22f   : > { %4842 = vrot.lane.b32.xlu1 %v4778_v15, %s5614_s17  ;;  %v4710_v18 = vor.u32 %v4709_v45, %v4705_v61  ;;  %v4679_v16 = vsel %vm5688_vm3, 0, %v4617_v49  ;;  %v4624_v58 = vor.u32 %v4622_v21, %v4621_v48  ;;  %5499 = vmatpush3.bf16.msra.mxu1 %v5573_v59  ;;  %v5575_v15 = vld [vmem:[%s7009_s6 + $0x20] ss:$0 sps:$4 sm:$0xff]   ;;  %v6781_v48 = vpop.permute.xlu0 %4873 }
 0x230   : > { %v6688_v23 = vsel %vm5692_vm5, %v4679_v16, 0  ;;  %5500 = vmatprep.subr.bf16.mxu1 %v5574_v30  ;;  %v5109_v29 = vsel %vm5107_vm10, %v5575_v15, 0  ;;  %v6779_v16 = vpop.permute.xlu1 %4753 }
 0x231   : > { %4755 = vrot.lane.b32.xlu0 %v4710_v18, %s5603_s16  ;;  %v4779_v25 = vrot.slane %v6688_v23, 1  ;;  %v4680_v31 = vsel %vm5688_vm3, 0, %v4624_v58  ;;  %v4714_v37 = vshll.u32 %v6688_v23, 16  ;;  %v4712_v19 = vshrl.u32 %v6688_v23, 16 }
 0x232   : > { %v6701_v56 = vsel %vm5692_vm5, %v4680_v31, 0 }
 0x233   : > { %4825 = vrot.lane.b32.xlu1 %v4710_v18, %s5608_s21  ;;  %v4780_v44 = vrot.slane %v6701_v56, 1  ;;  %v4716_v20 = vrot.slane %v4714_v37, 1  ;;  %v4721_v42 = vshll.u32 %v6701_v56, 16  ;;  %v4719_v51 = vshrl.u32 %v6701_v56, 16  ;;  %5501 = vmatpush3.bf16.msra.mxu1 %v5574_v30  ;;  %v6786_v37 = vpop.permute.xlu0 %4896 }
 0x234   : > { %5512 = vmatprep.subr.msk.bf16.mxu1 %vm5107_vm10, %v5575_v15  ;;  %v6783_v21 = vpop.permute.xlu1 %4785 }
 0x235   : > { %4804 = vrot.lane.b32.xlu0 %v6688_v23, %s5607_s20  ;;  %v4717_v36 = vor.u32 %v4716_v20, %v4712_v19  ;;  %v4723_v47 = vrot.slane %v4721_v42, 1 }
 0x237   : > { %4859 = vrot.lane.b32.xlu1 %v6688_v23, %s5612_s2  ;;  %v4724_v39 = vor.u32 %v4723_v47, %v4719_v51  ;;  %5503 = vmatpush3.bf16.msra.mxu1 %v5109_v29 }
 0x239   : > { %4844 = vrot.lane.b32.xlu0 %v4779_v25, %s5614_s17 }
 0x23b   : > { %4789 = vrot.lane.b32.xlu1 %v4779_v25, %s5605_s18 }
 0x23d   : > { %4861 = vrot.lane.b32.xlu0 %v6701_v56, %s5612_s2 }
 0x23f   : > { %4806 = vrot.lane.b32.xlu1 %v6701_v56, %s5607_s20 }
 0x241   : > { %4791 = vrot.lane.b32.xlu0 %v4780_v44, %s5605_s18 }
 0x243   : > { %4899 = vrot.lane.b32.xlu1 %v4779_v25, %s5615_s19 }
 0x245   : > { %4901 = vrot.lane.b32.xlu0 %v4780_v44, %s5615_s19 }
 0x247   : > { %4846 = vrot.lane.b32.xlu1 %v4780_v44, %s5614_s17 }
 0x249   : > { %4827 = vrot.lane.b32.xlu0 %v4717_v36, %s5608_s21 }
 0x24b   : > { %4757 = vrot.lane.b32.xlu1 %v4717_v36, %s5603_s16 }
 0x24d   : > { %4759 = vrot.lane.b32.xlu0 %v4724_v39, %s5603_s16 }
 0x24f   : > { %4882 = vrot.lane.b32.xlu1 %v4717_v36, %s5613_s11 }
 0x253   : > { %v4440_v22 = vpop.f32.mrb[8].mxu0  ;;  %4829 = vrot.lane.b32.xlu1 %v4724_v39, %s5608_s21 }
 0x254   : > { %v4473_v6 = vmul.f32 %v6656_v54, %v4440_v22  ;;  %v5484_v5 = vpop.f32.mrb[9].mxu0 }
 0x255   : > { %v4443_v3 = vpop.f32.mrb[10].mxu0 }
 0x256   : > { %v4489_v57 = vadd.f32 %v6661_v33, %v4473_v6  ;;  %v4474_v7 = vmul.f32 %v6656_v54, %v4443_v3  ;;  %v5485_v26 = vpop.f32.mrb[11].mxu0 }
 0x258   : > { %v4499_v28 = vmax.f32 %v4489_v57, 0.0  ;;  %v4490_v46 = vadd.f32 %v6661_v33, %v4474_v7 }
 0x25a   : > { %v4580_v0 = vpack.c.bf16 %v4499_v28, %v4499_v28  ;;  %v4500_v32 = vmax.f32 %v4490_v46, 0.0 }
 0x25c   : > { %v4626_v12 = vshrl.u32 %v4580_v0, 16  ;;  %v4581_v41 = vpack.c.bf16 %v4500_v32, %v4500_v32  ;;  %v4629_v38 = vshll.u32 %v4580_v0, 16 }
 0x25e   : > { %v4628_v60 = vrot.slane %v4626_v12, 7  ;;  %v4633_v8 = vshrl.u32 %v4581_v41, 16  ;;  %v4636_v52 = vshll.u32 %v4581_v41, 16 }
 0x260   : > { %v4631_v34 = vor.u32 %v4629_v38, %v4628_v60  ;;  %v4635_v50 = vrot.slane %v4633_v8, 7 }
 0x262   : > { %v4681_v1 = vsel %vm5688_vm3, 0, %v4631_v34  ;;  %v4638_v9 = vor.u32 %v4636_v52, %v4635_v50 }
 0x263   : > { %v6732_v55 = vsel %vm5692_vm5, %v4681_v1, 0 }
 0x264   : > { %4863 = vrot.lane.b32.xlu1 %v6732_v55, %s5612_s2  ;;  %4808 = vrot.lane.b32.xlu0 %v6732_v55, %s5607_s20  ;;  %v4781_v43 = vrot.slane %v6732_v55, 1  ;;  %v4682_v62 = vsel %vm5688_vm3, 0, %v4638_v9  ;;  %v4728_v14 = vshll.u32 %v6732_v55, 16  ;;  %v4726_v35 = vshrl.u32 %v6732_v55, 16 }
 0x265   : > { %v6754_v11 = vsel %vm5692_vm5, %v4682_v62, 0 }
 0x266   : > { %v4782_v53 = vrot.slane %v6754_v11, 1  ;;  %v4730_v24 = vrot.slane %v4728_v14, 1  ;;  %v4735_v49 = vshll.u32 %v6754_v11, 16  ;;  %v4733_v45 = vshrl.u32 %v6754_v11, 16 }
 0x268   : > { %4884 = vrot.lane.b32.xlu0 %v4724_v39, %s5613_s11  ;;  %4903 = vrot.lane.b32.xlu1 %v4781_v43, %s5615_s19  ;;  %v4731_v27 = vor.u32 %v4730_v24, %v4726_v35  ;;  %v4737_v61 = vrot.slane %v4735_v49, 1 }
 0x26a   : > { %v4738_v18 = vor.u32 %v4737_v61, %v4733_v45 }
 0x26c   : > { %4793 = vrot.lane.b32.xlu1 %v4781_v43, %s5605_s18  ;;  %4848 = vrot.lane.b32.xlu0 %v4781_v43, %s5614_s17 }
 0x270   : > { %4810 = vrot.lane.b32.xlu1 %v6754_v11, %s5607_s20  ;;  %4865 = vrot.lane.b32.xlu0 %v6754_v11, %s5612_s2 }
 0x274   : > { %4850 = vrot.lane.b32.xlu1 %v4782_v53, %s5614_s17  ;;  %4905 = vrot.lane.b32.xlu0 %v4782_v53, %s5615_s19 }
 0x278   : > { %4886 = vrot.lane.b32.xlu1 %v4731_v27, %s5613_s11  ;;  %4795 = vrot.lane.b32.xlu0 %v4782_v53, %s5605_s18 }
 0x27c   : > { %4761 = vrot.lane.b32.xlu1 %v4731_v27, %s5603_s16  ;;  %4831 = vrot.lane.b32.xlu0 %v4731_v27, %s5608_s21 }
 0x280   : > { %4833 = vrot.lane.b32.xlu1 %v4738_v18, %s5608_s21  ;;  %4888 = vrot.lane.b32.xlu0 %v4738_v18, %s5613_s11 }
 0x284   : > { %4763 = vrot.lane.b32.xlu0 %v4738_v18, %s5603_s16 }
 0x29d   : > { %v4448_v58 = vpop.f32.mrb[12].mxu0  ;;  %v6790_v36 = vpop.permute.xlu1 %4802 }
 0x29e   : > { %v4475_v25 = vmul.f32 %v6656_v54, %v4448_v58  ;;  %v5488_v31 = vpop.f32.mrb[13].mxu0 }
 0x29f   : > { %v4451_v44 = vpop.f32.mrb[14].mxu0  ;;  %v6793_v6 = vpop.permute.xlu0 %4787 }
 0x2a0   : > { %v4491_v20 = vadd.f32 %v6661_v33, %v4475_v25  ;;  %v4476_v42 = vmul.f32 %v6656_v54, %v4451_v44  ;;  %v5489_v19 = vpop.f32.mrb[15].mxu0 }
 0x2a1   : > { %v6795_v5 = vpop.permute.xlu1 %4842 }
 0x2a2   : > { %v4501_v47 = vmax.f32 %v4491_v20, 0.0  ;;  %v4492_v51 = vadd.f32 %v6661_v33, %v4476_v42 }
 0x2a3   : > { %v6799_v12 = vpop.permute.xlu0 %4755 }
 0x2a4   : > { %v4582_v39 = vpack.c.bf16 %v4501_v47, %v4501_v47  ;;  %v4502_v22 = vmax.f32 %v4492_v51, 0.0  ;;  %v4918_v4 = vsel %vm4183_vm14, %v6673_v17, %v6799_v12 }
 0x2a5   : > { %v6797_v46 = vpop.permute.xlu1 %4825 }
 0x2a6   : > { %v4640_v3 = vshrl.u32 %v4582_v39, 16  ;;  %v4583_v57 = vpack.c.bf16 %v4502_v22, %v4502_v22  ;;  %v4643_v26 = vshll.u32 %v4582_v39, 16 }
 0x2a7   : > { %v6813_v1 = vpop.permute.xlu0 %4804 }
 0x2a8   : > { %v4642_v7 = vrot.slane %v4640_v3, 7  ;;  %v4647_v28 = vshrl.u32 %v4583_v57, 16  ;;  %v4650_v41 = vshll.u32 %v4583_v57, 16 }
 0x2a9   : > { %v6807_v34 = vpop.permute.xlu1 %4859 }
 0x2aa   : > { %v4645_v0 = vor.u32 %v4643_v26, %v4642_v7  ;;  %v4649_v32 = vrot.slane %v4647_v28, 7 }
 0x2ab   : > { %v6826_v10 = vpop.permute.xlu0 %4844 }
 0x2ac   : > { %v4683_v60 = vsel %vm5688_vm3, 0, %v4645_v0  ;;  %v4652_v8 = vor.u32 %v4650_v41, %v4649_v32  ;;  %v4916_v0 = vsel %vm4183_vm14, %v6601_v63, %v6779_v16  ;;  %v4934_v16 = vsel %vm4225_vm0, %v4918_v4, %v6793_v6 }
 0x2ad   : > { %v6805_v38 = vsel %vm5692_vm5, %v4683_v60, 0  ;;  %v6816_v50 = vpop.permute.xlu1 %4789  ;;  %v4932_v60 = vsel %vm4225_vm0, %v4916_v0, %v6783_v21 }
 0x2ae   : > { %4867 = vrot.lane.b32.xlu1 %v6805_v38, %s5612_s2  ;;  %4812 = vrot.lane.b32.xlu0 %v6805_v38, %s5607_s20  ;;  %v4783_v40 = vrot.slane %v6805_v38, 1  ;;  %v4684_v52 = vsel %vm5688_vm3, 0, %v4652_v8  ;;  %v4742_v59 = vshll.u32 %v6805_v38, 16  ;;  %v4740_v45 = vshrl.u32 %v6805_v38, 16 }
 0x2af   : > { %v6824_v43 = vsel %vm5692_vm5, %v4684_v52, 0  ;;  %v6840_v53 = vpop.permute.xlu0 %4861 }
 0x2b0   : > { %v4784_v62 = vrot.slane %v6824_v43, 1  ;;  %v4744_v15 = vrot.slane %v4742_v59, 1  ;;  %v4749_v27 = vshll.u32 %v6824_v43, 16  ;;  %v4950_v59 = vsel %vm4267_vm2, %v4934_v16, %v6813_v1 }
 0x2b1   : > { %v6828_v9 = vpop.permute.xlu1 %4806 }
 0x2b2   : > { %4797 = vrot.lane.b32.xlu1 %v4783_v40, %s5605_s18  ;;  %4852 = vrot.lane.b32.xlu0 %v4783_v40, %s5614_s17  ;;  %v4745_v25 = vor.u32 %v4744_v15, %v4740_v45  ;;  %v4751_v31 = vrot.slane %v4749_v27, 1 }
 0x2b5   : > { %v6836_v14 = vpop.permute.xlu1 %4899 }
 0x2b6   : > { %4814 = vrot.lane.b32.xlu1 %v6824_v43, %s5607_s20  ;;  %4869 = vrot.lane.b32.xlu0 %v6824_v43, %s5612_s2 }
 0x2b9   : > { %v6848_v18 = vpop.permute.xlu1 %4846 }
 0x2ba   : > { %4907 = vrot.lane.b32.xlu1 %v4783_v40, %s5615_s19  ;;  %4799 = vrot.lane.b32.xlu0 %v4784_v62, %s5605_s18 }
 0x2bb   : > { %v4456_v30 = vpop.f32.mrb[16].mxu0 }
 0x2bc   : > { %v4477_v24 = vmul.f32 %v6656_v54, %v4456_v30  ;;  %v5492_v35 = vpop.f32.mrb[17].mxu0  ;;  %v6850_v54 = vpop.permute.xlu0 %4791 }
 0x2bd   : > { %v4459_v49 = vpop.f32.mrb[18].mxu0  ;;  %v4758_v19 = vpop.permute.xlu1 %4757 }
 0x2be   : > { %v4493_v29 = vadd.f32 %v6661_v33, %v4477_v24  ;;  %4854 = vrot.lane.b32.xlu1 %v4784_v62, %s5614_s17  ;;  %v5493_v61 = vpop.f32.mrb[19].mxu0  ;;  %4909 = vrot.lane.b32.xlu0 %v4784_v62, %s5615_s19  ;;  %v4747_v33 = vshrl.u32 %v6824_v43, 16  ;;  %v4948_v62 = vsel %vm4267_vm2, %v4932_v60, %v6790_v36  ;;  %v4920_v45 = vsel %vm4183_vm14, %v6688_v23, %v4758_v19 }
 0x2bf   : > { %v4964_v17 = vsel %vm4309_vm7, %v4948_v62, %v6797_v46 }
 0x2c0   : > { %v4503_v58 = vmax.f32 %v4493_v29, 0.0  ;;  %v4752_v42 = vor.u32 %v4751_v31, %v4747_v33  ;;  %v4902_v39 = vpop.permute.xlu0 %4901 }
 0x2c1   : > { %v4883_v7 = vpop.permute.xlu1 %4882 }
 0x2c2   : > { %v4584_v44 = vpack.c.bf16 %v4503_v58, %v4503_v58  ;;  %4765 = vrot.lane.b32.xlu1 %v4745_v25, %s5603_s16  ;;  %4835 = vrot.lane.b32.xlu0 %v4745_v25, %s5608_s21  ;;  %v4936_v58 = vsel %vm4225_vm0, %v4920_v45, %v6816_v50 }
 0x2c4   : > { %v4654_v20 = vshrl.u32 %v4584_v44, 16  ;;  %v4657_v51 = vshll.u32 %v4584_v44, 16  ;;  %v4828_v28 = vpop.permute.xlu0 %4827  ;;  %v4952_v44 = vsel %vm4267_vm2, %v4936_v58, %v6828_v9 }
 0x2c5   : > { %v4830_v8 = vpop.permute.xlu1 %4829  ;;  %v4966_v21 = vsel %vm4309_vm7, %v4950_v59, %v4828_v28 }
 0x2c6   : > { %v4656_v47 = vrot.slane %v4654_v20, 7  ;;  %4890 = vrot.lane.b32.xlu1 %v4745_v25, %s5613_s11  ;;  %4767 = vrot.lane.b32.xlu0 %v4752_v42, %s5603_s16  ;;  %v4968_v33 = vsel %vm4309_vm7, %v4952_v44, %v4830_v8 }
 0x2c8   : > { %v4659_v22 = vor.u32 %v4657_v51, %v4656_v47  ;;  %v4760_v52 = vpop.permute.xlu0 %4759 }
 0x2ca   : > { %4837 = vrot.lane.b32.xlu1 %v4752_v42, %s5608_s21  ;;  %v4685_v3 = vsel %vm5688_vm3, 0, %v4659_v22  ;;  %vm4979_vm3 = vcmask 326656  }
 0x2cb   : > { %v4695_v57 = vsel %vm5692_vm5, %v4685_v3, 0  ;;  %vm4996_vm5 = vcmask 392192   ;;  %v4981_v36 = vsel %vm4979_vm3, %v4964_v17, %v6795_v5  ;;  %v4983_v1 = vsel %vm4979_vm3, %v4966_v21, %v6826_v10 }
 0x2cc   : > { %4816 = vrot.lane.b32.xlu0 %v4695_v57, %s5607_s20  ;;  %v4821_v26 = vshll.u32 %v4695_v57, 16  ;;  %v4819_v32 = vshrl.u32 %v4695_v57, 16  ;;  %v4841_v40 = vrot.slane %v4695_v57, 1  ;;  %v4998_v46 = vsel %vm4996_vm5, %v4981_v36, %v6807_v34 }
 0x2cd   : > { %v5015_v30 = vsel %vm5013_vm11, %v4998_v46, %v4883_v7  ;;  %v5000_v35 = vsel %vm4996_vm5, %v4983_v1, %v6840_v53  ;;  %v4985_v50 = vsel %vm4979_vm3, %v4968_v33, %v6848_v18 }
 0x2ce   : > { %4871 = vrot.lane.b32.xlu1 %v4695_v57, %s5612_s2  ;;  %v4823_v41 = vrot.slane %v4821_v26, 1  ;;  %v5032_v10 = vsel %vm5030_vm12, %v5015_v30, %v6836_v14  ;;  %v4922_v14 = vsel %vm4183_vm14, %v6701_v56, %v4760_v52  ;;  %s5449_s2 = sshll.u32 %s7030_s28, 6 }
 0x2cf   : > { %v4938_v20 = vsel %vm4225_vm0, %v4922_v14, %v6850_v54 }
 0x2d0   : > { %4892 = vrot.lane.b32.xlu0 %v4752_v42, %s5613_s11  ;;  %v4824_v2 = vor.u32 %v4823_v41, %v4819_v32 }
 0x2d2   : > { %4894 = vrot.lane.b32.xlu1 %v4824_v2, %s5613_s11 }
 0x2d4   : > { %4856 = vrot.lane.b32.xlu0 %v4841_v40, %s5614_s17  ;;  %s6976_s17 = scalar_lea.vmem %s7012_s9, %s5449_s2 }
 0x2d6   : > { %4911 = vrot.lane.b32.xlu1 %v4841_v40, %s5615_s19  ;;  %v4864_v6 = vpop.permute.xlu1 %4863  ;;  %v4809_v12 = vpop.permute.xlu0 %4808 }
 0x2d7   : > { %v4954_v23 = vsel %vm4267_vm2, %v4938_v20, %v4809_v12  ;;  %v5002_v51 = vsel %vm4996_vm5, %v4985_v50, %v4864_v6 }
 0x2d8   : > { %4839 = vrot.lane.b32.xlu0 %v4824_v2, %s5608_s21 }
 0x2da   : > { %v4904_v24 = vpop.permute.xlu1 %4903  ;;  %v4885_v15 = vpop.permute.xlu0 %4884 }
 0x2db   : > { %v5017_v5 = vsel %vm5013_vm11, %v5000_v35, %v4885_v15 }
 0x2dc   : > { %4913 = vrot.lane.b32.xlu0 %v4777_v13, %s5615_s19  ;;  %v5034_v27 = vsel %vm5030_vm12, %v5017_v5, %v4902_v39 }
 0x2dd   : > { %v5428_v34 = vcombine.low %v5032_v10, %v5034_v27 }
 0x2de   : > { %v4794_v49 = vpop.permute.xlu1 %4793  ;;  %v4849_v29 = vpop.permute.xlu0 %4848 }
 0x2df   : > { %5504 = vmatprep.mubr.msk.bf16.mxu1 %vm5094_vm13, %v5428_v34 }
 0x2e2   : > { %v4811_v61 = vpop.permute.xlu1 %4810  ;;  %v4866_v53 = vpop.permute.xlu0 %4865 }
 0x2e6   : > { %v4851_v63 = vpop.permute.xlu1 %4850  ;;  %v4906_v13 = vpop.permute.xlu0 %4905 }
 0x2ea   : > { %v4887_v25 = vpop.permute.xlu1 %4886  ;;  %v4796_v31 = vpop.permute.xlu0 %4795 }
 0x2eb   : > { %v5019_v54 = vsel %vm5013_vm11, %v5002_v51, %v4887_v25 }
 0x2ec   : > { %v5036_v26 = vsel %vm5030_vm12, %v5019_v54, %v4904_v24 }
 0x2ee   : > { %v4762_v42 = vpop.permute.xlu1 %4761  ;;  %v4832_v19 = vpop.permute.xlu0 %4831 }
 0x2ef   : > { %v4924_v56 = vsel %vm4183_vm14, %v6732_v55, %v4762_v42  ;;  %v4970_v47 = vsel %vm4309_vm7, %v4954_v23, %v4832_v19 }
 0x2f0   : > { %v4940_v9 = vsel %vm4225_vm0, %v4924_v56, %v4794_v49  ;;  %v4987_v39 = vsel %vm4979_vm3, %v4970_v47, %v4849_v29 }
 0x2f1   : > { %v4956_v22 = vsel %vm4267_vm2, %v4940_v9, %v4811_v61  ;;  %v5004_v3 = vsel %vm4996_vm5, %v4987_v39, %v4866_v53 }
 0x2f2   : > { %v4834_v57 = vpop.permute.xlu1 %4833  ;;  %v4889_v7 = vpop.permute.xlu0 %4888 }
 0x2f3   : > { %v4972_v18 = vsel %vm4309_vm7, %v4956_v22, %v4834_v57  ;;  %v5021_v55 = vsel %vm5013_vm11, %v5004_v3, %v4889_v7  ;;  %v5441_v3 = vld [vmem:[%s7010_s7] ss:$0 sm:$0xff] }
 0x2f4   : > { %v5038_v28 = vsel %vm5030_vm12, %v5021_v55, %v4906_v13  ;;  %v4989_v0 = vsel %vm4979_vm3, %v4972_v18, %v4851_v63 }
 0x2f5   : > { %v5429_v32 = vcombine.low %v5036_v26, %v5038_v28 }
 0x2f6   : > { %v4764_v41 = vpop.permute.xlu0 %4763 }
 0x2f7   : > { %5505 = vmatmul.mubr.msk.bf16.vlgmr.msra.gmra.mrb[0].mxu1 %vm5094_vm13, %v5429_v32  ;;  %v4926_v12 = vsel %vm4183_vm14, %v6754_v11, %v4764_v41 }
 0x2f8   : > { %v4942_v46 = vsel %vm4225_vm0, %v4926_v12, %v4796_v31 }
 0x320   : > { %v4868_v2 = vpop.permute.xlu1 %4867  ;;  %v4813_v4 = vpop.permute.xlu0 %4812 }
 0x321   : > { %v4958_v30 = vsel %vm4267_vm2, %v4942_v46, %v4813_v4  ;;  %v5006_v10 = vsel %vm4996_vm5, %v4989_v0, %v4868_v2 }
 0x324   : > { %v4798_v60 = vpop.permute.xlu1 %4797  ;;  %v4853_v8 = vpop.permute.xlu0 %4852 }
 0x328   : > { %v4815_v40 = vpop.permute.xlu1 %4814  ;;  %v4870_v16 = vpop.permute.xlu0 %4869 }
 0x32c   : > { %v4908_v52 = vpop.permute.xlu1 %4907  ;;  %v4800_v62 = vpop.permute.xlu0 %4799 }
 0x330   : > { %v4855_v59 = vpop.permute.xlu1 %4854  ;;  %v4910_v17 = vpop.permute.xlu0 %4909 }
 0x334   : > { %v4766_v21 = vpop.permute.xlu1 %4765  ;;  %v4836_v6 = vpop.permute.xlu0 %4835 }
 0x335   : > { %v4974_v24 = vsel %vm4309_vm7, %v4958_v30, %v4836_v6  ;;  %v4928_v11 = vsel %vm4183_vm14, %v6805_v38, %v4766_v21 }
 0x336   : > { %v4991_v5 = vsel %vm4979_vm3, %v4974_v24, %v4853_v8  ;;  %v4944_v63 = vsel %vm4225_vm0, %v4928_v11, %v4798_v60 }
 0x337   : > { %v5008_v49 = vsel %vm4996_vm5, %v4991_v5, %v4870_v16  ;;  %v4960_v38 = vsel %vm4267_vm2, %v4944_v63, %v4815_v40 }
 0x338   : > { %v4891_v36 = vpop.permute.xlu1 %4890  ;;  %v4768_v1 = vpop.permute.xlu0 %4767 }
 0x339   : > { %v5023_v34 = vsel %vm5013_vm11, %v5006_v10, %v4891_v36  ;;  %v4930_v58 = vsel %vm4183_vm14, %v6824_v43, %v4768_v1 }
 0x33a   : > { %v5040_v53 = vsel %vm5030_vm12, %v5023_v34, %v4908_v52  ;;  %v4946_v44 = vsel %vm4225_vm0, %v4930_v58, %v4800_v62 }
 0x33c   : > { %v4838_v35 = vpop.permute.xlu1 %4837 }
 0x33d   : > { %v4976_v31 = vsel %vm4309_vm7, %v4960_v38, %v4838_v35 }
 0x33e   : > { %v4817_v15 = vpop.permute.xlu0 %4816  ;;  %v4993_v42 = vsel %vm4979_vm3, %v4976_v31, %v4855_v59 }
 0x33f   : > { %v4962_v33 = vsel %vm4267_vm2, %v4946_v44, %v4817_v15 }
 0x340   : > { %v4872_v27 = vpop.permute.xlu1 %4871 }
 0x341   : > { %v5010_v50 = vsel %vm4996_vm5, %v4993_v42, %v4872_v27 }
 0x342   : > { %v4893_v29 = vpop.permute.xlu0 %4892 }
 0x343   : > { %v5025_v61 = vsel %vm5013_vm11, %v5008_v49, %v4893_v29 }
 0x344   : > { %v5042_v45 = vsel %vm5030_vm12, %v5025_v61, %v4910_v17  ;;  %v4895_v14 = vpop.permute.xlu1 %4894 }
 0x345   : > { %v5430_v13 = vcombine.low %v5040_v53, %v5042_v45  ;;  %v5027_v47 = vsel %vm5013_vm11, %v5010_v50, %v4895_v14 }
 0x346   : > { %v4857_v25 = vpop.permute.xlu0 %4856 }
 0x347   : > { %5508 = vmatprep.mubr.msk.bf16.mxu1 %vm5094_vm13, %v5430_v13 }
 0x348   : > { %v4912_v19 = vpop.permute.xlu1 %4911 }
 0x349   : > { %v5044_v39 = vsel %vm5030_vm12, %v5027_v47, %v4912_v19 }
 0x34a   : > { %v4840_v20 = vpop.permute.xlu0 %4839 }
 0x34b   : > { %v4978_v23 = vsel %vm4309_vm7, %v4962_v33, %v4840_v20 }
 0x34c   : > { %v4995_v43 = vsel %vm4979_vm3, %v4978_v23, %v4857_v25 }
 0x34d   : > { %v5012_v56 = vsel %vm4996_vm5, %v4995_v43, %v6781_v48  ;;  %v5442_v48 = vld [vmem:[%s7011_s8] ss:$0 sm:$0xff] }
 0x34e   : > { %v5029_v51 = vsel %vm5013_vm11, %v5012_v56, %v6786_v37  ;;  %v4914_v9 = vpop.permute.xlu0 %4913 }
 0x34f   : > { %v5046_v54 = vsel %vm5030_vm12, %v5029_v51, %v4914_v9 }
 0x350   : > { %v5431_v22 = vcombine.low %v5044_v39, %v5046_v54 }
 0x352   : > { %5509 = vmatmul.mubr.msk.bf16.gmra.mrb[4].mxu1 %vm5094_vm13, %v5431_v22 }
 0x3ca   : > { %v5506_v57 = vpop.f32.mrb[0].mxu1 }
 0x3cb   : > { %v5184_v7 = vmul.f32 %v5506_v57, %v5441_v3  ;;  %v5145_v37 = vpop.f32.mrb[1].mxu1 }
 0x3cc   : > { %v5182_v18 = vmul.f32 %v5441_v3, %v5145_v37  ;;  %v5507_v55 = vpop.f32.mrb[2].mxu1 }
 0x3cd   : > { %v5198_v26 = vadd.f32 %v5442_v48, %v5184_v7  ;;  %v5185_v28 = vmul.f32 %v5507_v55, %v5441_v3  ;;  %v5148_v0 = vpop.f32.mrb[3].mxu1 }
 0x3ce   : > { %v5196_v32 = vadd.f32 %v5442_v48, %v5182_v18  ;;  %v5183_v41 = vmul.f32 %v5441_v3, %v5148_v0 }
 0x3cf   : > { %v5206_v2 = vmax.f32 %v5198_v26, 0.0  ;;  %v5199_v4 = vadd.f32 %v5442_v48, %v5185_v28 }
 0x3d0   : > { %v5204_v60 = vmax.f32 %v5196_v32, 0.0  ;;  %v5197_v8 = vadd.f32 %v5442_v48, %v5183_v41 }
 0x3d1   : > { %5214 = vst.msk [vmem:[%s6976_s17 + $0x10] sm:$0xff] %vm4183_vm14, %v5206_v2  ;;  %v5207_v40 = vmax.f32 %v5199_v4, 0.0 }
 0x3d2   : > { %5212 = vst.msk [vmem:[%s6976_s17] sm:$0xff] %vm4183_vm14, %v5204_v60  ;;  %v5205_v16 = vmax.f32 %v5197_v8, 0.0 }
 0x3d3   : > { %5215 = vst.msk [vmem:[%s6976_s17 + $0x18] sm:$0xff] %vm4183_vm14, %v5207_v40 }
 0x3d4   : > { %5213 = vst.msk [vmem:[%s6976_s17 + $0x8] sm:$0xff] %vm4183_vm14, %v5205_v16 }
 0x425   : > { %v5510_v52 = vpop.f32.mrb[4].mxu1 }
 0x426   : > { %v5188_v62 = vmul.f32 %v5510_v52, %v5441_v3  ;;  %v5161_v59 = vpop.f32.mrb[5].mxu1 }
 0x427   : > { %v5186_v17 = vmul.f32 %v5441_v3, %v5161_v59  ;;  %v5511_v21 = vpop.f32.mrb[6].mxu1 }
 0x428   : > { %v5202_v6 = vadd.f32 %v5442_v48, %v5188_v62  ;;  %v5189_v12 = vmul.f32 %v5511_v21, %v5441_v3  ;;  %v5164_v36 = vpop.f32.mrb[7].mxu1 }
 0x429   : > { %v5200_v1 = vadd.f32 %v5442_v48, %v5186_v17  ;;  %v5187_v46 = vmul.f32 %v5441_v3, %v5164_v36 }
 0x42a   : > { %v5210_v30 = vmax.f32 %v5202_v6, 0.0  ;;  %v5203_v24 = vadd.f32 %v5442_v48, %v5189_v12 }
 0x42b   : > { %v5208_v35 = vmax.f32 %v5200_v1, 0.0  ;;  %v5201_v15 = vadd.f32 %v5442_v48, %v5187_v46 }
 0x42c   : > { %5218 = vst.msk [vmem:[%s6976_s17 + $0x30] sm:$0xff] %vm4183_vm14, %v5210_v30  ;;  %v5211_v5 = vmax.f32 %v5203_v24, 0.0 }
 0x42d   : > { %5216 = vst.msk [vmem:[%s6976_s17 + $0x20] sm:$0xff] %vm4183_vm14, %v5208_v35  ;;  %v5209_v10 = vmax.f32 %v5201_v15, 0.0 }
 0x42e   : > { %5219 = vst.msk [vmem:[%s6976_s17 + $0x38] sm:$0xff] %vm4183_vm14, %v5211_v5 }
 0x42f   : > { %5217 = vst.msk [vmem:[%s6976_s17 + $0x28] sm:$0xff] %vm4183_vm14, %v5209_v10 }
 0x430 PF: > { %s19_s30 = sadd.s32 1, %s5598_s30   ;;  %s7025_s28 = smov %s5594_s29 }
 0x431   : > { %p16_p5 = scmp.ge.s32.totalorder %s19_s30, 4   ;;  %s7026_s29 = smov %s7028_s10 }
 0x433   :  { %18 = sbr.rel (!%p16_p5) target bundleno = 2 (0x2), region = 92 }

</bundles_post_ra>
